<compile_context>
chip_gen: v6e
topology: v6e:2x2x1
jax: 0.10.0
libtpu: 0.0.40
codegen_flags: <defaults>
</compile_context>

<pallas_src>
import functools
import math

import jax
import jax.numpy as jnp
from jax import lax
from jax.experimental import pallas as pl
from jax.experimental.pallas import tpu as pltpu

BN_EPS = 1e-5


def _bn_relu_channel_rows(y, num_positions):
    """BatchNorm2d (training batch stats, gamma=1, beta=0) + ReLU.

    `y` is channel-major (D, M); stats are per channel (row) over all M
    positions, computed in ONE pass: var = E[y^2] - E[y]^2.
    """
    inv_m = 1.0 / num_positions
    mean = jnp.sum(y, axis=1, keepdims=True) * inv_m
    ex2 = jnp.sum(y * y, axis=1, keepdims=True) * inv_m
    var = jnp.maximum(ex2 - mean * mean, 0.0)
    return jnp.maximum((y - mean) * lax.rsqrt(var + BN_EPS), 0.0)


# -----------------------------------------------------------------------------
# Pallas kernel: entire TransformAttention forward in one invocation.
# Activations are channel-major (D, M), columns ordered (time, batch*node).
# -----------------------------------------------------------------------------
def _transform_attention_kernel(sp_ref, sh_ref, x_ref,
                                wqt_ref, wkt_ref, wvt_ref, wft_ref,
                                o_ref, *, num_heads, head_dim, t_pred, t_his,
                                groups, scale, matmul_dtype):
    D = num_heads * head_dim
    m_pred = float(t_pred * groups)
    m_his = float(t_his * groups)

    def proj(wt_ref, act_ref, m):
        # Full-D 1x1 conv on the MXU:  y_T = W^T @ x_T  -> (D, M), lane-dense in M.
        y = jnp.dot(wt_ref[...].astype(matmul_dtype),
                    act_ref[...].astype(matmul_dtype),
                    preferred_element_type=jnp.float32)
        return _bn_relu_channel_rows(y, m)

    q = proj(wqt_ref, sp_ref, m_pred)     # (D, Mp)
    k = proj(wkt_ref, sh_ref, m_his)      # (D, Mh)
    v = proj(wvt_ref, x_ref, m_his)       # (D, Mh)

    # (D, T*G) -> (D, T, G): the batch*node group axis stays on lanes.
    q3 = q.reshape(D, t_pred, groups)
    k3 = k.reshape(D, t_his, groups)
    v3 = v.reshape(D, t_his, groups)

    # Per-head cross-attention over time, statically unrolled over the d heads.
    # All work is VPU/EUP elementwise with groups on lanes; the tiny (t x t)
    # score matrices never become lane-sparse matmul operands.
    ctx_heads = []
    for h in range(num_heads):
        lo, hi = h * head_dim, (h + 1) * head_dim
        qh = q3[lo:hi]                                   # (K, tp, G)
        kh = k3[lo:hi]                                   # (K, th, G)
        vh = v3[lo:hi]                                   # (K, th, G)
        # scores: s[p, q, g] = sum_k qh[k, p, g] * kh[k, q, g]   (reduce leading dim)
        s = jnp.sum(qh[:, :, None, :] * kh[:, None, :, :], axis=0) * scale  # (tp, th, G)
        s = s - jnp.max(s, axis=1, keepdims=True)
        e = jnp.exp(s)
        denom = jnp.sum(e, axis=1, keepdims=True)
        p = e * pl.reciprocal(denom, approx=True)        # EUP reciprocal
        # context: c[k, p, g] = sum_q p[p, q, g] * vh[k, q, g]
        c = jnp.sum(p[None, :, :, :] * vh[:, None, :, :], axis=2)           # (K, tp, G)
        ctx_heads.append(c)

    # Merge heads back onto the channel axis (head h -> channels h*K:(h+1)*K).
    ctx = jnp.concatenate(ctx_heads, axis=0).reshape(D, t_pred * groups)    # (D, Mp)

    # Fused head-merge + final 1x1 conv as ONE full-D matmul, then BN + ReLU.
    y = jnp.dot(wft_ref[...].astype(matmul_dtype), ctx.astype(matmul_dtype),
                preferred_element_type=jnp.float32)
    o_ref[...] = _bn_relu_channel_rows(y, m_pred)


# -----------------------------------------------------------------------------
# Wrapper: layout plumbing (free XLA transposes/reshapes) + pallas_call.
# -----------------------------------------------------------------------------
def transform_attention(params, X, STE_his, STE_pred, *, K, d,
                        matmul_dtype=jnp.float32):
    B, t_his, N, D = X.shape
    _, t_pred, _, _ = STE_pred.shape
    assert D == K * d
    num_heads, head_dim = d, K           # split(.., K, dim=-1) -> d heads of width K
    scale = 1.0 / math.sqrt(d)           # reference scales by 1/sqrt(self._d)

    G = B * N
    Mp = t_pred * G
    Mh = t_his * G

    def to_channel_major(t, T):
        # (B, T, N, D) -> (D, T*B*N); columns ordered (time, batch, node).
        return jnp.transpose(t, (3, 1, 0, 2)).reshape(D, T * G)

    sp_t = to_channel_major(STE_pred, t_pred)
    sh_t = to_channel_major(STE_his, t_his)
    x_t = to_channel_major(X, t_his)

    # Params follow y = x @ W; channel-major kernel computes y_T = W^T @ x_T.
    wq_t = params["Wq"].T
    wk_t = params["Wk"].T
    wv_t = params["Wv"].T
    wf_t = params["Wf"].T

    # VMEM budget from actual buffer sizes (with headroom), capped for v7x (64 MiB
    # physical): never request the whole chip.
    f32 = 4
    slab_bytes = (2 * Mp + 2 * Mh) * D * f32 + 4 * D * D * f32
    vmem_budget = int(min(max(8 * slab_bytes, 4 << 20), 48 << 20))

    kernel = functools.partial(
        _transform_attention_kernel,
        num_heads=num_heads, head_dim=head_dim, t_pred=t_pred, t_his=t_his,
        groups=G, scale=scale, matmul_dtype=matmul_dtype)

    out_t = pl.pallas_call(
        kernel,
        out_shape=jax.ShapeDtypeStruct((D, Mp), jnp.float32),
        grid=(1,),
        in_specs=[
            pl.BlockSpec((D, Mp), lambda i: (0, 0)),
            pl.BlockSpec((D, Mh), lambda i: (0, 0)),
            pl.BlockSpec((D, Mh), lambda i: (0, 0)),
            pl.BlockSpec((D, D), lambda i: (0, 0)),
            pl.BlockSpec((D, D), lambda i: (0, 0)),
            pl.BlockSpec((D, D), lambda i: (0, 0)),
            pl.BlockSpec((D, D), lambda i: (0, 0)),
        ],
        out_specs=pl.BlockSpec((D, Mp), lambda i: (0, 0)),
        compiler_params=pltpu.CompilerParams(
            dimension_semantics=("arbitrary",),
            vmem_limit_bytes=vmem_budget,
        ),
    )(sp_t, sh_t, x_t, wq_t, wk_t, wv_t, wf_t)

    # (D, tp*B*N) -> (B, num_pred, N, D)
    return jnp.transpose(out_t.reshape(D, t_pred, B, N), (2, 1, 3, 0))


# -----------------------------------------------------------------------------
# Deterministic parameter init (xavier_uniform weights; biases zero -> dropped).
# -----------------------------------------------------------------------------
def init_params(key, K, d):
    D = K * d
    names = ["Wq", "Wk", "Wv", "Wf"]
    keys = jax.random.split(key, len(names))
    bound = math.sqrt(6.0 / (D + D))
    return {name: jax.random.uniform(kk, (D, D), jnp.float32, -bound, bound)
            for name, kk in zip(names, keys)}


if __name__ == "__main__":
    K, d = 4, 4                       # D = K*d = 16 attention channels
    D = K * d
    B, num_his, num_pred, N = 2, 8, 8, 16

    root = jax.random.PRNGKey(0)
    kx, kh, kp, kw = jax.random.split(root, 4)
    X = jax.random.normal(kx, (B, num_his, N, D), jnp.float32)
    STE_his = jax.random.normal(kh, (B, num_his, N, D), jnp.float32)
    STE_pred = jax.random.normal(kp, (B, num_pred, N, D), jnp.float32)
    params = init_params(kw, K, d)

    # matmul_dtype=jnp.bfloat16 is the recommended setting on v6e/v7x; float32
    # here for exact parity with the f32 torch reference.
    fwd = jax.jit(functools.partial(transform_attention, K=K, d=d,
                                    matmul_dtype=jnp.float32))
    out = fwd(params, X, STE_his, STE_pred)
    jax.block_until_ready(out)
    assert out.shape == (B, num_pred, N, D)
    assert bool(jnp.all(jnp.isfinite(out)))
    print("KERNEL_OK")
</pallas_src>

<mosaic_0001>
module attributes {stable_mosaic.version = 11 : i64} {
  func.func @_transform_attention_kernel(%arg0: i32, %arg1: memref<16x256xf32, #tpu.memory_space<vmem>>, %arg2: memref<16x256xf32, #tpu.memory_space<vmem>>, %arg3: memref<16x256xf32, #tpu.memory_space<vmem>>, %arg4: memref<16x16xf32, #tpu.memory_space<vmem>>, %arg5: memref<16x16xf32, #tpu.memory_space<vmem>>, %arg6: memref<16x16xf32, #tpu.memory_space<vmem>>, %arg7: memref<16x16xf32, #tpu.memory_space<vmem>>, %arg8: memref<16x256xf32, #tpu.memory_space<vmem>>) attributes {dimension_semantics = [#tpu.dimension_semantics<arbitrary>], iteration_bounds = array<i64: 1>, scalar_prefetch = 0 : i64, scratch_operands = 0 : i64, tpu.core_type = #tpu.core_type<tc>, window_params = [{pipeline_mode = #tpu.pipeline_mode<synchronous>, transform_indices = @transform_0, window_bounds = array<i64: 16, 256>}, {pipeline_mode = #tpu.pipeline_mode<synchronous>, transform_indices = @transform_1, window_bounds = array<i64: 16, 256>}, {pipeline_mode = #tpu.pipeline_mode<synchronous>, transform_indices = @transform_2, window_bounds = array<i64: 16, 256>}, {pipeline_mode = #tpu.pipeline_mode<synchronous>, transform_indices = @transform_3, window_bounds = array<i64: 16, 16>}, {pipeline_mode = #tpu.pipeline_mode<synchronous>, transform_indices = @transform_4, window_bounds = array<i64: 16, 16>}, {pipeline_mode = #tpu.pipeline_mode<synchronous>, transform_indices = @transform_5, window_bounds = array<i64: 16, 16>}, {pipeline_mode = #tpu.pipeline_mode<synchronous>, transform_indices = @transform_6, window_bounds = array<i64: 16, 16>}, {pipeline_mode = #tpu.pipeline_mode<synchronous>, transform_indices = @transform_7, window_bounds = array<i64: 16, 256>}]} {
    %c0 = arith.constant 0 : index
    %c0_0 = arith.constant 0 : index
    %0 = vector.load %arg4[%c0, %c0_0] : memref<16x16xf32, #tpu.memory_space<vmem>>, vector<16x16xf32>
    %c0_1 = arith.constant 0 : index
    %c0_2 = arith.constant 0 : index
    %1 = vector.load %arg1[%c0_1, %c0_2] : memref<16x256xf32, #tpu.memory_space<vmem>>, vector<16x256xf32>
    %cst = arith.constant dense<0.000000e+00> : vector<16x256xf32>
    %2 = tpu.matmul %0, %1, %cst {dimension_numbers = #tpu.dot_dimension_numbers<[1], [0], [0], [1], [0, 0, 1, 1], [], []>} : vector<16x16xf32>, vector<16x256xf32>, vector<16x256xf32> -> vector<16x256xf32>
    %cst_3 = arith.constant dense<0.000000e+00> : vector<16xf32>
    %3 = vector.multi_reduction <add>, %2, %cst_3 [1] : vector<16x256xf32> to vector<16xf32>
    %4 = vector.shape_cast %3 : vector<16xf32> to vector<16x1xf32>
    %cst_4 = arith.constant 3.906250e-03 : f32
    %5 = vector.broadcast %cst_4 : f32 to vector<16x1xf32>
    %6 = arith.mulf %4, %5 : vector<16x1xf32>
    %7 = arith.mulf %2, %2 : vector<16x256xf32>
    %cst_5 = arith.constant dense<0.000000e+00> : vector<16xf32>
    %8 = vector.multi_reduction <add>, %7, %cst_5 [1] : vector<16x256xf32> to vector<16xf32>
    %9 = vector.shape_cast %8 : vector<16xf32> to vector<16x1xf32>
    %cst_6 = arith.constant 3.906250e-03 : f32
    %10 = vector.broadcast %cst_6 : f32 to vector<16x1xf32>
    %11 = arith.mulf %9, %10 : vector<16x1xf32>
    %12 = arith.mulf %6, %6 : vector<16x1xf32>
    %13 = arith.subf %11, %12 : vector<16x1xf32>
    %cst_7 = arith.constant 0.000000e+00 : f32
    %14 = vector.broadcast %cst_7 : f32 to vector<16x1xf32>
    %15 = arith.maximumf %13, %14 : vector<16x1xf32>
    %16 = vector.broadcast %6 : vector<16x1xf32> to vector<16x256xf32>
    %17 = arith.subf %2, %16 : vector<16x256xf32>
    %cst_8 = arith.constant 9.99999974E-6 : f32
    %18 = vector.broadcast %cst_8 : f32 to vector<16x1xf32>
    %19 = arith.addf %15, %18 : vector<16x1xf32>
    %20 = math.rsqrt %19 : vector<16x1xf32>
    %21 = vector.broadcast %20 : vector<16x1xf32> to vector<16x256xf32>
    %22 = arith.mulf %17, %21 : vector<16x256xf32>
    %cst_9 = arith.constant 0.000000e+00 : f32
    %23 = vector.broadcast %cst_9 : f32 to vector<16x256xf32>
    %24 = arith.maximumf %22, %23 : vector<16x256xf32>
    %c0_10 = arith.constant 0 : index
    %c0_11 = arith.constant 0 : index
    %25 = vector.load %arg5[%c0_10, %c0_11] : memref<16x16xf32, #tpu.memory_space<vmem>>, vector<16x16xf32>
    %c0_12 = arith.constant 0 : index
    %c0_13 = arith.constant 0 : index
    %26 = vector.load %arg2[%c0_12, %c0_13] : memref<16x256xf32, #tpu.memory_space<vmem>>, vector<16x256xf32>
    %cst_14 = arith.constant dense<0.000000e+00> : vector<16x256xf32>
    %27 = tpu.matmul %25, %26, %cst_14 {dimension_numbers = #tpu.dot_dimension_numbers<[1], [0], [0], [1], [0, 0, 1, 1], [], []>} : vector<16x16xf32>, vector<16x256xf32>, vector<16x256xf32> -> vector<16x256xf32>
    %cst_15 = arith.constant dense<0.000000e+00> : vector<16xf32>
    %28 = vector.multi_reduction <add>, %27, %cst_15 [1] : vector<16x256xf32> to vector<16xf32>
    %29 = vector.shape_cast %28 : vector<16xf32> to vector<16x1xf32>
    %cst_16 = arith.constant 3.906250e-03 : f32
    %30 = vector.broadcast %cst_16 : f32 to vector<16x1xf32>
    %31 = arith.mulf %29, %30 : vector<16x1xf32>
    %32 = arith.mulf %27, %27 : vector<16x256xf32>
    %cst_17 = arith.constant dense<0.000000e+00> : vector<16xf32>
    %33 = vector.multi_reduction <add>, %32, %cst_17 [1] : vector<16x256xf32> to vector<16xf32>
    %34 = vector.shape_cast %33 : vector<16xf32> to vector<16x1xf32>
    %cst_18 = arith.constant 3.906250e-03 : f32
    %35 = vector.broadcast %cst_18 : f32 to vector<16x1xf32>
    %36 = arith.mulf %34, %35 : vector<16x1xf32>
    %37 = arith.mulf %31, %31 : vector<16x1xf32>
    %38 = arith.subf %36, %37 : vector<16x1xf32>
    %cst_19 = arith.constant 0.000000e+00 : f32
    %39 = vector.broadcast %cst_19 : f32 to vector<16x1xf32>
    %40 = arith.maximumf %38, %39 : vector<16x1xf32>
    %41 = vector.broadcast %31 : vector<16x1xf32> to vector<16x256xf32>
    %42 = arith.subf %27, %41 : vector<16x256xf32>
    %cst_20 = arith.constant 9.99999974E-6 : f32
    %43 = vector.broadcast %cst_20 : f32 to vector<16x1xf32>
    %44 = arith.addf %40, %43 : vector<16x1xf32>
    %45 = math.rsqrt %44 : vector<16x1xf32>
    %46 = vector.broadcast %45 : vector<16x1xf32> to vector<16x256xf32>
    %47 = arith.mulf %42, %46 : vector<16x256xf32>
    %cst_21 = arith.constant 0.000000e+00 : f32
    %48 = vector.broadcast %cst_21 : f32 to vector<16x256xf32>
    %49 = arith.maximumf %47, %48 : vector<16x256xf32>
    %c0_22 = arith.constant 0 : index
    %c0_23 = arith.constant 0 : index
    %50 = vector.load %arg6[%c0_22, %c0_23] : memref<16x16xf32, #tpu.memory_space<vmem>>, vector<16x16xf32>
    %c0_24 = arith.constant 0 : index
    %c0_25 = arith.constant 0 : index
    %51 = vector.load %arg3[%c0_24, %c0_25] : memref<16x256xf32, #tpu.memory_space<vmem>>, vector<16x256xf32>
    %cst_26 = arith.constant dense<0.000000e+00> : vector<16x256xf32>
    %52 = tpu.matmul %50, %51, %cst_26 {dimension_numbers = #tpu.dot_dimension_numbers<[1], [0], [0], [1], [0, 0, 1, 1], [], []>} : vector<16x16xf32>, vector<16x256xf32>, vector<16x256xf32> -> vector<16x256xf32>
    %cst_27 = arith.constant dense<0.000000e+00> : vector<16xf32>
    %53 = vector.multi_reduction <add>, %52, %cst_27 [1] : vector<16x256xf32> to vector<16xf32>
    %54 = vector.shape_cast %53 : vector<16xf32> to vector<16x1xf32>
    %cst_28 = arith.constant 3.906250e-03 : f32
    %55 = vector.broadcast %cst_28 : f32 to vector<16x1xf32>
    %56 = arith.mulf %54, %55 : vector<16x1xf32>
    %57 = arith.mulf %52, %52 : vector<16x256xf32>
    %cst_29 = arith.constant dense<0.000000e+00> : vector<16xf32>
    %58 = vector.multi_reduction <add>, %57, %cst_29 [1] : vector<16x256xf32> to vector<16xf32>
    %59 = vector.shape_cast %58 : vector<16xf32> to vector<16x1xf32>
    %cst_30 = arith.constant 3.906250e-03 : f32
    %60 = vector.broadcast %cst_30 : f32 to vector<16x1xf32>
    %61 = arith.mulf %59, %60 : vector<16x1xf32>
    %62 = arith.mulf %56, %56 : vector<16x1xf32>
    %63 = arith.subf %61, %62 : vector<16x1xf32>
    %cst_31 = arith.constant 0.000000e+00 : f32
    %64 = vector.broadcast %cst_31 : f32 to vector<16x1xf32>
    %65 = arith.maximumf %63, %64 : vector<16x1xf32>
    %66 = vector.broadcast %56 : vector<16x1xf32> to vector<16x256xf32>
    %67 = arith.subf %52, %66 : vector<16x256xf32>
    %cst_32 = arith.constant 9.99999974E-6 : f32
    %68 = vector.broadcast %cst_32 : f32 to vector<16x1xf32>
    %69 = arith.addf %65, %68 : vector<16x1xf32>
    %70 = math.rsqrt %69 : vector<16x1xf32>
    %71 = vector.broadcast %70 : vector<16x1xf32> to vector<16x256xf32>
    %72 = arith.mulf %67, %71 : vector<16x256xf32>
    %cst_33 = arith.constant 0.000000e+00 : f32
    %73 = vector.broadcast %cst_33 : f32 to vector<16x256xf32>
    %74 = arith.maximumf %72, %73 : vector<16x256xf32>
    %75 = vector.shape_cast %24 : vector<16x256xf32> to vector<16x8x32xf32>
    %76 = vector.shape_cast %49 : vector<16x256xf32> to vector<16x8x32xf32>
    %77 = vector.shape_cast %74 : vector<16x256xf32> to vector<16x8x32xf32>
    %78 = vector.extract_strided_slice %75 {offsets = [0, 0, 0], sizes = [4, 8, 32], strides = [1, 1, 1]} : vector<16x8x32xf32> to vector<4x8x32xf32>
    %79 = vector.extract_strided_slice %76 {offsets = [0, 0, 0], sizes = [4, 8, 32], strides = [1, 1, 1]} : vector<16x8x32xf32> to vector<4x8x32xf32>
    %80 = vector.extract_strided_slice %77 {offsets = [0, 0, 0], sizes = [4, 8, 32], strides = [1, 1, 1]} : vector<16x8x32xf32> to vector<4x8x32xf32>
    %81 = vector.shape_cast %78 : vector<4x8x32xf32> to vector<4x8x1x32xf32>
    %82 = vector.shape_cast %79 : vector<4x8x32xf32> to vector<4x1x8x32xf32>
    %83 = vector.broadcast %81 : vector<4x8x1x32xf32> to vector<4x8x8x32xf32>
    %84 = vector.broadcast %82 : vector<4x1x8x32xf32> to vector<4x8x8x32xf32>
    %85 = arith.mulf %83, %84 : vector<4x8x8x32xf32>
    %cst_34 = arith.constant dense<0.000000e+00> : vector<8x8x32xf32>
    %86 = vector.multi_reduction <add>, %85, %cst_34 [0] : vector<4x8x8x32xf32> to vector<8x8x32xf32>
    %cst_35 = arith.constant 5.000000e-01 : f32
    %87 = vector.broadcast %cst_35 : f32 to vector<8x8x32xf32>
    %88 = arith.mulf %86, %87 : vector<8x8x32xf32>
    %cst_36 = arith.constant dense<0xFF800000> : vector<8x32xf32>
    %89 = vector.multi_reduction <maximumf>, %88, %cst_36 [1] : vector<8x8x32xf32> to vector<8x32xf32>
    %90 = vector.shape_cast %89 : vector<8x32xf32> to vector<8x1x32xf32>
    %91 = vector.broadcast %90 : vector<8x1x32xf32> to vector<8x8x32xf32>
    %92 = arith.subf %88, %91 : vector<8x8x32xf32>
    %93 = math.exp %92 : vector<8x8x32xf32>
    %cst_37 = arith.constant dense<0.000000e+00> : vector<8x32xf32>
    %94 = vector.multi_reduction <add>, %93, %cst_37 [1] : vector<8x8x32xf32> to vector<8x32xf32>
    %95 = vector.shape_cast %94 : vector<8x32xf32> to vector<8x1x32xf32>
    %96 = tpu.reciprocal %95 {approx = true} : vector<8x1x32xf32> -> vector<8x1x32xf32>
    %97 = vector.broadcast %96 : vector<8x1x32xf32> to vector<8x8x32xf32>
    %98 = arith.mulf %93, %97 : vector<8x8x32xf32>
    %99 = vector.shape_cast %98 : vector<8x8x32xf32> to vector<1x8x8x32xf32>
    %100 = vector.shape_cast %80 : vector<4x8x32xf32> to vector<4x1x8x32xf32>
    %101 = vector.broadcast %99 : vector<1x8x8x32xf32> to vector<4x8x8x32xf32>
    %102 = vector.broadcast %100 : vector<4x1x8x32xf32> to vector<4x8x8x32xf32>
    %103 = arith.mulf %101, %102 : vector<4x8x8x32xf32>
    %cst_38 = arith.constant dense<0.000000e+00> : vector<4x8x32xf32>
    %104 = vector.multi_reduction <add>, %103, %cst_38 [2] : vector<4x8x8x32xf32> to vector<4x8x32xf32>
    %105 = vector.extract_strided_slice %75 {offsets = [4, 0, 0], sizes = [4, 8, 32], strides = [1, 1, 1]} : vector<16x8x32xf32> to vector<4x8x32xf32>
    %106 = vector.extract_strided_slice %76 {offsets = [4, 0, 0], sizes = [4, 8, 32], strides = [1, 1, 1]} : vector<16x8x32xf32> to vector<4x8x32xf32>
    %107 = vector.extract_strided_slice %77 {offsets = [4, 0, 0], sizes = [4, 8, 32], strides = [1, 1, 1]} : vector<16x8x32xf32> to vector<4x8x32xf32>
    %108 = vector.shape_cast %105 : vector<4x8x32xf32> to vector<4x8x1x32xf32>
    %109 = vector.shape_cast %106 : vector<4x8x32xf32> to vector<4x1x8x32xf32>
    %110 = vector.broadcast %108 : vector<4x8x1x32xf32> to vector<4x8x8x32xf32>
    %111 = vector.broadcast %109 : vector<4x1x8x32xf32> to vector<4x8x8x32xf32>
    %112 = arith.mulf %110, %111 : vector<4x8x8x32xf32>
    %cst_39 = arith.constant dense<0.000000e+00> : vector<8x8x32xf32>
    %113 = vector.multi_reduction <add>, %112, %cst_39 [0] : vector<4x8x8x32xf32> to vector<8x8x32xf32>
    %cst_40 = arith.constant 5.000000e-01 : f32
    %114 = vector.broadcast %cst_40 : f32 to vector<8x8x32xf32>
    %115 = arith.mulf %113, %114 : vector<8x8x32xf32>
    %cst_41 = arith.constant dense<0xFF800000> : vector<8x32xf32>
    %116 = vector.multi_reduction <maximumf>, %115, %cst_41 [1] : vector<8x8x32xf32> to vector<8x32xf32>
    %117 = vector.shape_cast %116 : vector<8x32xf32> to vector<8x1x32xf32>
    %118 = vector.broadcast %117 : vector<8x1x32xf32> to vector<8x8x32xf32>
    %119 = arith.subf %115, %118 : vector<8x8x32xf32>
    %120 = math.exp %119 : vector<8x8x32xf32>
    %cst_42 = arith.constant dense<0.000000e+00> : vector<8x32xf32>
    %121 = vector.multi_reduction <add>, %120, %cst_42 [1] : vector<8x8x32xf32> to vector<8x32xf32>
    %122 = vector.shape_cast %121 : vector<8x32xf32> to vector<8x1x32xf32>
    %123 = tpu.reciprocal %122 {approx = true} : vector<8x1x32xf32> -> vector<8x1x32xf32>
    %124 = vector.broadcast %123 : vector<8x1x32xf32> to vector<8x8x32xf32>
    %125 = arith.mulf %120, %124 : vector<8x8x32xf32>
    %126 = vector.shape_cast %125 : vector<8x8x32xf32> to vector<1x8x8x32xf32>
    %127 = vector.shape_cast %107 : vector<4x8x32xf32> to vector<4x1x8x32xf32>
    %128 = vector.broadcast %126 : vector<1x8x8x32xf32> to vector<4x8x8x32xf32>
    %129 = vector.broadcast %127 : vector<4x1x8x32xf32> to vector<4x8x8x32xf32>
    %130 = arith.mulf %128, %129 : vector<4x8x8x32xf32>
    %cst_43 = arith.constant dense<0.000000e+00> : vector<4x8x32xf32>
    %131 = vector.multi_reduction <add>, %130, %cst_43 [2] : vector<4x8x8x32xf32> to vector<4x8x32xf32>
    %132 = vector.extract_strided_slice %75 {offsets = [8, 0, 0], sizes = [4, 8, 32], strides = [1, 1, 1]} : vector<16x8x32xf32> to vector<4x8x32xf32>
    %133 = vector.extract_strided_slice %76 {offsets = [8, 0, 0], sizes = [4, 8, 32], strides = [1, 1, 1]} : vector<16x8x32xf32> to vector<4x8x32xf32>
    %134 = vector.extract_strided_slice %77 {offsets = [8, 0, 0], sizes = [4, 8, 32], strides = [1, 1, 1]} : vector<16x8x32xf32> to vector<4x8x32xf32>
    %135 = vector.shape_cast %132 : vector<4x8x32xf32> to vector<4x8x1x32xf32>
    %136 = vector.shape_cast %133 : vector<4x8x32xf32> to vector<4x1x8x32xf32>
    %137 = vector.broadcast %135 : vector<4x8x1x32xf32> to vector<4x8x8x32xf32>
    %138 = vector.broadcast %136 : vector<4x1x8x32xf32> to vector<4x8x8x32xf32>
    %139 = arith.mulf %137, %138 : vector<4x8x8x32xf32>
    %cst_44 = arith.constant dense<0.000000e+00> : vector<8x8x32xf32>
    %140 = vector.multi_reduction <add>, %139, %cst_44 [0] : vector<4x8x8x32xf32> to vector<8x8x32xf32>
    %cst_45 = arith.constant 5.000000e-01 : f32
    %141 = vector.broadcast %cst_45 : f32 to vector<8x8x32xf32>
    %142 = arith.mulf %140, %141 : vector<8x8x32xf32>
    %cst_46 = arith.constant dense<0xFF800000> : vector<8x32xf32>
    %143 = vector.multi_reduction <maximumf>, %142, %cst_46 [1] : vector<8x8x32xf32> to vector<8x32xf32>
    %144 = vector.shape_cast %143 : vector<8x32xf32> to vector<8x1x32xf32>
    %145 = vector.broadcast %144 : vector<8x1x32xf32> to vector<8x8x32xf32>
    %146 = arith.subf %142, %145 : vector<8x8x32xf32>
    %147 = math.exp %146 : vector<8x8x32xf32>
    %cst_47 = arith.constant dense<0.000000e+00> : vector<8x32xf32>
    %148 = vector.multi_reduction <add>, %147, %cst_47 [1] : vector<8x8x32xf32> to vector<8x32xf32>
    %149 = vector.shape_cast %148 : vector<8x32xf32> to vector<8x1x32xf32>
    %150 = tpu.reciprocal %149 {approx = true} : vector<8x1x32xf32> -> vector<8x1x32xf32>
    %151 = vector.broadcast %150 : vector<8x1x32xf32> to vector<8x8x32xf32>
    %152 = arith.mulf %147, %151 : vector<8x8x32xf32>
    %153 = vector.shape_cast %152 : vector<8x8x32xf32> to vector<1x8x8x32xf32>
    %154 = vector.shape_cast %134 : vector<4x8x32xf32> to vector<4x1x8x32xf32>
    %155 = vector.broadcast %153 : vector<1x8x8x32xf32> to vector<4x8x8x32xf32>
    %156 = vector.broadcast %154 : vector<4x1x8x32xf32> to vector<4x8x8x32xf32>
    %157 = arith.mulf %155, %156 : vector<4x8x8x32xf32>
    %cst_48 = arith.constant dense<0.000000e+00> : vector<4x8x32xf32>
    %158 = vector.multi_reduction <add>, %157, %cst_48 [2] : vector<4x8x8x32xf32> to vector<4x8x32xf32>
    %159 = vector.extract_strided_slice %75 {offsets = [12, 0, 0], sizes = [4, 8, 32], strides = [1, 1, 1]} : vector<16x8x32xf32> to vector<4x8x32xf32>
    %160 = vector.extract_strided_slice %76 {offsets = [12, 0, 0], sizes = [4, 8, 32], strides = [1, 1, 1]} : vector<16x8x32xf32> to vector<4x8x32xf32>
    %161 = vector.extract_strided_slice %77 {offsets = [12, 0, 0], sizes = [4, 8, 32], strides = [1, 1, 1]} : vector<16x8x32xf32> to vector<4x8x32xf32>
    %162 = vector.shape_cast %159 : vector<4x8x32xf32> to vector<4x8x1x32xf32>
    %163 = vector.shape_cast %160 : vector<4x8x32xf32> to vector<4x1x8x32xf32>
    %164 = vector.broadcast %162 : vector<4x8x1x32xf32> to vector<4x8x8x32xf32>
    %165 = vector.broadcast %163 : vector<4x1x8x32xf32> to vector<4x8x8x32xf32>
    %166 = arith.mulf %164, %165 : vector<4x8x8x32xf32>
    %cst_49 = arith.constant dense<0.000000e+00> : vector<8x8x32xf32>
    %167 = vector.multi_reduction <add>, %166, %cst_49 [0] : vector<4x8x8x32xf32> to vector<8x8x32xf32>
    %cst_50 = arith.constant 5.000000e-01 : f32
    %168 = vector.broadcast %cst_50 : f32 to vector<8x8x32xf32>
    %169 = arith.mulf %167, %168 : vector<8x8x32xf32>
    %cst_51 = arith.constant dense<0xFF800000> : vector<8x32xf32>
    %170 = vector.multi_reduction <maximumf>, %169, %cst_51 [1] : vector<8x8x32xf32> to vector<8x32xf32>
    %171 = vector.shape_cast %170 : vector<8x32xf32> to vector<8x1x32xf32>
    %172 = vector.broadcast %171 : vector<8x1x32xf32> to vector<8x8x32xf32>
    %173 = arith.subf %169, %172 : vector<8x8x32xf32>
    %174 = math.exp %173 : vector<8x8x32xf32>
    %cst_52 = arith.constant dense<0.000000e+00> : vector<8x32xf32>
    %175 = vector.multi_reduction <add>, %174, %cst_52 [1] : vector<8x8x32xf32> to vector<8x32xf32>
    %176 = vector.shape_cast %175 : vector<8x32xf32> to vector<8x1x32xf32>
    %177 = tpu.reciprocal %176 {approx = true} : vector<8x1x32xf32> -> vector<8x1x32xf32>
    %178 = vector.broadcast %177 : vector<8x1x32xf32> to vector<8x8x32xf32>
    %179 = arith.mulf %174, %178 : vector<8x8x32xf32>
    %180 = vector.shape_cast %179 : vector<8x8x32xf32> to vector<1x8x8x32xf32>
    %181 = vector.shape_cast %161 : vector<4x8x32xf32> to vector<4x1x8x32xf32>
    %182 = vector.broadcast %180 : vector<1x8x8x32xf32> to vector<4x8x8x32xf32>
    %183 = vector.broadcast %181 : vector<4x1x8x32xf32> to vector<4x8x8x32xf32>
    %184 = arith.mulf %182, %183 : vector<4x8x8x32xf32>
    %cst_53 = arith.constant dense<0.000000e+00> : vector<4x8x32xf32>
    %185 = vector.multi_reduction <add>, %184, %cst_53 [2] : vector<4x8x8x32xf32> to vector<4x8x32xf32>
    %186 = tpu.concatenate %104, %131, %158, %185 in 0 : vector<4x8x32xf32>, vector<4x8x32xf32>, vector<4x8x32xf32>, vector<4x8x32xf32> -> vector<16x8x32xf32>
    %187 = vector.shape_cast %186 : vector<16x8x32xf32> to vector<16x256xf32>
    %c0_54 = arith.constant 0 : index
    %c0_55 = arith.constant 0 : index
    %188 = vector.load %arg7[%c0_54, %c0_55] : memref<16x16xf32, #tpu.memory_space<vmem>>, vector<16x16xf32>
    %cst_56 = arith.constant dense<0.000000e+00> : vector<16x256xf32>
    %189 = tpu.matmul %188, %187, %cst_56 {dimension_numbers = #tpu.dot_dimension_numbers<[1], [0], [0], [1], [0, 0, 1, 1], [], []>} : vector<16x16xf32>, vector<16x256xf32>, vector<16x256xf32> -> vector<16x256xf32>
    %cst_57 = arith.constant dense<0.000000e+00> : vector<16xf32>
    %190 = vector.multi_reduction <add>, %189, %cst_57 [1] : vector<16x256xf32> to vector<16xf32>
    %191 = vector.shape_cast %190 : vector<16xf32> to vector<16x1xf32>
    %cst_58 = arith.constant 3.906250e-03 : f32
    %192 = vector.broadcast %cst_58 : f32 to vector<16x1xf32>
    %193 = arith.mulf %191, %192 : vector<16x1xf32>
    %194 = arith.mulf %189, %189 : vector<16x256xf32>
    %cst_59 = arith.constant dense<0.000000e+00> : vector<16xf32>
    %195 = vector.multi_reduction <add>, %194, %cst_59 [1] : vector<16x256xf32> to vector<16xf32>
    %196 = vector.shape_cast %195 : vector<16xf32> to vector<16x1xf32>
    %cst_60 = arith.constant 3.906250e-03 : f32
    %197 = vector.broadcast %cst_60 : f32 to vector<16x1xf32>
    %198 = arith.mulf %196, %197 : vector<16x1xf32>
    %199 = arith.mulf %193, %193 : vector<16x1xf32>
    %200 = arith.subf %198, %199 : vector<16x1xf32>
    %cst_61 = arith.constant 0.000000e+00 : f32
    %201 = vector.broadcast %cst_61 : f32 to vector<16x1xf32>
    %202 = arith.maximumf %200, %201 : vector<16x1xf32>
    %203 = vector.broadcast %193 : vector<16x1xf32> to vector<16x256xf32>
    %204 = arith.subf %189, %203 : vector<16x256xf32>
    %cst_62 = arith.constant 9.99999974E-6 : f32
    %205 = vector.broadcast %cst_62 : f32 to vector<16x1xf32>
    %206 = arith.addf %202, %205 : vector<16x1xf32>
    %207 = math.rsqrt %206 : vector<16x1xf32>
    %208 = vector.broadcast %207 : vector<16x1xf32> to vector<16x256xf32>
    %209 = arith.mulf %204, %208 : vector<16x256xf32>
    %cst_63 = arith.constant 0.000000e+00 : f32
    %210 = vector.broadcast %cst_63 : f32 to vector<16x256xf32>
    %211 = arith.maximumf %209, %210 : vector<16x256xf32>
    %c0_64 = arith.constant 0 : index
    %c0_65 = arith.constant 0 : index
    %212 = vector.load %arg8[%c0_64, %c0_65] : memref<16x256xf32, #tpu.memory_space<vmem>>, vector<16x256xf32>
    tpu.vector_store %arg8[%c0_64, %c0_65], %211 {strides = array<i32>} : memref<16x256xf32, #tpu.memory_space<vmem>>, vector<16x256xf32>,
    return
  }
  func.func @transform_0(%arg0: i32) -> (i32, i32) {
    %c0_i32 = arith.constant 0 : i32
    %c0_i32_0 = arith.constant 0 : i32
    %c0_i32_1 = arith.constant 0 : i32
    return %c0_i32, %c0_i32_0 : i32, i32
  }
  func.func @transform_1(%arg0: i32) -> (i32, i32) {
    %c0_i32 = arith.constant 0 : i32
    %c0_i32_0 = arith.constant 0 : i32
    %c0_i32_1 = arith.constant 0 : i32
    return %c0_i32, %c0_i32_0 : i32, i32
  }
  func.func @transform_2(%arg0: i32) -> (i32, i32) {
    %c0_i32 = arith.constant 0 : i32
    %c0_i32_0 = arith.constant 0 : i32
    %c0_i32_1 = arith.constant 0 : i32
    return %c0_i32, %c0_i32_0 : i32, i32
  }
  func.func @transform_3(%arg0: i32) -> (i32, i32) {
    %c0_i32 = arith.constant 0 : i32
    %c0_i32_0 = arith.constant 0 : i32
    %c0_i32_1 = arith.constant 0 : i32
    return %c0_i32, %c0_i32_0 : i32, i32
  }
  func.func @transform_4(%arg0: i32) -> (i32, i32) {
    %c0_i32 = arith.constant 0 : i32
    %c0_i32_0 = arith.constant 0 : i32
    %c0_i32_1 = arith.constant 0 : i32
    return %c0_i32, %c0_i32_0 : i32, i32
  }
  func.func @transform_5(%arg0: i32) -> (i32, i32) {
    %c0_i32 = arith.constant 0 : i32
    %c0_i32_0 = arith.constant 0 : i32
    %c0_i32_1 = arith.constant 0 : i32
    return %c0_i32, %c0_i32_0 : i32, i32
  }
  func.func @transform_6(%arg0: i32) -> (i32, i32) {
    %c0_i32 = arith.constant 0 : i32
    %c0_i32_0 = arith.constant 0 : i32
    %c0_i32_1 = arith.constant 0 : i32
    return %c0_i32, %c0_i32_0 : i32, i32
  }
  func.func @transform_7(%arg0: i32) -> (i32, i32) {
    %c0_i32 = arith.constant 0 : i32
    %c0_i32_0 = arith.constant 0 : i32
    %c0_i32_1 = arith.constant 0 : i32
    return %c0_i32, %c0_i32_0 : i32, i32
  }
}

</mosaic_0001>

<bundles_post_ra>
// kernel: transform_attention.1
= control target key start
LH: loop header
LB: loop body
LE: loop exit
PB: predicated region body
PF: predicated region fallthrough
CT: control target
= control target key end

     0   :  { %v9453_v3 = vmov 0.0   ;;  %vm32_vm0 = vcmask 130048   ;;  %s5834_s9 = smov 96   ;;  %s5835_s10 = smov 32   ;;  %vm1748_vm1 = vcmask 261120   ;;  %vm4942_vm2 = vcmask 1041409   ;;  %s9445_s0 = inlined_call_operand.vmem [shape: f32[16,256], index: 0, kind: input, shape index: {}]   ;;  %s9446_s3 = inlined_call_operand.vmem [shape: f32[16,16], index: 3, kind: input, shape index: {}]   ;;  %s9447_s1 = inlined_call_operand.vmem [shape: f32[16,256], index: 1, kind: input, shape index: {}]   ;;  %s9448_s4 = inlined_call_operand.vmem [shape: f32[16,16], index: 4, kind: input, shape index: {}]   ;;  %s9449_s2 = inlined_call_operand.vmem [shape: f32[16,256], index: 2, kind: input, shape index: {}]   ;;  %s9450_s5 = inlined_call_operand.vmem [shape: f32[16,16], index: 5, kind: input, shape index: {}]   ;;  %s9451_s6 = inlined_call_operand.vmem [shape: f32[16,16], index: 6, kind: input, shape index: {}]   ;;  %s9452_s7 = inlined_call_operand.vmem [shape: f32[16,256], index: 7, kind: output, shape index: {}]  }
   0x1   :  { %v31_v0 = vld [vmem:[%s9445_s0 + $0x18] sm:$0xff]  ;;  %v30_v1 = vld [vmem:[%s9445_s0 + $0x10] sm:$0xff]  ;;  %v29_v2 = vld [vmem:[%s9445_s0 + $0x8] sm:$0xff]  ;;  %103 = vmatprep.mubr.f32.mxu0 %v9453_v3  ;;  %234 = vmatprep.mubr.f32.mxu1 %v9453_v3  ;;  %vm4945_vm3 = vcmask 1042434   ;;  %vm4948_vm4 = vcmask 1043459   ;;  %vm4951_vm5 = vcmask 1044484  }
   0x2   :  { %67 = vmatprep.subr.mxu0 %v31_v0  ;;  %v28_v4 = vld [vmem:[%s9445_s0] sm:$0xff]  ;;  %v163_v6 = vld [vmem:[%s9447_s1 + $0x18] sm:$0xff]  ;;  %v162_v7 = vld [vmem:[%s9447_s1 + $0x10] sm:$0xff]  ;;  %vm4954_vm6 = vcmask 1045509   ;;  %vm4957_vm7 = vcmask 1046534   ;;  %vm4960_vm8 = vcmask 1047559  }
   0x3   :  { %v26_v5 = vld [vmem:[%s9446_s3] sm:$0xff]  ;;  %68 = vmatpush1.msra.mxu0 %v30_v1  ;;  %v161_v8 = vld [vmem:[%s9447_s1 + $0x8] sm:$0xff]  ;;  %198 = vmatprep.subr.mxu1 %v163_v6  ;;  %v294_v11 = vld [vmem:[%s9449_s2 + $0x18] sm:$0xff]  ;;  %vm5510_vm9 = vcmask 523264   ;;  %vm5513_vm10 = vcmask 785408  }
   0x4   :  { %69 = vmatprep.subr.mxu0 %v29_v2  ;;  %v160_v9 = vld [vmem:[%s9447_s1] sm:$0xff]  ;;  %199 = vmatpush1.msra.mxu1 %v162_v7  ;;  %v293_v12 = vld [vmem:[%s9449_s2 + $0x10] sm:$0xff]  ;;  %v27_v13 = vld [vmem:[%s9446_s3 + $0x8] sm:$0xff] }
   0x5   :  { %70 = vmatpush1.msra.mxu0 %v28_v4  ;;  %v158_v10 = vld [vmem:[%s9448_s4] sm:$0xff]  ;;  %200 = vmatprep.subr.mxu1 %v161_v8  ;;  %v292_v14 = vld [vmem:[%s9449_s2 + $0x8] sm:$0xff] }
   0x6   :  { %5657 = vmatmul.mubr.msk.f32.vlgmr.msra.gmra.mxu0 %vm32_vm0, %v26_v5  ;;  %201 = vmatpush1.msra.mxu1 %v160_v9  ;;  %v291_v15 = vld [vmem:[%s9449_s2] sm:$0xff]  ;;  %v159_v16 = vld [vmem:[%s9448_s4 + $0x8] sm:$0xff] }
   0x7   :  { %109 = vmatprep.mubr.f32.mxu0 %v9453_v3  ;;  %5659 = vmatmul.mubr.msk.f32.vlgmr.msra.gmra.mxu1 %vm32_vm0, %v158_v10  ;;  %v289_v17 = vld [vmem:[%s9450_s5] sm:$0xff]  ;;  %v290_v18 = vld [vmem:[%s9450_s5 + $0x8] sm:$0xff]  ;;  %s5833_s5 = smov 64  }
   0x8   :  { %329 = vmatprep.subr.mxu0 %v294_v11  ;;  %240 = vmatprep.mubr.f32.mxu1 %v9453_v3 }
   0x9   :  { %330 = vmatpush1.msra.mxu0 %v293_v12 }
   0xa   :  { %5658 = vmatmul.mubr.msk.f32.gmra.mxu0 %vm32_vm0, %v27_v13  ;;  %331 = vmatprep.subr.mxu0 %v292_v14 }
   0xb   :  { %332 = vmatpush1.msra.mxu0 %v291_v15  ;;  %365 = vmatprep.mubr.f32.mxu0 %v9453_v3 }
   0xc   :  { %5660 = vmatmul.mubr.msk.f32.gmra.mxu1 %vm32_vm0, %v159_v16 }
   0xd   :  { %5594 = vmatprep.mubr.f32.mxu1 %v9453_v3 }
   0xe   :  { %5661 = vmatmul.mubr.msk.f32.vlgmr.msra.gmra.mxu0 %vm32_vm0, %v289_v17 }
   0xf   :  { %371 = vmatprep.mubr.f32.mxu0 %v9453_v3 }
  0x12   :  { %5662 = vmatmul.mubr.msk.f32.gmra.mxu0 %vm32_vm0, %v290_v18 }
  0xc6   :  { %v5946_v19 = vpop.f32.mrf.mxu0 }
  0xc7   :  { %v5950_v21 = vpop.f32.mrf.mxu1  ;;  %v124_v35 = vmul.f32 %v5946_v19, %v5946_v19 }
  0xc8   :  { %v5948_v20 = vpop.f32.mrf.mxu0  ;;  %v255_v42 = vmul.f32 %v5950_v21, %v5950_v21 }
  0xc9   :  { %v5954_v23 = vpop.f32.mrf.mxu1  ;;  %v125_v31 = vmul.f32 %v5948_v20, %v5948_v20  ;;  %v116_v34 = vadd.f32 %v5948_v20, %v5946_v19 }
  0xca   :  { %v5952_v22 = vpop.f32.mrf.mxu0  ;;  %v247_v41 = vadd.f32 %v5954_v23, %v5950_v21  ;;  %v256_v43 = vmul.f32 %v5954_v23, %v5954_v23 }
  0xcb   :  { %v126_v27 = vmul.f32 %v5952_v22, %v5952_v22  ;;  %v128_v36 = vadd.f32 %v125_v31, %v124_v35 }
  0xcc   :  { %v5956_v24 = vpop.f32.mrf.mxu0  ;;  %v5958_v25 = vpop.f32.mrf.mxu1  ;;  %v259_v46 = vadd.f32 %v256_v43, %v255_v42 }
  0xcd   :  { %v119_v26 = vadd.f32 %v5956_v24, %v5952_v22  ;;  %v127_v28 = vmul.f32 %v5956_v24, %v5956_v24  ;;  %v257_v38 = vmul.f32 %v5958_v25, %v5958_v25 }
  0xce   :  { %v5966_v29 = vpop.f32.mrf.mxu0  ;;  %v5970_v32 = vpop.f32.mrf.mxu1 }
  0xcf   :  { %120 = vadd.xlane.f32.xlu0 %v119_v26  ;;  %v131_v30 = vadd.f32 %v127_v28, %v126_v27  ;;  %v250_v37 = vadd.f32 %v5970_v32, %v5958_v25  ;;  %v258_v39 = vmul.f32 %v5970_v32, %v5970_v32  ;;  %v386_v51 = vmul.f32 %v5966_v29, %v5966_v29 }
  0xd0   :  { %v5972_v33 = vpop.f32.mrf.mxu0 }
  0xd1   :  { %132 = vadd.xlane.f32.xlu1 %v131_v30  ;;  %v262_v44 = vadd.f32 %v258_v39, %v257_v38  ;;  %v378_v50 = vadd.f32 %v5972_v33, %v5966_v29  ;;  %v387_v52 = vmul.f32 %v5972_v33, %v5972_v33 }
  0xd2   :  { %v5984_v40 = vpop.f32.mrf.mxu0 }
  0xd3   :  { %117 = vadd.xlane.f32.xlu0 %v116_v34  ;;  %v388_v49 = vmul.f32 %v5984_v40, %v5984_v40  ;;  %v390_v54 = vadd.f32 %v387_v52, %v386_v51 }
  0xd4   :  { %v5992_v45 = vpop.f32.mrf.mxu0 }
  0xd5   :  { %129 = vadd.xlane.f32.xlu1 %v128_v36  ;;  %v389_v47 = vmul.f32 %v5992_v45, %v5992_v45  ;;  %v381_v48 = vadd.f32 %v5992_v45, %v5984_v40 }
  0xd7   :  { %251 = vadd.xlane.f32.xlu0 %v250_v37  ;;  %v393_v53 = vadd.f32 %v389_v47, %v388_v49 }
  0xd9   :  { %248 = vadd.xlane.f32.xlu1 %v247_v41 }
  0xdb   :  { %263 = vadd.xlane.f32.xlu0 %v262_v44 }
  0xdd   :  { %260 = vadd.xlane.f32.xlu1 %v259_v46 }
  0xdf   :  { %382 = vadd.xlane.f32.xlu0 %v381_v48 }
  0xe1   :  { %379 = vadd.xlane.f32.xlu1 %v378_v50 }
  0xe3   :  { %394 = vadd.xlane.f32.xlu0 %v393_v53 }
  0xe5   :  { %391 = vadd.xlane.f32.xlu1 %v390_v54 }
 0x158   :  { %v121_v55 = vpop.xlane.xlu0 %120 }
 0x159   :  { %v6006_v1 = vmul.f32 0.00390625, %v121_v55 }
 0x15a   :  { %v133_v56 = vpop.xlane.xlu1 %132 }
 0x15b   :  { %v135_v9 = vmul.f32 0.00390625, %v133_v56  ;;  %v137_v10 = vmul.f32 %v6006_v1, %v6006_v1  ;;  %v144_v56 = vsub.f32 %v5952_v22, %v6006_v1 }
 0x15c   :  { %v118_v57 = vpop.xlane.xlu0 %117 }
 0x15d   :  { %v122_v58 = vmul.f32 0.00390625, %v118_v57  ;;  %v139_v13 = vsub.f32 %v135_v9, %v137_v10 }
 0x15e   :  { %v130_v59 = vpop.xlane.xlu1 %129 }
 0x15f   :  { %v134_v60 = vmul.f32 0.00390625, %v130_v59  ;;  %v136_v61 = vmul.f32 %v122_v58, %v122_v58  ;;  %v141_v17 = vmax.f32 %v139_v13, 0.0  ;;  %v142_v28 = vsub.f32 %v5946_v19, %v122_v58 }
 0x160   :  { %v252_v7 = vpop.xlane.xlu0 %251  ;;  %v143_v34 = vsub.f32 %v5948_v20, %v122_v58 }
 0x161   :  { %v138_v62 = vsub.f32 %v134_v60, %v136_v61  ;;  %v6010_v16 = vmul.f32 0.00390625, %v252_v7  ;;  %v147_v27 = vadd.f32 1e-05, %v141_v17  ;;  %v145_v61 = vsub.f32 %v5956_v24, %v6006_v1 }
 0x162   :  { %v249_v63 = vpop.xlane.xlu1 %248 }
 0x163   :  { %v253_v0 = vmul.f32 0.00390625, %v249_v63  ;;  %v140_v2 = vmax.f32 %v138_v62, 0.0  ;;  %v268_v18 = vmul.f32 %v6010_v16, %v6010_v16 }
 0x164   :  { %v264_v14 = vpop.xlane.xlu0 %263 }
 0x165   :  { %v267_v4 = vmul.f32 %v253_v0, %v253_v0  ;;  %v146_v5 = vadd.f32 1e-05, %v140_v2  ;;  %v266_v26 = vmul.f32 0.00390625, %v264_v14  ;;  %v273_v43 = vsub.f32 %v5950_v21, %v253_v0 }
 0x166   :  { %v261_v6 = vpop.xlane.xlu1 %260  ;;  %v274_v50 = vsub.f32 %v5954_v23, %v253_v0 }
 0x167   :  { %v265_v8 = vmul.f32 0.00390625, %v261_v6  ;;  %5688 = vrsqrt.f32 %v146_v5  ;;  %v270_v30 = vsub.f32 %v266_v26, %v268_v18 }
 0x168   :  { %v383_v46 = vpop.xlane.xlu0 %382 }
 0x169   :  { %v269_v11 = vsub.f32 %v265_v8, %v267_v4  ;;  %v272_v37 = vmax.f32 %v270_v30, 0.0  ;;  %v385_v54 = vmul.f32 0.00390625, %v383_v46  ;;  %v275_v4 = vsub.f32 %v5958_v25, %v6010_v16 }
 0x16a   :  { %v380_v36 = vpop.xlane.xlu1 %379  ;;  %v276_v25 = vsub.f32 %v5970_v32, %v6010_v16 }
 0x16b   :  { %v271_v12 = vmax.f32 %v269_v11, 0.0  ;;  %v278_v19 = vadd.f32 1e-05, %v272_v37  ;;  %v6025_v44 = vmul.f32 0.00390625, %v380_v36  ;;  %v399_v23 = vmul.f32 %v385_v54, %v385_v54 }
 0x16c   :  { %v395_v55 = vpop.xlane.xlu0 %394  ;;  %v406_v14 = vsub.f32 %v5984_v40, %v385_v54  ;;  %v407_v40 = vsub.f32 %v5992_v45, %v385_v54  ;;  %v5836_v45 = vmov 1983009808   ;;  %v5837_v36 = vmov 1934713408  }
 0x16d   :  { %v277_v15 = vadd.f32 1e-05, %v271_v12  ;;  %v398_v47 = vmul.f32 %v6025_v44, %v6025_v44  ;;  %v397_v57 = vmul.f32 0.00390625, %v395_v55  ;;  %v404_v32 = vsub.f32 %v5966_v29, %v6025_v44 }
 0x16e   :  { %v392_v20 = vpop.xlane.xlu1 %391  ;;  %v527_v37 = vunpack.c.l.s4 %v5837_v36 }
 0x16f   :  { %5690 = vrsqrt.f32 %v277_v15  ;;  %v396_v48 = vmul.f32 0.00390625, %v392_v20  ;;  %v401_v22 = vsub.f32 %v397_v57, %v399_v23  ;;  %v405_v15 = vsub.f32 %v5972_v33, %v6025_v44 }
 0x170   :  { %5692 = vrsqrt.f32 %v147_v27  ;;  %v463_v27 = vunpack.c.l.s4 %v5836_v45 }
 0x171   :  { %5694 = vrsqrt.f32 %v278_v19  ;;  %v400_v21 = vsub.f32 %v396_v48, %v398_v47  ;;  %v403_v24 = vmax.f32 %v401_v22, 0.0 }
 0x172   :  { %v464_v30 = vunpack.c.0.s8 %v463_v27 }
 0x173   :  { %v402_v58 = vmax.f32 %v400_v21, 0.0  ;;  %v409_v6 = vadd.f32 1e-05, %v403_v24 }
 0x174   :  { %v5689_v31 = vpop.eup %5688 }
 0x175   :  { %v150_v35 = vmul.f32 %v5689_v31, %v142_v28  ;;  %v151_v39 = vmul.f32 %v5689_v31, %v143_v34  ;;  %v408_v62 = vadd.f32 1e-05, %v402_v58  ;;  %v465_v28 = vlaneseq }
 0x177   :  { %v6016_v38 = vmax.f32 %v150_v35, 0.0  ;;  %v6022_v41 = vmax.f32 %v151_v39, 0.0  ;;  %5696 = vrsqrt.f32 %v408_v62  ;;  %v466_v31 = vshrl.u32 %v465_v28, 7 }
 0x178   :  { %5698 = vrsqrt.f32 %v409_v6 }
 0x179   :  { %428 = vrot.lane.b32.xlu1 %v6016_v38, %s5833_s5  ;;  %422 = vrot.lane.b32.xlu0 %v6016_v38, %s5834_s9  ;;  %v6132_v39 = vsub.s32 %v464_v30, %v466_v31  ;;  %v6166_v28 = vsub.s32 0, %v466_v31 }
 0x17b   :  { %9590 = vst [vmem:[#allocation6_spill] sm:$0xff] %v6132_v39 }
 0x17c   :  { %v5691_v42 = vpop.eup %5690 }
 0x17d   :  { %442 = vrot.lane.b32.xlu1 %v6022_v41, %s5834_s9  ;;  %434 = vrot.lane.b32.xlu0 %v6016_v38, %s5835_s10  ;;  %v281_v49 = vmul.f32 %v5691_v42, %v273_v43  ;;  %v282_v52 = vmul.f32 %v5691_v42, %v274_v50  ;;  %v5693_v53 = vpop.eup %5692  ;;  %v528_v43 = vunpack.c.0.s8 %v527_v37 }
 0x17e   :  { %v152_v60 = vmul.f32 %v5693_v53, %v144_v56  ;;  %v153_v0 = vmul.f32 %v5693_v53, %v145_v61  ;;  %v5695_v2 = vpop.eup %5694 }
 0x17f   :  { %v6038_v51 = vmax.f32 %v281_v49, 0.0  ;;  %v6046_v59 = vmax.f32 %v282_v52, 0.0  ;;  %v283_v5 = vmul.f32 %v5695_v2, %v275_v4  ;;  %v284_v8 = vmul.f32 %v5695_v2, %v276_v25 }
 0x180   :  { %v6054_v63 = vmax.f32 %v152_v60, 0.0  ;;  %v6062_v1 = vmax.f32 %v153_v0, 0.0  ;;  %v5838_v49 = vmov 1966171168   ;;  %v6138_v54 = vsub.s32 %v528_v43, %v466_v31 }
 0x181   :  { %454 = vrot.lane.b32.xlu1 %v6022_v41, %s5835_s10  ;;  %448 = vrot.lane.b32.xlu0 %v6022_v41, %s5833_s5  ;;  %v6068_v7 = vmax.f32 %v283_v5, 0.0  ;;  %v6080_v9 = vmax.f32 %v284_v8, 0.0  ;;  %v1362_v50 = vunpack.c.l.s4 %v5838_v49 }
 0x182   :  { %9591 = vst [vmem:[#allocation7_spill] sm:$0xff] %v6138_v54 }
 0x183   :  { %v1363_v22 = vunpack.c.0.s8 %v1362_v50 }
 0x184   :  { %v5697_v10 = vpop.eup %5696 }
 0x185   :  { %740 = vrot.lane.b32.xlu1 %v6038_v51, %s5833_s5  ;;  %734 = vrot.lane.b32.xlu0 %v6038_v51, %s5834_s9  ;;  %v412_v11 = vmul.f32 %v5697_v10, %v404_v32  ;;  %v5699_v13 = vpop.eup %5698  ;;  %v413_v17 = vmul.f32 %v5697_v10, %v405_v15  ;;  %v6150_v32 = vsub.s32 %v1363_v22, %v466_v31 }
 0x186   :  { %v414_v29 = vmul.f32 %v5699_v13, %v406_v14  ;;  %v415_v33 = vmul.f32 %v5699_v13, %v407_v40 }
 0x187   :  { %v6092_v12 = vmax.f32 %v412_v11, 0.0  ;;  %v6112_v18 = vmax.f32 %v413_v17, 0.0 }
 0x188   :  { %v6105_v16 = vmax.f32 %v414_v29, 0.0  ;;  %v6118_v26 = vmax.f32 %v415_v33, 0.0 }
 0x189   :  { %754 = vrot.lane.b32.xlu1 %v6046_v59, %s5834_s9  ;;  %746 = vrot.lane.b32.xlu0 %v6038_v51, %s5835_s10  ;;  %9586 = vst [vmem:[#allocation2_spill] sm:$0xff] %v6092_v12  ;;  %9588 = vst [vmem:[#allocation4_spill] sm:$0xff] %v6112_v18 }
 0x18a   :  { %9587 = vst [vmem:[#allocation3_spill] sm:$0xff] %v6105_v16  ;;  %9589 = vst [vmem:[#allocation5_spill] sm:$0xff] %v6118_v26 }
 0x18d   :  { %430 = vrot.lane.b32.xlu1 %v6054_v63, %s5833_s5  ;;  %424 = vrot.lane.b32.xlu0 %v6054_v63, %s5834_s9 }
 0x191   :  { %436 = vrot.lane.b32.xlu1 %v6054_v63, %s5835_s10  ;;  %450 = vrot.lane.b32.xlu0 %v6062_v1, %s5833_s5 }
 0x195   :  { %444 = vrot.lane.b32.xlu1 %v6062_v1, %s5834_s9  ;;  %736 = vrot.lane.b32.xlu0 %v6068_v7, %s5834_s9 }
 0x199   :  { %456 = vrot.lane.b32.xlu1 %v6062_v1, %s5835_s10  ;;  %748 = vrot.lane.b32.xlu0 %v6068_v7, %s5835_s10 }
 0x19d   :  { %742 = vrot.lane.b32.xlu1 %v6068_v7, %s5833_s5  ;;  %762 = vrot.lane.b32.xlu0 %v6080_v9, %s5833_s5 }
 0x1a1   :  { %756 = vrot.lane.b32.xlu1 %v6080_v9, %s5834_s9  ;;  %760 = vrot.lane.b32.xlu0 %v6046_v59, %s5833_s5 }
 0x1a5   :  { %768 = vrot.lane.b32.xlu1 %v6080_v9, %s5835_s10  ;;  %1046 = vrot.lane.b32.xlu0 %v6092_v12, %s5834_s9 }
 0x1a9   :  { %766 = vrot.lane.b32.xlu1 %v6046_v59, %s5835_s10  ;;  %1058 = vrot.lane.b32.xlu0 %v6092_v12, %s5835_s10 }
 0x1ad   :  { %1052 = vrot.lane.b32.xlu1 %v6092_v12, %s5833_s5  ;;  %1048 = vrot.lane.b32.xlu0 %v6105_v16, %s5834_s9 }
 0x1b1   :  { %1066 = vrot.lane.b32.xlu1 %v6112_v18, %s5834_s9  ;;  %1060 = vrot.lane.b32.xlu0 %v6105_v16, %s5835_s10 }
 0x1b5   :  { %1054 = vrot.lane.b32.xlu1 %v6105_v16, %s5833_s5  ;;  %1074 = vrot.lane.b32.xlu0 %v6118_v26, %s5833_s5 }
 0x1b9   :  { %1068 = vrot.lane.b32.xlu1 %v6118_v26, %s5834_s9  ;;  %1072 = vrot.lane.b32.xlu0 %v6112_v18, %s5833_s5 }
 0x1bd   :  { %1080 = vrot.lane.b32.xlu1 %v6118_v26, %s5835_s10 }
 0x1c1   :  { %1078 = vrot.lane.b32.xlu1 %v6112_v18, %s5835_s10 }
 0x1eb   :  { %v429_v34 = vpop.permute.xlu1 %428  ;;  %v423_v35 = vpop.permute.xlu0 %422 }
 0x1ec   :  { %v460_v20 = vcombine.low %v6016_v38, %v429_v34  ;;  %v461_v47 = vcombine.high %v6016_v38, %v429_v34 }
 0x1ee   :  { %v468_v53 = vrot.slane %v460_v20, %v6132_v39  ;;  %v475_v38 = vrot.slane %v461_v47, %v6132_v39 }
 0x1ef   :  { %v443_v19 = vpop.permute.xlu1 %442  ;;  %v435_v42 = vpop.permute.xlu0 %434 }
 0x1f0   :  { %v476_v44 = vcombine.low %v423_v35, %v435_v42  ;;  %v477_v46 = vcombine.high %v423_v35, %v435_v42 }
 0x1f2   :  { %v484_v48 = vrot.slane %v476_v44, %v6132_v39  ;;  %v491_v55 = vrot.slane %v477_v46, %v6132_v39 }
 0x1f3   :  { %v455_v21 = vpop.permute.xlu1 %454  ;;  %v449_v52 = vpop.permute.xlu0 %448 }
 0x1f4   :  { %v508_v56 = vcombine.low %v443_v19, %v455_v21  ;;  %v509_v23 = vcombine.high %v443_v19, %v455_v21  ;;  %v492_v57 = vcombine.low %v6022_v41, %v449_v52  ;;  %v493_v58 = vcombine.high %v6022_v41, %v449_v52 }
 0x1f5   :  { %v524_v60 = vcombine.low %v468_v53, %v484_v48  ;;  %v525_v61 = vcombine.high %v468_v53, %v484_v48  ;;  %v540_v6 = vcombine.low %v475_v38, %v491_v55  ;;  %v541_v25 = vcombine.high %v475_v38, %v491_v55 }
 0x1f6   :  { %v516_v62 = vrot.slane %v508_v56, %v6132_v39  ;;  %v523_v0 = vrot.slane %v509_v23, %v6132_v39  ;;  %v500_v2 = vrot.slane %v492_v57, %v6132_v39  ;;  %v507_v4 = vrot.slane %v493_v58, %v6132_v39 }
 0x1f7   :  { %v741_v24 = vpop.permute.xlu1 %740  ;;  %v6148_v5 = vpop.permute.xlu0 %734  ;;  %v532_v29 = vrot.slane %v524_v60, %v6138_v54  ;;  %v539_v15 = vrot.slane %v525_v61, %v6138_v54  ;;  %v6161_v45 = vrot.slane %v540_v6, %v6138_v54  ;;  %v6164_v27 = vrot.slane %v541_v25, %v6138_v54 }
 0x1f8   :  { %v556_v8 = vcombine.low %v500_v2, %v516_v62  ;;  %v557_v41 = vcombine.high %v500_v2, %v516_v62  ;;  %v572_v10 = vcombine.low %v507_v4, %v523_v0  ;;  %v573_v11 = vcombine.high %v507_v4, %v523_v0 }
 0x1f9   :  { %v772_v13 = vcombine.low %v6038_v51, %v741_v24  ;;  %v773_v14 = vcombine.high %v6038_v51, %v741_v24 }
 0x1fa   :  { %v564_v17 = vrot.slane %v556_v8, %v6138_v54  ;;  %v571_v40 = vrot.slane %v557_v41, %v6138_v54  ;;  %v6169_v51 = vrot.slane %v572_v10, %v6138_v54  ;;  %v6172_v36 = vrot.slane %v573_v11, %v6138_v54 }
 0x1fb   :  { %v6158_v33 = vpop.permute.xlu0 %746  ;;  %v6175_v37 = vrot.slane %v772_v13, %v6132_v39  ;;  %v6178_v19 = vrot.slane %v773_v14, %v6132_v39 }
 0x1fc   :  { %v588_v30 = vcombine.low %v532_v29, %v564_v17  ;;  %v589_v34 = vcombine.high %v532_v29, %v564_v17  ;;  %v590_v35 = vcombine.low %v539_v15, %v571_v40  ;;  %v5663_v31 = vcombine.low %v564_v17, %v564_v17 }
 0x1fd   :  { %v5664_v43 = vcombine.high %v564_v17, %v564_v17  ;;  %v591_v46 = vcombine.high %v539_v15, %v571_v40  ;;  %v5665_v47 = vcombine.low %v571_v40, %v571_v40  ;;  %v592_v50 = vcombine.low %v6161_v45, %v6169_v51 }
 0x1fe   :  { %v1367_v20 = vrot.slane %v588_v30, %v6150_v32  ;;  %v1416_v44 = vrot.slane %v589_v34, %v6150_v32  ;;  %v1465_v48 = vrot.slane %v590_v35, %v6150_v32  ;;  %v1374_v21 = vrot.slane %v5663_v31, %v6150_v32 }
 0x1ff   :  { %v1423_v53 = vrot.slane %v5664_v43, %v6150_v32  ;;  %v1472_v57 = vrot.slane %v5665_v47, %v6150_v32  ;;  %v593_v58 = vcombine.high %v6161_v45, %v6169_v51  ;;  %v594_v38 = vcombine.low %v6164_v27, %v6172_v36 }
 0x200   :  { %v1375_v52 = vcombine.high %v1367_v20, %v1367_v20  ;;  %v6192_v55 = vrot.slane %v1367_v20, %v6150_v32  ;;  %v1424_v56 = vcombine.high %v1416_v44, %v1416_v44  ;;  %v6195_v23 = vrot.slane %v1416_v44, %v6150_v32 }
 0x201   :  { %v1376_v60 = vcombine.high %v1374_v21, %v1374_v21  ;;  %v1473_v61 = vcombine.high %v1465_v48, %v1465_v48  ;;  %v6203_v22 = vrot.slane %v1374_v21, %v6150_v32  ;;  %v1425_v62 = vcombine.high %v1423_v53, %v1423_v53 }
 0x202   :  { %9592 = vst [vmem:[#allocation8_spill] sm:$0xff] %v6192_v55  ;;  %9593 = vst [vmem:[#allocation9_spill] sm:$0xff] %v6195_v23  ;;  %v5666_v0 = vcombine.high %v571_v40, %v571_v40  ;;  %v1514_v2 = vrot.slane %v591_v46, %v6150_v32  ;;  %v6207_v4 = vrot.slane %v1375_v52, %v6150_v32 }
 0x203   :  { %9594 = vst [vmem:[#allocation10_spill] sm:$0xff] %v6203_v22  ;;  %v6210_v24 = vrot.slane %v1423_v53, %v6150_v32  ;;  %v6213_v6 = vrot.slane %v1424_v56, %v6150_v32  ;;  %v1474_v25 = vcombine.high %v1472_v57, %v1472_v57  ;;  %v6218_v41 = vrot.slane %v1376_v60, %v6150_v32 }
 0x204   :  { %9595 = vst [vmem:[#allocation11_spill] sm:$0xff] %v6207_v4  ;;  %v1405_v10 = vcombine.high %v6192_v55, %v6192_v55  ;;  %v1454_v11 = vcombine.high %v6195_v23, %v6195_v23  ;;  %v6225_v13 = vrot.slane %v1425_v62, %v6150_v32  ;;  %v6228_v14 = vrot.slane %v1465_v48, %v6150_v32 }
 0x205   :  { %9596 = vst [vmem:[#allocation12_spill] sm:$0xff] %v6210_v24  ;;  %9597 = vst [vmem:[#allocation13_spill] sm:$0xff] %v6213_v6  ;;  %v6231_v29 = vrot.slane %v1472_v57, %v6150_v32  ;;  %v6234_v15 = vrot.slane %v1473_v61, %v6150_v32  ;;  %v1406_v17 = vcombine.high %v6203_v22, %v6203_v22 }
 0x206   :  { %9598 = vst [vmem:[#allocation14_spill] sm:$0xff] %v6218_v41  ;;  %9599 = vst [vmem:[#allocation15_spill] sm:$0xff] %v6225_v13  ;;  %v6239_v40 = vrot.slane %v1474_v25, %v6150_v32  ;;  %v1521_v30 = vrot.slane %v5666_v0, %v6150_v32  ;;  %v1522_v34 = vcombine.high %v1514_v2, %v1514_v2 }
 0x207   :  { %9600 = vst [vmem:[#allocation16_spill] sm:$0xff] %v6228_v14  ;;  %9601 = vst [vmem:[#allocation17_spill] sm:$0xff] %v6231_v29  ;;  %v1407_v35 = vcombine.high %v6207_v4, %v6207_v4  ;;  %v1455_v31 = vcombine.high %v6210_v24, %v6210_v24  ;;  %v1456_v20 = vcombine.high %v6213_v6, %v6213_v6 }
 0x208   :  { %9602 = vst [vmem:[#allocation18_spill] sm:$0xff] %v6234_v15  ;;  %9603 = vst [vmem:[#allocation19_spill] sm:$0xff] %v6239_v40  ;;  %v6249_v43 = vrot.slane %v1514_v2, %v6150_v32  ;;  %v1408_v44 = vcombine.high %v6218_v41, %v6218_v41  ;;  %v1523_v46 = vcombine.high %v1521_v30, %v1521_v30 }
 0x209   :  { %v6254_v47 = vrot.slane %v1521_v30, %v6150_v32  ;;  %v6257_v48 = vrot.slane %v1522_v34, %v6150_v32  ;;  %v1457_v21 = vcombine.high %v6225_v13, %v6225_v13  ;;  %v1503_v52 = vcombine.high %v6228_v14, %v6228_v14 }
 0x20a   :  { %9604 = vst [vmem:[#allocation20_spill] sm:$0xff] %v6249_v43  ;;  %v1504_v53 = vcombine.high %v6231_v29, %v6231_v29  ;;  %v1505_v56 = vcombine.high %v6234_v15, %v6234_v15  ;;  %v1506_v57 = vcombine.high %v6239_v40, %v6239_v40  ;;  %v6270_v60 = vrot.slane %v1523_v46, %v6150_v32 }
 0x20b   :  { %9605 = vst [vmem:[#allocation21_spill] sm:$0xff] %v6254_v47  ;;  %9606 = vst [vmem:[#allocation22_spill] sm:$0xff] %v6257_v48  ;;  %v1552_v61 = vcombine.high %v6249_v43, %v6249_v43  ;;  %v1553_v0 = vcombine.high %v6254_v47, %v6254_v47  ;;  %v6281_v25 = vrot.slane %v1405_v10, %v6166_v28 }
 0x20c   :  { %9607 = vst [vmem:[#allocation23_spill] sm:$0xff] %v6270_v60  ;;  %v6284_v30 = vrot.slane %v1407_v35, %v6166_v28  ;;  %v1554_v34 = vcombine.high %v6257_v48, %v6257_v48  ;;  %v6293_v62 = vrot.slane %v1406_v17, %v6166_v28  ;;  %v1555_v2 = vcombine.high %v6270_v60, %v6270_v60 }
 0x20d   :  { %9608 = vst [vmem:[#allocation24_spill] sm:$0xff] %v6281_v25  ;;  %v6298_v10 = vrot.slane %v1408_v44, %v6166_v28  ;;  %v6305_v46 = vrot.slane %v1454_v11, %v6166_v28  ;;  %v6308_v3 = vrot.slane %v1456_v20, %v6166_v28  ;;  %v6315_v44 = vrot.slane %v1455_v31, %v6166_v28  ;;  %v6324_v20 = vpop.permute.xlu1 %754 }
 0x20e   :  { %9609 = vst [vmem:[#allocation25_spill] sm:$0xff] %v6284_v30  ;;  %9610 = vst [vmem:[#allocation26_spill] sm:$0xff] %v6293_v62  ;;  %v6318_v35 = vrot.slane %v1457_v21, %v6166_v28  ;;  %v6327_v8 = vrot.slane %v1503_v52, %v6166_v28  ;;  %v6330_v17 = vrot.slane %v1505_v56, %v6166_v28 }
 0x20f   :  { %9611 = vst [vmem:[#allocation27_spill] sm:$0xff] %v6298_v10  ;;  %9612 = vst [vmem:[#allocation28_spill] sm:$0xff] %v6305_v46  ;;  %v6337_v42 = vrot.slane %v1504_v53, %v6166_v28  ;;  %v6340_v49 = vrot.slane %v1506_v57, %v6166_v28  ;;  %v5667_v56 = vcombine.low %v6169_v51, %v6169_v51 }
 0x210   :  { %9613 = vst [vmem:[#allocation29_spill] sm:$0xff] %v6308_v3  ;;  %9614 = vst [vmem:[#allocation30_spill] sm:$0xff] %v6315_v44  ;;  %v2232_v21 = vrot.slane %v592_v50, %v6150_v32  ;;  %v5668_v53 = vcombine.high %v6169_v51, %v6169_v51  ;;  %v2281_v57 = vrot.slane %v593_v58, %v6150_v32 }
 0x211   :  { %9615 = vst [vmem:[#allocation31_spill] sm:$0xff] %v6318_v35  ;;  %9616 = vst [vmem:[#allocation32_spill] sm:$0xff] %v6327_v8  ;;  %v6359_v11 = vrot.slane %v1552_v61, %v6166_v28  ;;  %v6362_v52 = vrot.slane %v1554_v34, %v6166_v28  ;;  %v5669_v31 = vcombine.low %v6172_v36, %v6172_v36  ;;  %v6381_v12 = vpop.permute.xlu1 %430 }
 0x212   :  { %9617 = vst [vmem:[#allocation33_spill] sm:$0xff] %v6330_v17  ;;  %9618 = vst [vmem:[#allocation34_spill] sm:$0xff] %v6337_v42  ;;  %v2330_v50 = vrot.slane %v594_v38, %v6150_v32  ;;  %v2239_v45 = vrot.slane %v5667_v56, %v6150_v32  ;;  %v2240_v51 = vcombine.high %v2232_v21, %v2232_v21 }
 0x213   :  { %9619 = vst [vmem:[#allocation35_spill] sm:$0xff] %v6340_v49  ;;  %9620 = vst [vmem:[#allocation36_spill] sm:$0xff] %v6359_v11  ;;  %v2288_v58 = vrot.slane %v5668_v53, %v6150_v32  ;;  %v6375_v61 = vrot.slane %v2232_v21, %v6150_v32  ;;  %v2289_v34 = vcombine.high %v2281_v57, %v2281_v57 }
 0x214   :  { %9621 = vst [vmem:[#allocation37_spill] sm:$0xff] %v6362_v52  ;;  %v6378_v26 = vrot.slane %v2281_v57, %v6150_v32  ;;  %v2337_v16 = vrot.slane %v5669_v31, %v6150_v32  ;;  %v6386_v18 = vrot.slane %v1553_v0, %v6166_v28  ;;  %v2241_v56 = vcombine.high %v2239_v45, %v2239_v45 }
 0x215   :  { %9622 = vst [vmem:[#allocation38_spill] sm:$0xff] %v6375_v61  ;;  %v2338_v47 = vcombine.high %v2330_v50, %v2330_v50  ;;  %v6389_v53 = vrot.slane %v2239_v45, %v6150_v32  ;;  %v2290_v21 = vcombine.high %v2288_v58, %v2288_v58  ;;  %v5670_v57 = vcombine.high %v6172_v36, %v6172_v36  ;;  %v6436_v43 = vpop.permute.xlu1 %436 }
 0x216   :  { %9623 = vst [vmem:[#allocation39_spill] sm:$0xff] %v6378_v26  ;;  %9624 = vst [vmem:[#allocation40_spill] sm:$0xff] %v6386_v18  ;;  %v9626_v31 = vcombine.high %v6164_v27, %v6172_v36  ;;  %v6398_v11 = vrot.slane %v2240_v51, %v6150_v32  ;;  %v6401_v0 = vrot.slane %v2288_v58, %v6150_v32 }
 0x217   :  { %9625 = vst [vmem:[#allocation41_spill] sm:$0xff] %v6389_v53  ;;  %v6404_v38 = vrot.slane %v2289_v34, %v6150_v32  ;;  %v2339_v45 = vcombine.high %v2337_v16, %v2337_v16  ;;  %v6407_v18 = vrot.slane %v1555_v2, %v6166_v28  ;;  %v6410_v60 = vrot.slane %v2241_v56, %v6150_v32  ;;  %v6428_v56 = vpop.permute.xlu0 %424 }
 0x218   :  { %v2379_v52 = vrot.slane %v9626_v31, %v6150_v32  ;;  %9627 = vst [vmem:[#allocation42_spill] sm:$0xff] %v6398_v11  ;;  %9628 = vst [vmem:[#allocation43_spill] sm:$0xff] %v6401_v0  ;;  %v2270_v27 = vcombine.high %v6375_v61, %v6375_v61  ;;  %v2319_v36 = vcombine.high %v6378_v26, %v6378_v26 }
 0x219   :  { %9629 = vst [vmem:[#allocation44_spill] sm:$0xff] %v6404_v38  ;;  %9630 = vst [vmem:[#allocation45_spill] sm:$0xff] %v6407_v18  ;;  %v6417_v51 = vrot.slane %v2290_v21, %v6150_v32  ;;  %v6420_v58 = vrot.slane %v2330_v50, %v6150_v32  ;;  %v6423_v34 = vrot.slane %v2337_v16, %v6150_v32  ;;  %v445_v44 = vpop.permute.xlu1 %444 }
 0x21a   :  { %9631 = vst [vmem:[#allocation46_spill] sm:$0xff] %v6410_v60  ;;  %v6426_v2 = vrot.slane %v2338_v47, %v6150_v32  ;;  %v2271_v31 = vcombine.high %v6389_v53, %v6389_v53  ;;  %v6433_v18 = vrot.slane %v2339_v45, %v6150_v32  ;;  %v2386_v21 = vrot.slane %v5670_v57, %v6150_v32 }
 0x21b   :  { %9632 = vst [vmem:[#allocation47_spill] sm:$0xff] %v6417_v51  ;;  %9633 = vst [vmem:[#allocation48_spill] sm:$0xff] %v6420_v58  ;;  %v2387_v48 = vcombine.high %v2379_v52, %v2379_v52  ;;  %v2272_v16 = vcombine.high %v6398_v11, %v6398_v11  ;;  %v2320_v47 = vcombine.high %v6401_v0, %v6401_v0 }
 0x21c   :  { %9634 = vst [vmem:[#allocation49_spill] sm:$0xff] %v6423_v34  ;;  %9635 = vst [vmem:[#allocation50_spill] sm:$0xff] %v6426_v2  ;;  %v2321_v50 = vcombine.high %v6404_v38, %v6404_v38  ;;  %v6445_v49 = vrot.slane %v2379_v52, %v6150_v32  ;;  %v2273_v45 = vcombine.high %v6410_v60, %v6410_v60 }
 0x21d   :  { %9636 = vst [vmem:[#allocation51_spill] sm:$0xff] %v6433_v18  ;;  %v2388_v42 = vcombine.high %v2386_v21, %v2386_v21  ;;  %v6450_v57 = vrot.slane %v2386_v21, %v6150_v32  ;;  %v6453_v40 = vrot.slane %v2387_v48, %v6150_v32  ;;  %v2322_v29 = vcombine.high %v6417_v51, %v6417_v51 }
 0x21e   :  { %9637 = vst [vmem:[#allocation52_spill] sm:$0xff] %v6445_v49  ;;  %v2368_v17 = vcombine.high %v6420_v58, %v6420_v58  ;;  %v2369_v52 = vcombine.high %v6423_v34, %v6423_v34  ;;  %v2370_v8 = vcombine.high %v6426_v2, %v6426_v2  ;;  %v2371_v15 = vcombine.high %v6433_v18, %v6433_v18 }
 0x21f   :  { %9638 = vst [vmem:[#allocation53_spill] sm:$0xff] %v6450_v57  ;;  %9639 = vst [vmem:[#allocation54_spill] sm:$0xff] %v6453_v40  ;;  %v6466_v21 = vrot.slane %v2388_v42, %v6150_v32  ;;  %v2417_v48 = vcombine.high %v6445_v49, %v6445_v49  ;;  %v2418_v35 = vcombine.high %v6450_v57, %v6450_v57  ;;  %v451_v42 = vpop.permute.xlu0 %450 }
 0x220   :  { %v6477_v13 = vrot.slane %v2270_v27, %v6166_v28  ;;  %v6480_v24 = vrot.slane %v2272_v16, %v6166_v28  ;;  %v2419_v3 = vcombine.high %v6453_v40, %v6453_v40  ;;  %v6489_v61 = vrot.slane %v2271_v31, %v6166_v28 }
 0x221   :  { %9640 = vst [vmem:[#allocation55_spill] sm:$0xff] %v6466_v21  ;;  %v2420_v27 = vcombine.high %v6466_v21, %v6466_v21  ;;  %v6494_v16 = vrot.slane %v2273_v45, %v6166_v28  ;;  %v6501_v46 = vrot.slane %v2319_v36, %v6166_v28  ;;  %v6504_v14 = vrot.slane %v2321_v50, %v6166_v28  ;;  %v457_v36 = vpop.permute.xlu1 %456 }
 0x222   :  { %9641 = vst [vmem:[#allocation56_spill] sm:$0xff] %v6477_v13  ;;  %9642 = vst [vmem:[#allocation57_spill] sm:$0xff] %v6480_v24  ;;  %v6511_v45 = vrot.slane %v2320_v47, %v6166_v28  ;;  %v6514_v24 = vrot.slane %v2322_v29, %v6166_v28  ;;  %v6521_v50 = vrot.slane %v2368_v17, %v6166_v28 }
 0x223   :  { %9643 = vst [vmem:[#allocation58_spill] sm:$0xff] %v6489_v61  ;;  %9644 = vst [vmem:[#allocation59_spill] sm:$0xff] %v6494_v16  ;;  %v6524_v31 = vrot.slane %v2370_v8, %v6166_v28  ;;  %v6531_v29 = vrot.slane %v2369_v52, %v6166_v28  ;;  %v6534_v13 = vrot.slane %v2371_v15, %v6166_v28  ;;  %v737_v8 = vpop.permute.xlu0 %736 }
 0x224   :  { %9645 = vst [vmem:[#allocation60_spill] sm:$0xff] %v6501_v46  ;;  %9646 = vst [vmem:[#allocation61_spill] sm:$0xff] %v6504_v14  ;;  %v9654_v47 = vcombine.low %v6148_v5, %v6158_v33  ;;  %v596_v15 = vcombine.low %v6054_v63, %v6381_v12  ;;  %v597_v52 = vcombine.high %v6054_v63, %v6381_v12 }
 0x225   :  { %9647 = vst [vmem:[#allocation62_spill] sm:$0xff] %v6511_v45  ;;  %9648 = vst [vmem:[#allocation63_spill] sm:$0xff] %v6514_v24  ;;  %v6554_v49 = vrot.slane %v2419_v3, %v6166_v28  ;;  %v612_v17 = vcombine.low %v6428_v56, %v6436_v43  ;;  %v9656_v63 = vcombine.high %v6148_v5, %v6158_v33 }
 0x226   :  { %9649 = vst [vmem:[#allocation64_spill] sm:$0xff] %v6521_v50  ;;  %9650 = vst [vmem:[#allocation65_spill] sm:$0xff] %v6524_v31  ;;  %v6541_v31 = vrot.slane %v2417_v48, %v6166_v28  ;;  %v6547_v61 = vrot.slane %v9654_v47, %v6132_v39  ;;  %v613_v47 = vcombine.high %v6428_v56, %v6436_v43 }
 0x227   :  { %9651 = vst [vmem:[#allocation66_spill] sm:$0xff] %v6531_v29  ;;  %9652 = vst [vmem:[#allocation67_spill] sm:$0xff] %v6534_v13  ;;  %v6568_v12 = vrot.slane %v9656_v63, %v6132_v39  ;;  %v628_v3 = vcombine.low %v6062_v1, %v451_v42  ;;  %v604_v48 = vrot.slane %v596_v15, %v6132_v39  ;;  %v749_v63 = vpop.permute.xlu0 %748 }
 0x228   :  { %9653 = vst [vmem:[#allocation68_spill] sm:$0xff] %v6541_v31  ;;  %9655 = vst [vmem:[#allocation69_spill] sm:$0xff] %v6554_v49  ;;  %v629_v49 = vcombine.high %v6062_v1, %v451_v42  ;;  %v611_v57 = vrot.slane %v597_v52, %v6132_v39  ;;  %v620_v40 = vrot.slane %v612_v17, %v6132_v39 }
 0x229   :  { %v627_v43 = vrot.slane %v613_v47, %v6132_v39  ;;  %v6577_v56 = vrot.slane %v2418_v35, %v6166_v28  ;;  %v6580_v31 = vrot.slane %v2420_v27, %v6166_v28  ;;  %v836_v5 = vcombine.low %v6175_v37, %v6547_v61 }
 0x22a   :  { %v837_v1 = vcombine.high %v6175_v37, %v6547_v61  ;;  %v660_v33 = vcombine.low %v604_v48, %v620_v40  ;;  %v661_v42 = vcombine.high %v604_v48, %v620_v40  ;;  %v852_v17 = vcombine.low %v6178_v19, %v6568_v12 }
 0x22b   :  { %9657 = vst [vmem:[#allocation70_spill] sm:$0xff] %v6577_v56  ;;  %9658 = vst [vmem:[#allocation71_spill] sm:$0xff] %v6580_v31  ;;  %v676_v15 = vcombine.low %v611_v57, %v627_v43  ;;  %v677_v52 = vcombine.high %v611_v57, %v627_v43  ;;  %v853_v35 = vcombine.high %v6178_v19, %v6568_v12  ;;  %v743_v31 = vpop.permute.xlu1 %742 }
 0x22c   :  { %v644_v47 = vcombine.low %v445_v44, %v457_v36  ;;  %v645_v27 = vcombine.high %v445_v44, %v457_v36  ;;  %v668_v56 = vrot.slane %v660_v33, %v6138_v54  ;;  %v675_v21 = vrot.slane %v661_v42, %v6138_v54 }
 0x22d   :  { %v636_v37 = vrot.slane %v628_v3, %v6132_v39  ;;  %v643_v40 = vrot.slane %v629_v49, %v6132_v39  ;;  %v924_v48 = vcombine.low %v737_v8, %v749_v63  ;;  %v925_v43 = vcombine.high %v737_v8, %v749_v63 }
 0x22e   :  { %v652_v61 = vrot.slane %v644_v47, %v6132_v39  ;;  %v659_v57 = vrot.slane %v645_v27, %v6132_v39  ;;  %v6597_v13 = vrot.slane %v676_v15, %v6138_v54  ;;  %v6600_v19 = vrot.slane %v677_v52, %v6138_v54 }
 0x22f   :  { %v908_v44 = vcombine.low %v6068_v7, %v743_v31  ;;  %v909_v36 = vcombine.high %v6068_v7, %v743_v31  ;;  %v6605_v42 = vrot.slane %v924_v48, %v6132_v39  ;;  %v6608_v47 = vrot.slane %v925_v43, %v6132_v39 }
 0x230   :  { %v692_v12 = vcombine.low %v636_v37, %v652_v61  ;;  %v693_v3 = vcombine.high %v636_v37, %v652_v61  ;;  %v708_v33 = vcombine.low %v643_v40, %v659_v57  ;;  %v709_v49 = vcombine.high %v643_v40, %v659_v57 }
 0x231   :  { %v6611_v8 = vrot.slane %v908_v44, %v6132_v39  ;;  %v6614_v15 = vrot.slane %v909_v36, %v6132_v39  ;;  %v6646_v37 = vrot.slane %v837_v1, %v6138_v54  ;;  %v6649_v36 = vpop.permute.xlu0 %762 }
 0x232   :  { %v700_v52 = vrot.slane %v692_v12, %v6138_v54  ;;  %v707_v7 = vrot.slane %v693_v3, %v6138_v54  ;;  %v6619_v31 = vrot.slane %v708_v33, %v6138_v54  ;;  %v6622_v63 = vrot.slane %v709_v49, %v6138_v54 }
 0x233   :  { %9660 = vst [vmem:[#allocation73_spill] sm:$0xff] %v6646_v37  ;;  %v6652_v3 = vrot.slane %v852_v17, %v6138_v54 }
 0x234   :  { %v724_v57 = vcombine.low %v668_v56, %v700_v52  ;;  %v725_v48 = vcombine.high %v668_v56, %v700_v52  ;;  %v726_v43 = vcombine.low %v675_v21, %v707_v7  ;;  %v727_v44 = vcombine.high %v675_v21, %v707_v7 }
 0x235   :  { %v5671_v49 = vcombine.low %v700_v52, %v700_v52  ;;  %v5672_v61 = vcombine.high %v700_v52, %v700_v52  ;;  %v6643_v21 = vrot.slane %v836_v5, %v6138_v54  ;;  %v5673_v27 = vcombine.low %v707_v7, %v707_v7  ;;  %9661 = vst [vmem:[#allocation74_spill] sm:$0xff] %v6652_v3 }
 0x236   :  { %v3096_v40 = vrot.slane %v724_v57, %v6150_v32  ;;  %v3145_v56 = vrot.slane %v725_v48, %v6150_v32  ;;  %v3194_v12 = vrot.slane %v726_v43, %v6150_v32  ;;  %v6664_v43 = vrot.slane %v853_v35, %v6138_v54 }
 0x237   :  { %9659 = vst [vmem:[#allocation72_spill] sm:$0xff] %v6643_v21  ;;  %v3103_v33 = vrot.slane %v5671_v49, %v6150_v32  ;;  %v3152_v52 = vrot.slane %v5672_v61, %v6150_v32  ;;  %v3201_v29 = vrot.slane %v5673_v27, %v6150_v32  ;;  %v3243_v50 = vrot.slane %v727_v44, %v6150_v32 }
 0x238   :  { %v3104_v57 = vcombine.high %v3096_v40, %v3096_v40  ;;  %v6657_v48 = vrot.slane %v3096_v40, %v6150_v32  ;;  %v3153_v5 = vcombine.high %v3145_v56, %v3145_v56  ;;  %v6660_v1 = vrot.slane %v3145_v56, %v6150_v32  ;;  %9662 = vst [vmem:[#allocation75_spill] sm:$0xff] %v6664_v43 }
 0x239   :  { %v3105_v18 = vcombine.high %v3103_v33, %v3103_v33  ;;  %v3202_v17 = vcombine.high %v3194_v12, %v3194_v12  ;;  %v6669_v34 = vrot.slane %v3103_v33, %v6150_v32  ;;  %v3154_v61 = vcombine.high %v3152_v52, %v3152_v52 }
 0x23a   :  { %v5674_v40 = vcombine.high %v707_v7, %v707_v7  ;;  %v6673_v56 = vrot.slane %v3104_v57, %v6150_v32  ;;  %v6676_v27 = vrot.slane %v3152_v52, %v6150_v32  ;;  %v6679_v35 = vrot.slane %v3153_v5, %v6150_v32 }
 0x23b   :  { %v3203_v2 = vcombine.high %v3201_v29, %v3201_v29  ;;  %v6682_v58 = vrot.slane %v3105_v18, %v6150_v32  ;;  %v3134_v33 = vcombine.high %v6657_v48, %v6657_v48  ;;  %v3183_v7 = vcombine.high %v6660_v1, %v6660_v1 }
 0x23c   :  { %v6691_v57 = vrot.slane %v3154_v61, %v6150_v32  ;;  %v6694_v52 = vrot.slane %v3194_v12, %v6150_v32  ;;  %v6697_v5 = vrot.slane %v3201_v29, %v6150_v32  ;;  %v6700_v18 = vrot.slane %v3202_v17, %v6150_v32 }
 0x23d   :  { %v3135_v49 = vcombine.high %v6669_v34, %v6669_v34  ;;  %v6705_v24 = vrot.slane %v3203_v2, %v6150_v32  ;;  %v3250_v44 = vrot.slane %v5674_v40, %v6150_v32  ;;  %v3251_v45 = vcombine.high %v3243_v50, %v3243_v50 }
 0x23e   :  { %9663 = vst [vmem:[#allocation76_spill] sm:$0xff] %v6694_v52  ;;  %9664 = vst [vmem:[#allocation77_spill] sm:$0xff] %v6697_v5  ;;  %v3136_v61 = vcombine.high %v6673_v56, %v6673_v56  ;;  %v3184_v12 = vcombine.high %v6676_v27, %v6676_v27  ;;  %v3185_v29 = vcombine.high %v6679_v35, %v6679_v35 }
 0x23f   :  { %9665 = vst [vmem:[#allocation78_spill] sm:$0xff] %v6700_v18  ;;  %9666 = vst [vmem:[#allocation79_spill] sm:$0xff] %v6705_v24  ;;  %v6715_v17 = vrot.slane %v3243_v50, %v6150_v32  ;;  %v3137_v51 = vcombine.high %v6682_v58, %v6682_v58  ;;  %v3252_v2 = vcombine.high %v3250_v44, %v3250_v44 }
 0x240   :  { %v6720_v0 = vrot.slane %v3250_v44, %v6150_v32  ;;  %v6723_v40 = vrot.slane %v3251_v45, %v6150_v32  ;;  %v3186_v14 = vcombine.high %v6691_v57, %v6691_v57  ;;  %v3232_v46 = vcombine.high %v6694_v52, %v6694_v52 }
 0x241   :  { %9667 = vst [vmem:[#allocation80_spill] sm:$0xff] %v6715_v17  ;;  %v3233_v50 = vcombine.high %v6697_v5, %v6697_v5  ;;  %v3234_v38 = vcombine.high %v6700_v18, %v6700_v18  ;;  %v3235_v26 = vcombine.high %v6705_v24, %v6705_v24  ;;  %v6736_v44 = vrot.slane %v3252_v2, %v6150_v32 }
 0x242   :  { %9668 = vst [vmem:[#allocation81_spill] sm:$0xff] %v6720_v0  ;;  %9669 = vst [vmem:[#allocation82_spill] sm:$0xff] %v6723_v40  ;;  %v3281_v45 = vcombine.high %v6715_v17, %v6715_v17  ;;  %v3282_v60 = vcombine.high %v6720_v0, %v6720_v0  ;;  %v6747_v11 = vrot.slane %v3134_v33, %v6166_v28 }
 0x243   :  { %9670 = vst [vmem:[#allocation83_spill] sm:$0xff] %v6736_v44  ;;  %v6750_v6 = vrot.slane %v3136_v61, %v6166_v28  ;;  %v3283_v2 = vcombine.high %v6723_v40, %v6723_v40  ;;  %v6759_v10 = vrot.slane %v3135_v49, %v6166_v28  ;;  %v3284_v53 = vcombine.high %v6736_v44, %v6736_v44 }
 0x244   :  { %v6764_v33 = vrot.slane %v3137_v51, %v6166_v28  ;;  %v6771_v23 = vrot.slane %v3183_v7, %v6166_v28  ;;  %v6774_v16 = vrot.slane %v3185_v29, %v6166_v28  ;;  %v6781_v51 = vrot.slane %v3184_v12, %v6166_v28 }
 0x245   :  { %v6784_v61 = vrot.slane %v3186_v14, %v6166_v28  ;;  %v6791_v29 = vrot.slane %v3232_v46, %v6166_v28  ;;  %v6794_v49 = vrot.slane %v3234_v38, %v6166_v28  ;;  %v6801_v14 = vrot.slane %v3233_v50, %v6166_v28 }
 0x246   :  { %v6804_v62 = vrot.slane %v3235_v26, %v6166_v28  ;;  %v5675_v38 = vcombine.low %v6619_v31, %v6619_v31  ;;  %v9676_v41 = vcombine.low %v6597_v13, %v6619_v31  ;;  %v5676_v50 = vcombine.high %v6619_v31, %v6619_v31 }
 0x247   :  { %9671 = vst [vmem:[#allocation84_spill] sm:$0xff] %v6784_v61  ;;  %9672 = vst [vmem:[#allocation85_spill] sm:$0xff] %v6791_v29  ;;  %v9677_v26 = vcombine.high %v6597_v13, %v6619_v31  ;;  %v6823_v7 = vrot.slane %v3281_v45, %v6166_v28  ;;  %v6826_v46 = vrot.slane %v3283_v2, %v6166_v28 }
 0x248   :  { %9673 = vst [vmem:[#allocation86_spill] sm:$0xff] %v6794_v49  ;;  %9674 = vst [vmem:[#allocation87_spill] sm:$0xff] %v6801_v14  ;;  %v3960_v12 = vrot.slane %v9676_v41, %v6150_v32  ;;  %v5677_v30 = vcombine.low %v6622_v63, %v6622_v63  ;;  %v9680_v41 = vcombine.low %v6600_v19, %v6622_v63 }
 0x249   :  { %9675 = vst [vmem:[#allocation88_spill] sm:$0xff] %v6804_v62  ;;  %v4009_v22 = vrot.slane %v9677_v26, %v6150_v32  ;;  %9678 = vst [vmem:[#allocation89_spill] sm:$0xff] %v6823_v7  ;;  %v3967_v13 = vrot.slane %v5675_v38, %v6150_v32  ;;  %v4016_v45 = vrot.slane %v5676_v50, %v6150_v32 }
 0x24a   :  { %9679 = vst [vmem:[#allocation90_spill] sm:$0xff] %v6826_v46  ;;  %v4058_v25 = vrot.slane %v9680_v41, %v6150_v32  ;;  %v3968_v31 = vcombine.high %v3960_v12, %v3960_v12  ;;  %v6839_v26 = vrot.slane %v3960_v12, %v6150_v32  ;;  %v4065_v43 = vrot.slane %v5677_v30, %v6150_v32 }
 0x24b   :  { %v4017_v2 = vcombine.high %v4009_v22, %v4009_v22  ;;  %v6842_v55 = vrot.slane %v4009_v22, %v6150_v32  ;;  %v6848_v3 = vrot.slane %v3282_v60, %v6166_v28  ;;  %v3969_v4 = vcombine.high %v3967_v13, %v3967_v13 }
 0x24c   :  { %9681 = vst [vmem:[#allocation91_spill] sm:$0xff] %v6839_v26  ;;  %v4066_v38 = vcombine.high %v4058_v25, %v4058_v25  ;;  %v6851_v37 = vrot.slane %v3967_v13, %v6150_v32  ;;  %v4018_v50 = vcombine.high %v4016_v45, %v4016_v45  ;;  %v5678_v12 = vcombine.high %v6622_v63, %v6622_v63 }
 0x24d   :  { %9682 = vst [vmem:[#allocation92_spill] sm:$0xff] %v6848_v3  ;;  %v9683_v22 = vcombine.high %v6600_v19, %v6622_v63  ;;  %v6860_v21 = vrot.slane %v3968_v31, %v6150_v32  ;;  %v6863_v60 = vrot.slane %v4016_v45, %v6150_v32  ;;  %v6866_v41 = vrot.slane %v4017_v2, %v6150_v32 }
 0x24e   :  { %v4067_v13 = vcombine.high %v4065_v43, %v4065_v43  ;;  %v6869_v3 = vrot.slane %v3284_v53, %v6166_v28  ;;  %v6872_v44 = vrot.slane %v3969_v4, %v6150_v32  ;;  %v3998_v19 = vcombine.high %v6839_v26, %v6839_v26  ;;  %v6890_v4 = vpop.permute.xlu1 %756 }
 0x24f   :  { %v4107_v30 = vrot.slane %v9683_v22, %v6150_v32  ;;  %v4047_v63 = vcombine.high %v6842_v55, %v6842_v55  ;;  %v6879_v31 = vrot.slane %v4018_v50, %v6150_v32  ;;  %v6882_v45 = vrot.slane %v4058_v25, %v6150_v32 }
 0x250   :  { %9684 = vst [vmem:[#allocation93_spill] sm:$0xff] %v6869_v3  ;;  %v6885_v2 = vrot.slane %v4065_v43, %v6150_v32  ;;  %v6888_v53 = vrot.slane %v4066_v38, %v6150_v32  ;;  %v3999_v22 = vcombine.high %v6851_v37, %v6851_v37  ;;  %v6895_v3 = vrot.slane %v4067_v13, %v6150_v32 }
 0x251   :  { %v4114_v50 = vrot.slane %v5678_v12, %v6150_v32  ;;  %v4115_v0 = vcombine.high %v4107_v30, %v4107_v30  ;;  %v4000_v25 = vcombine.high %v6860_v21, %v6860_v21  ;;  %v4048_v43 = vcombine.high %v6863_v60, %v6863_v60 }
 0x252   :  { %9685 = vst [vmem:[#allocation94_spill] sm:$0xff] %v6895_v3  ;;  %v4049_v38 = vcombine.high %v6866_v41, %v6866_v41  ;;  %v6905_v46 = vrot.slane %v4107_v30, %v6150_v32  ;;  %v4001_v7 = vcombine.high %v6872_v44, %v6872_v44  ;;  %v4050_v17 = vcombine.high %v6879_v31, %v6879_v31 }
 0x253   :  { %v4116_v13 = vcombine.high %v4114_v50, %v4114_v50  ;;  %v6910_v40 = vrot.slane %v4114_v50, %v6150_v32  ;;  %v6913_v12 = vrot.slane %v4115_v0, %v6150_v32  ;;  %v4096_v62 = vcombine.high %v6882_v45, %v6882_v45 }
 0x254   :  { %9686 = vst [vmem:[#allocation95_spill] sm:$0xff] %v6905_v46  ;;  %v4097_v30 = vcombine.high %v6885_v2, %v6885_v2  ;;  %v4098_v14 = vcombine.high %v6888_v53, %v6888_v53  ;;  %v4099_v24 = vcombine.high %v6895_v3, %v6895_v3  ;;  %v4145_v0 = vcombine.high %v6905_v46, %v6905_v46 }
 0x255   :  { %9687 = vst [vmem:[#allocation96_spill] sm:$0xff] %v6910_v40  ;;  %9688 = vst [vmem:[#allocation97_spill] sm:$0xff] %v6913_v12  ;;  %v6926_v50 = vrot.slane %v4116_v13, %v6150_v32  ;;  %v4146_v49 = vcombine.high %v6910_v40, %v6910_v40  ;;  %v6937_v18 = vrot.slane %v3998_v19, %v6166_v28  ;;  %v769_v32 = vpop.permute.xlu1 %768 }
 0x256   :  { %v6940_v52 = vrot.slane %v4000_v25, %v6166_v28  ;;  %v4147_v13 = vcombine.high %v6913_v12, %v6913_v12  ;;  %v6949_v26 = vrot.slane %v3999_v22, %v6166_v28  ;;  %v6954_v29 = vrot.slane %v4001_v7, %v6166_v28 }
 0x257   :  { %9689 = vst [vmem:[#allocation98_spill] sm:$0xff] %v6926_v50  ;;  %v4148_v19 = vcombine.high %v6926_v50, %v6926_v50  ;;  %v6961_v61 = vrot.slane %v4047_v63, %v6166_v28  ;;  %v6964_v5 = vrot.slane %v4049_v38, %v6166_v28  ;;  %v6971_v7 = vrot.slane %v4048_v43, %v6166_v28 }
 0x258   :  { %9690 = vst [vmem:[#allocation99_spill] sm:$0xff] %v6940_v52  ;;  %9691 = vst [vmem:[#allocation100_spill] sm:$0xff] %v6949_v26  ;;  %v6974_v25 = vrot.slane %v4050_v17, %v6166_v28  ;;  %v6981_v38 = vrot.slane %v4096_v62, %v6166_v28  ;;  %v6984_v22 = vrot.slane %v4098_v14, %v6166_v28  ;;  %v761_v17 = vpop.permute.xlu0 %760 }
 0x259   :  { %v6994_v52 = vrot.slane %v4099_v24, %v6166_v28  ;;  %v767_v63 = vpop.permute.xlu1 %766  ;;  %v7004_v26 = vrot.slane %v4147_v13, %v6166_v28  ;;  %v7011_v43 = vrot.slane %v4146_v49, %v6166_v28  ;;  %v7014_v62 = vrot.slane %v4148_v19, %v6166_v28 }
 0x25a   :  { %9692 = vst [vmem:[#allocation101_spill] sm:$0xff] %v6974_v25  ;;  %9693 = vst [vmem:[#allocation102_spill] sm:$0xff] %v6984_v22  ;;  %v6991_v25 = vrot.slane %v4097_v30, %v6166_v28  ;;  %v7001_v22 = vrot.slane %v4145_v0, %v6166_v28  ;;  %v804_v14 = vcombine.low %v6046_v59, %v761_v17 }
 0x25b   :  { %9695 = vst [vmem:[#allocation104_spill] sm:$0xff] %v6994_v52  ;;  %9697 = vst [vmem:[#allocation106_spill] sm:$0xff] %v7004_v26  ;;  %v805_v0 = vcombine.high %v6046_v59, %v761_v17  ;;  %v957_v13 = vcombine.high %v6890_v4, %v769_v32  ;;  %v820_v26 = vcombine.low %v6324_v20, %v767_v63 }
 0x25c   :  { %9694 = vst [vmem:[#allocation103_spill] sm:$0xff] %v6991_v25  ;;  %9696 = vst [vmem:[#allocation105_spill] sm:$0xff] %v7001_v22  ;;  %v956_v22 = vcombine.low %v6890_v4, %v769_v32  ;;  %v821_v30 = vcombine.high %v6324_v20, %v767_v63  ;;  %v9700_v49 = vcombine.low %v6611_v8, %v6605_v42 }
 0x25d   :  { %9698 = vst [vmem:[#allocation107_spill] sm:$0xff] %v7011_v43  ;;  %9699 = vst [vmem:[#allocation108_spill] sm:$0xff] %v7014_v62  ;;  %v9701_v19 = vcombine.high %v6611_v8, %v6605_v42  ;;  %v9702_v59 = vcombine.low %v6080_v9, %v6649_v36  ;;  %v9703_v4 = vcombine.high %v6080_v9, %v6649_v36 }
 0x25e   :  { %v980_v24 = vrot.slane %v9700_v49, %v6138_v54  ;;  %v964_v32 = vrot.slane %v956_v22, %v6132_v39  ;;  %v971_v63 = vrot.slane %v957_v13, %v6132_v39  ;;  %v828_v49 = vrot.slane %v820_v26, %v6132_v39 }
 0x25f   :  { %v987_v62 = vrot.slane %v9701_v19, %v6138_v54  ;;  %v948_v17 = vrot.slane %v9702_v59, %v6132_v39  ;;  %v955_v20 = vrot.slane %v9703_v4, %v6132_v39  ;;  %v835_v43 = vrot.slane %v821_v30, %v6132_v39 }
 0x260   :  { %v9704_v42 = vcombine.low %v6614_v15, %v6608_v47  ;;  %v9705_v19 = vcombine.high %v6614_v15, %v6608_v47  ;;  %v812_v9 = vrot.slane %v804_v14, %v6132_v39  ;;  %v819_v36 = vrot.slane %v805_v0, %v6132_v39  ;;  %v9732_v39 = vld [vmem:[#allocation80_spill] sm:$0xff] }
 0x261   :  { %v1004_v22 = vcombine.low %v948_v17, %v964_v32  ;;  %v1005_v13 = vcombine.high %v948_v17, %v964_v32  ;;  %v1020_v4 = vcombine.low %v955_v20, %v971_v63  ;;  %v1021_v26 = vcombine.high %v955_v20, %v971_v63 }
 0x262   :  { %v996_v8 = vrot.slane %v9704_v42, %v6138_v54  ;;  %v1003_v59 = vrot.slane %v9705_v19, %v6138_v54  ;;  %v868_v50 = vcombine.low %v812_v9, %v828_v49  ;;  %v869_v30 = vcombine.high %v812_v9, %v828_v49 }
 0x263   :  { %v884_v40 = vcombine.low %v819_v36, %v835_v43  ;;  %v885_v12 = vcombine.high %v819_v36, %v835_v43  ;;  %v1012_v46 = vrot.slane %v1004_v22, %v6138_v54  ;;  %v1019_v42 = vrot.slane %v1005_v13, %v6138_v54 }
 0x264   :  { %v1028_v52 = vrot.slane %v1020_v4, %v6138_v54  ;;  %v1035_v47 = vrot.slane %v1021_v26, %v6138_v54  ;;  %v7057_v15 = vrot.slane %v868_v50, %v6138_v54  ;;  %v7060_v14 = vrot.slane %v869_v30, %v6138_v54 }
 0x265   :  { %v7063_v0 = vrot.slane %v884_v40, %v6138_v54  ;;  %v7066_v43 = vrot.slane %v885_v12, %v6138_v54  ;;  %v1036_v17 = vcombine.low %v980_v24, %v1012_v46  ;;  %v1037_v20 = vcombine.high %v980_v24, %v1012_v46 }
 0x266   :  { %9706 = vst [vmem:[#allocation109_spill] sm:$0xff] %v7057_v15  ;;  %9707 = vst [vmem:[#allocation110_spill] sm:$0xff] %v7060_v14  ;;  %v1038_v32 = vcombine.low %v987_v62, %v1019_v42  ;;  %v1039_v63 = vcombine.high %v987_v62, %v1019_v42  ;;  %v7068_v49 = vcombine.low %v996_v8, %v1028_v52  ;;  %v9738_v15 = vld [vmem:[#allocation81_spill] sm:$0xff] }
 0x267   :  { %9708 = vst [vmem:[#allocation111_spill] sm:$0xff] %v7063_v0  ;;  %9709 = vst [vmem:[#allocation112_spill] sm:$0xff] %v7066_v43  ;;  %v7070_v19 = vcombine.high %v996_v8, %v1028_v52  ;;  %v7072_v9 = vcombine.low %v1003_v59, %v1035_v47  ;;  %v7074_v50 = vcombine.high %v1003_v59, %v1035_v47  ;;  %v9734_v43 = vld [vmem:[#allocation82_spill] sm:$0xff]  ;;  %v9736_v0 = vld [vmem:[#allocation89_spill] sm:$0xff] }
 0x268   :  { %v9711_v36 = vrot.slane %v6657_v48, %v6166_v28  ;;  %v9712_v12 = vrot.slane %v6673_v56, %v6166_v28  ;;  %v3447_v46 = vmul.f32 %v6747_v11, %v1036_v17  ;;  %v3448_v62 = vmul.f32 %v6750_v6, %v1036_v17 }
 0x269   :  { %9710 = vst [vmem:[#allocation113_spill] sm:$0xff] %v7074_v50  ;;  %v9713_v52 = vrot.slane %v6669_v34, %v6166_v28  ;;  %v9714_v8 = vrot.slane %v6682_v58, %v6166_v28  ;;  %v7091_v13 = vmul.f32 %v6759_v10, %v1036_v17  ;;  %v7094_v48 = vmul.f32 %v6764_v33, %v1036_v17  ;;  %v9740_v50 = vld [vmem:[#allocation83_spill] sm:$0xff] }
 0x26a   :  { %v3445_v40 = vmul.f32 %v9711_v36, %v1036_v17  ;;  %v3446_v22 = vmul.f32 %v9712_v12, %v1036_v17  ;;  %v9715_v56 = vrot.slane %v6660_v1, %v6166_v28  ;;  %v9716_v6 = vrot.slane %v6679_v35, %v6166_v28  ;;  %v9719_v1 = vld [vmem:[#allocation84_spill] sm:$0xff] }
 0x26b   :  { %v3449_v24 = vmul.f32 %v9713_v52, %v1036_v17  ;;  %v3450_v59 = vmul.f32 %v9714_v8, %v1036_v17  ;;  %v3455_v34 = vmul.f32 %v6771_v23, %v1037_v20  ;;  %v3456_v26 = vmul.f32 %v6774_v16, %v1037_v20  ;;  %v9720_v17 = vld [vmem:[#allocation76_spill] sm:$0xff]  ;;  %v9722_v23 = vld [vmem:[#allocation78_spill] sm:$0xff]  ;;  %v9724_v52 = vld [vmem:[#allocation85_spill] sm:$0xff] }
 0x26c   :  { %v3453_v11 = vmul.f32 %v9715_v56, %v1037_v20  ;;  %v3454_v4 = vmul.f32 %v9716_v6, %v1037_v20  ;;  %v9717_v58 = vrot.slane %v6676_v27, %v6166_v28  ;;  %v9718_v33 = vrot.slane %v6691_v57, %v6166_v28  ;;  %v9725_v8 = vld [vmem:[#allocation86_spill] sm:$0xff]  ;;  %v9726_v6 = vld [vmem:[#allocation77_spill] sm:$0xff] }
 0x26d   :  { %v3459_v42 = vmul.f32 %v6781_v51, %v1037_v20  ;;  %v7112_v47 = vmul.f32 %v9719_v1, %v1037_v20  ;;  %v9721_v35 = vrot.slane %v9720_v17, %v6166_v28  ;;  %v9723_v16 = vrot.slane %v9722_v23, %v6166_v28  ;;  %v9728_v51 = vld [vmem:[#allocation79_spill] sm:$0xff]  ;;  %v9731_v17 = vld [vmem:[#allocation88_spill] sm:$0xff] }
 0x26e   :  { %v3457_v10 = vmul.f32 %v9717_v58, %v1037_v20  ;;  %v3458_v30 = vmul.f32 %v9718_v33, %v1037_v20  ;;  %v3463_v27 = vmul.f32 %v9724_v52, %v1038_v32  ;;  %v3464_v56 = vmul.f32 %v9725_v8, %v1038_v32  ;;  %v9730_v1 = vld [vmem:[#allocation87_spill] sm:$0xff] }
 0x26f   :  { %v3461_v36 = vmul.f32 %v9721_v35, %v1038_v32  ;;  %v3462_v12 = vmul.f32 %v9723_v16, %v1038_v32  ;;  %v9727_v57 = vrot.slane %v9726_v6, %v6166_v28  ;;  %v9729_v20 = vrot.slane %v9728_v51, %v6166_v28  ;;  %v9737_v6 = vld [vmem:[#allocation90_spill] sm:$0xff] }
 0x270   :  { %v3467_v54 = vmul.f32 %v9730_v1, %v1038_v32  ;;  %v3468_v35 = vmul.f32 %v9731_v17, %v1038_v32  ;;  %v9733_v23 = vrot.slane %v9732_v39, %v6166_v28  ;;  %v9735_v52 = vrot.slane %v9734_v43, %v6166_v28  ;;  %v9742_v17 = vld [vmem:[#allocation92_spill] sm:$0xff]  ;;  %v9743_v39 = vld [vmem:[#allocation93_spill] sm:$0xff] }
 0x271   :  { %v3465_v58 = vmul.f32 %v9727_v57, %v1038_v32  ;;  %v3466_v33 = vmul.f32 %v9729_v20, %v1038_v32  ;;  %v3471_v14 = vmul.f32 %v9736_v0, %v1039_v63  ;;  %v3472_v57 = vmul.f32 %v9737_v6, %v1039_v63 }
 0x272   :  { %v3469_v16 = vmul.f32 %v9733_v23, %v1039_v63  ;;  %v3470_v8 = vmul.f32 %v9735_v52, %v1039_v63  ;;  %v9739_v51 = vrot.slane %v9738_v15, %v6166_v28  ;;  %v9741_v1 = vrot.slane %v9740_v50, %v6166_v28 }
 0x273   :  { %v3475_v25 = vmul.f32 %v9742_v17, %v1039_v63  ;;  %v3476_v23 = vmul.f32 %v9743_v39, %v1039_v63  ;;  %v3477_v3 = vsel %vm1748_vm1, %v3445_v40, 0.0  ;;  %v3478_v43 = vsel %vm1748_vm1, %v3453_v11, 0.0 }
 0x274   :  { %v3473_v20 = vmul.f32 %v9739_v51, %v1039_v63  ;;  %v3474_v32 = vmul.f32 %v9741_v1, %v1039_v63  ;;  %v3480_v0 = vsel %vm1748_vm1, %v3461_v36, 0.0  ;;  %v3482_v52 = vsel %vm1748_vm1, %v3469_v16, 0.0 }
 0x275   :  { %v3479_v6 = vadd.f32 %v3478_v43, %v3477_v3  ;;  %v3484_v15 = vsel %vm1748_vm1, %v3446_v22, 0.0  ;;  %v3485_v51 = vsel %vm1748_vm1, %v3454_v4, 0.0  ;;  %v3487_v50 = vsel %vm1748_vm1, %v3462_v12, 0.0 }
 0x276   :  { %v3486_v1 = vadd.f32 %v3485_v51, %v3484_v15  ;;  %v3489_v17 = vsel %vm1748_vm1, %v3470_v8, 0.0  ;;  %v3491_v63 = vsel %vm1748_vm1, %v3447_v46, 0.0  ;;  %v3492_v40 = vsel %vm1748_vm1, %v3455_v34, 0.0 }
 0x277   :  { %v3481_v39 = vadd.f32 %v3480_v0, %v3479_v6  ;;  %v3493_v11 = vadd.f32 %v3492_v40, %v3491_v63  ;;  %v3494_v36 = vsel %vm1748_vm1, %v3463_v27, 0.0  ;;  %v3496_v16 = vsel %vm1748_vm1, %v3471_v14, 0.0 }
 0x278   :  { %v3488_v3 = vadd.f32 %v3487_v50, %v3486_v1  ;;  %v3498_v22 = vsel %vm1748_vm1, %v3448_v62, 0.0  ;;  %v3499_v4 = vsel %vm1748_vm1, %v3456_v26, 0.0  ;;  %v3501_v12 = vsel %vm1748_vm1, %v3464_v56, 0.0 }
 0x279   :  { %v3483_v43 = vadd.f32 %v3482_v52, %v3481_v39  ;;  %v3495_v15 = vadd.f32 %v3494_v36, %v3493_v11  ;;  %v3500_v8 = vadd.f32 %v3499_v4, %v3498_v22  ;;  %v3503_v46 = vsel %vm1748_vm1, %v3472_v57, 0.0 }
 0x27a   :  { %v3490_v51 = vadd.f32 %v3489_v17, %v3488_v3  ;;  %v3505_v34 = vsel %vm1748_vm1, %v3449_v24, 0.0  ;;  %v3506_v0 = vsel %vm1748_vm1, %v3457_v10, 0.0  ;;  %v3508_v27 = vsel %vm1748_vm1, %v3465_v58, 0.0 }
 0x27b   :  { %v3497_v14 = vadd.f32 %v3496_v16, %v3495_v15  ;;  %v3502_v6 = vadd.f32 %v3501_v12, %v3500_v8  ;;  %v3507_v50 = vadd.f32 %v3506_v0, %v3505_v34  ;;  %v3510_v62 = vsel %vm1748_vm1, %v3473_v20, 0.0 }
 0x27c   :  { %v3512_v26 = vsel %vm1748_vm1, %v3450_v59, 0.0  ;;  %v3513_v56 = vsel %vm1748_vm1, %v3458_v30, 0.0  ;;  %v3515_v52 = vsel %vm1748_vm1, %v3466_v33, 0.0  ;;  %v3517_v57 = vsel %vm1748_vm1, %v3474_v32, 0.0 }
 0x27d   :  { %v3504_v1 = vadd.f32 %v3503_v46, %v3502_v6  ;;  %v3509_v17 = vadd.f32 %v3508_v27, %v3507_v50  ;;  %v3514_v24 = vadd.f32 %v3513_v56, %v3512_v26  ;;  %v3519_v10 = vsel %vm1748_vm1, %v7091_v13, 0.0 }
 0x27e   :  { %v3520_v58 = vsel %vm1748_vm1, %v3459_v42, 0.0  ;;  %v3522_v63 = vsel %vm1748_vm1, %v3467_v54, 0.0  ;;  %v3524_v20 = vsel %vm1748_vm1, %v3475_v25, 0.0  ;;  %v3526_v59 = vsel %vm1748_vm1, %v7094_v48, 0.0 }
 0x27f   :  { %v3511_v30 = vadd.f32 %v3510_v62, %v3509_v17  ;;  %v3516_v40 = vadd.f32 %v3515_v52, %v3514_v24  ;;  %v3521_v33 = vadd.f32 %v3520_v58, %v3519_v10  ;;  %v3527_v32 = vsel %vm1748_vm1, %v7112_v47, 0.0 }
 0x280   :  { %v3528_v39 = vadd.f32 %v3527_v32, %v3526_v59  ;;  %v3529_v11 = vsel %vm1748_vm1, %v3468_v35, 0.0  ;;  %v3531_v13 = vsel %vm1748_vm1, %v3476_v23, 0.0  ;;  %v7181_v36 = vmul.f32 0.5, %v3483_v43 }
 0x281   :  { %v3518_v42 = vadd.f32 %v3517_v57, %v3516_v40  ;;  %v3523_v54 = vadd.f32 %v3522_v63, %v3521_v33  ;;  %v7183_v16 = vmul.f32 0.5, %v3490_v51  ;;  %v7185_v25 = vmul.f32 0.5, %v3497_v14 }
 0x282   :  { %v3530_v48 = vadd.f32 %v3529_v11, %v3528_v39  ;;  %v7187_v3 = vmul.f32 0.5, %v3504_v1  ;;  %v7189_v22 = vmul.f32 0.5, %v3511_v30  ;;  %v3541_v47 = vsel %vm1748_vm1, %v7181_v36, -inf }
 0x283   :  { %v3525_v4 = vadd.f32 %v3524_v20, %v3523_v54  ;;  %v7193_v35 = vmul.f32 0.5, %v3518_v42  ;;  %v3542_v23 = vrot.slane %v3541_v47, 4  ;;  %v3548_v12 = vsel %vm1748_vm1, %v7183_v16, -inf }
 0x284   :  { %v3532_v43 = vadd.f32 %v3531_v13, %v3530_v48  ;;  %v3549_v15 = vrot.slane %v3548_v12, 4  ;;  %v3555_v8 = vsel %vm1748_vm1, %v7185_v25, -inf  ;;  %v3562_v46 = vsel %vm1748_vm1, %v7187_v3, -inf }
 0x285   :  { %v7201_v51 = vmul.f32 0.5, %v3525_v4  ;;  %v3543_v34 = vmax.f32 %v3541_v47, %v3542_v23  ;;  %v3556_v0 = vrot.slane %v3555_v8, 4  ;;  %v3563_v27 = vrot.slane %v3562_v46, 4 }
 0x286   :  { %v7203_v14 = vmul.f32 0.5, %v3532_v43  ;;  %v3550_v6 = vmax.f32 %v3548_v12, %v3549_v15  ;;  %v3569_v50 = vsel %vm1748_vm1, %v7189_v22, -inf  ;;  %v3576_v62 = vsel %vm1748_vm1, %v7193_v35, -inf }
 0x287   :  { %v3544_v26 = vrot.slane %v3543_v34, 2  ;;  %v3557_v56 = vmax.f32 %v3555_v8, %v3556_v0  ;;  %v3564_v52 = vmax.f32 %v3562_v46, %v3563_v27  ;;  %v3570_v57 = vrot.slane %v3569_v50, 4 }
 0x288   :  { %9744 = vst [vmem:[#allocation84_spill] sm:$0xff] %v7203_v14  ;;  %v3551_v1 = vrot.slane %v3550_v6, 2  ;;  %v3577_v17 = vrot.slane %v3576_v62, 4  ;;  %v3583_v24 = vsel %vm1748_vm1, %v7201_v51, -inf  ;;  %v3590_v10 = vsel %vm1748_vm1, %v7203_v14, -inf }
 0x289   :  { %v3545_v58 = vmax.f32 %v3543_v34, %v3544_v26  ;;  %v3558_v63 = vrot.slane %v3557_v56, 2  ;;  %v3565_v20 = vrot.slane %v3564_v52, 2  ;;  %v3571_v59 = vmax.f32 %v3569_v50, %v3570_v57 }
 0x28a   :  { %v3552_v30 = vmax.f32 %v3550_v6, %v3551_v1  ;;  %v3578_v40 = vmax.f32 %v3576_v62, %v3577_v17  ;;  %v3584_v33 = vrot.slane %v3583_v24, 4  ;;  %v3591_v32 = vrot.slane %v3590_v10, 4 }
 0x28b   :  { %v3546_v39 = vrot.slane %v3545_v58, 1  ;;  %v3559_v11 = vmax.f32 %v3557_v56, %v3558_v63  ;;  %v3566_v13 = vmax.f32 %v3564_v52, %v3565_v20  ;;  %v3572_v42 = vrot.slane %v3571_v59, 2 }
 0x28c   :  { %v3553_v54 = vrot.slane %v3552_v30, 1  ;;  %v3579_v48 = vrot.slane %v3578_v40, 2  ;;  %v3585_v47 = vmax.f32 %v3583_v24, %v3584_v33  ;;  %v3592_v4 = vmax.f32 %v3590_v10, %v3591_v32 }
 0x28d   :  { %v3547_v23 = vmax.f32 %v3545_v58, %v3546_v39  ;;  %v3560_v12 = vrot.slane %v3559_v11, 1  ;;  %v3567_v43 = vrot.slane %v3566_v13, 1  ;;  %v3573_v15 = vmax.f32 %v3571_v59, %v3572_v42 }
 0x28e   :  { %v3554_v8 = vmax.f32 %v3552_v30, %v3553_v54  ;;  %v3580_v46 = vmax.f32 %v3578_v40, %v3579_v48  ;;  %v3586_v34 = vrot.slane %v3585_v47, 2  ;;  %v3593_v0 = vrot.slane %v3592_v4, 2 }
 0x28f   :  { %v3561_v27 = vmax.f32 %v3559_v11, %v3560_v12  ;;  %v3568_v6 = vmax.f32 %v3566_v13, %v3567_v43  ;;  %v3574_v50 = vrot.slane %v3573_v15, 1  ;;  %v3597_v62 = vsub.f32 %v7181_v36, %v3547_v23 }
 0x290   :  { %v3581_v26 = vrot.slane %v3580_v46, 1  ;;  %v3587_v56 = vmax.f32 %v3585_v47, %v3586_v34  ;;  %v3594_v52 = vmax.f32 %v3592_v4, %v3593_v0  ;;  %v3598_v57 = vsub.f32 %v7183_v16, %v3554_v8  ;;  %v9749_v47 = vld [vmem:[#allocation99_spill] sm:$0xff] }
 0x291   :  { %v3575_v1 = vmax.f32 %v3573_v15, %v3574_v50  ;;  %v3599_v17 = vsub.f32 %v7185_v25, %v3561_v27  ;;  %v3600_v24 = vsub.f32 %v7187_v3, %v3568_v6  ;;  %v3605_v10 = vmul.f32 1.442695, %v3597_v62  ;;  %v9746_v3 = vld [vmem:[#allocation91_spill] sm:$0xff] }
 0x292   :  { %v3582_v58 = vmax.f32 %v3580_v46, %v3581_v26  ;;  %v3588_v63 = vrot.slane %v3587_v56, 1  ;;  %v3595_v20 = vrot.slane %v3594_v52, 1  ;;  %v3607_v59 = vmul.f32 1.442695, %v3598_v57  ;;  %v9762_v57 = vld [vmem:[#allocation94_spill] sm:$0xff] }
 0x293   :  { %v3601_v30 = vsub.f32 %v7189_v22, %v3575_v1  ;;  %5700 = vpow2.f32 %v3605_v10  ;;  %v3609_v40 = vmul.f32 1.442695, %v3599_v17  ;;  %v3611_v36 = vmul.f32 1.442695, %v3600_v24  ;;  %v9764_v17 = vld [vmem:[#allocation103_spill] sm:$0xff]  ;;  %v9765_v24 = vld [vmem:[#allocation104_spill] sm:$0xff] }
 0x294   :  { %v3589_v33 = vmax.f32 %v3587_v56, %v3588_v63  ;;  %v7218_v32 = vmax.f32 %v3594_v52, %v3595_v20  ;;  %v3602_v16 = vsub.f32 %v7193_v35, %v3582_v58  ;;  %5702 = vpow2.f32 %v3607_v59  ;;  %v9766_v10 = vld [vmem:[#allocation113_spill] sm:$0xff]  ;;  %v9767_v58 = vld [vmem:[#allocation95_spill] sm:$0xff] }
 0x295   :  { %5704 = vpow2.f32 %v3609_v40  ;;  %v3613_v25 = vmul.f32 1.442695, %v3601_v30  ;;  %v9747_v39 = vrot.slane %v9746_v3, %v6166_v28  ;;  %v9748_v22 = vrot.slane %v6860_v21, %v6166_v28  ;;  %v9771_v40 = vld [vmem:[#allocation105_spill] sm:$0xff] }
 0x296   :  { %9745 = vst [vmem:[#allocation76_spill] sm:$0xff] %v7218_v32  ;;  %v3603_v42 = vsub.f32 %v7201_v51, %v3589_v33  ;;  %5706 = vpow2.f32 %v3611_v36  ;;  %v3615_v35 = vmul.f32 1.442695, %v3602_v16  ;;  %v4311_v48 = vmul.f32 %v6937_v18, %v7068_v49  ;;  %v9752_v18 = vld [vmem:[#allocation100_spill] sm:$0xff]  ;;  %v9772_v33 = vld [vmem:[#allocation106_spill] sm:$0xff] }
 0x297   :  { %v4309_v11 = vmul.f32 %v9747_v39, %v7068_v49  ;;  %v4310_v13 = vmul.f32 %v9748_v22, %v7068_v49  ;;  %5708 = vpow2.f32 %v3613_v25  ;;  %v7236_v4 = vmul.f32 %v9749_v47, %v7068_v49  ;;  %v9773_v25 = vld [vmem:[#allocation96_spill] sm:$0xff]  ;;  %v9775_v39 = vld [vmem:[#allocation98_spill] sm:$0xff] }
 0x298   :  { %v9750_v21 = vrot.slane %v6851_v37, %v6166_v28  ;;  %5710 = vpow2.f32 %v3615_v35  ;;  %v3617_v51 = vmul.f32 1.442695, %v3603_v42  ;;  %v9751_v12 = vrot.slane %v6872_v44, %v6166_v28  ;;  %v9777_v35 = vld [vmem:[#allocation107_spill] sm:$0xff] }
 0x299   :  { %v7252_v15 = vmul.f32 %v9752_v18, %v7068_v49  ;;  %v7256_v8 = vmul.f32 %v6954_v29, %v7068_v49  ;;  %v9753_v37 = vrot.slane %v6842_v55, %v6166_v28  ;;  %v9754_v34 = vrot.slane %v6866_v41, %v6166_v28 }
 0x29a   :  { %v7242_v23 = vmul.f32 %v9750_v21, %v7068_v49  ;;  %v7248_v43 = vmul.f32 %v9751_v12, %v7068_v49  ;;  %v4319_v0 = vmul.f32 %v6961_v61, %v7070_v19  ;;  %5712 = vpow2.f32 %v3617_v51  ;;  %v9757_v61 = vld [vmem:[#allocation101_spill] sm:$0xff]  ;;  %v9778_v21 = vld [vmem:[#allocation108_spill] sm:$0xff] }
 0x29b   :  { %v4317_v46 = vmul.f32 %v9753_v37, %v7070_v19  ;;  %v4318_v44 = vmul.f32 %v9754_v34, %v7070_v19  ;;  %v4320_v27 = vmul.f32 %v6964_v5, %v7070_v19  ;;  %v9755_v29 = vrot.slane %v6863_v60, %v6166_v28 }
 0x29c   :  { %v9756_v55 = vrot.slane %v6879_v31, %v6166_v28  ;;  %v7282_v41 = vmul.f32 %v6971_v7, %v7070_v19  ;;  %v7286_v50 = vmul.f32 %v9757_v61, %v7070_v19  ;;  %v9758_v5 = vrot.slane %v6882_v45, %v6166_v28  ;;  %v9760_v7 = vld [vmem:[#allocation102_spill] sm:$0xff] }
 0x29d   :  { %v4321_v49 = vmul.f32 %v9755_v29, %v7070_v19  ;;  %v9759_v62 = vrot.slane %v6888_v53, %v6166_v28  ;;  %v4327_v26 = vmul.f32 %v6981_v38, %v7072_v9  ;;  %v4328_v56 = vmul.f32 %v9760_v7, %v7072_v9 }
 0x29e   :  { %v7278_v6 = vmul.f32 %v9756_v55, %v7070_v19  ;;  %v4325_v60 = vmul.f32 %v9758_v5, %v7072_v9  ;;  %v9761_v19 = vrot.slane %v6885_v2, %v6166_v28  ;;  %v9763_v45 = vrot.slane %v9762_v57, %v6166_v28  ;;  %v9769_v2 = vld [vmem:[#allocation97_spill] sm:$0xff] }
 0x29f   :  { %v4326_v31 = vmul.f32 %v9759_v62, %v7072_v9  ;;  %v7310_v53 = vmul.f32 %v9764_v17, %v7072_v9  ;;  %v7314_v38 = vmul.f32 %v9765_v24, %v7072_v9  ;;  %v9768_v63 = vrot.slane %v9767_v58, %v6166_v28 }
 0x2a0   :  { %v4329_v52 = vmul.f32 %v9761_v19, %v7072_v9  ;;  %v4330_v1 = vmul.f32 %v9763_v45, %v7072_v9  ;;  %v9770_v59 = vrot.slane %v9769_v2, %v6166_v28  ;;  %v4335_v36 = vmul.f32 %v9771_v40, %v9766_v10  ;;  %v7344_v37 = vpop.eup %5700 }
 0x2a1   :  { %v4333_v20 = vmul.f32 %v9768_v63, %v9766_v10  ;;  %v4336_v16 = vmul.f32 %v9772_v33, %v9766_v10  ;;  %v9774_v9 = vrot.slane %v9773_v25, %v6166_v28  ;;  %v9776_v22 = vrot.slane %v9775_v39, %v6166_v28  ;;  %9779 = vst [vmem:[#allocation78_spill] sm:$0xff] %v7344_v37  ;;  %v7349_v5 = vpop.eup %5702 }
 0x2a2   :  { %v4334_v30 = vmul.f32 %v9770_v59, %v9766_v10  ;;  %v4339_v47 = vmul.f32 %v9777_v35, %v9766_v10  ;;  %v7340_v51 = vmul.f32 %v9778_v21, %v9766_v10  ;;  %v4341_v12 = vsel %vm1748_vm1, %v4309_v11, 0.0  ;;  %9780 = vst [vmem:[#allocation85_spill] sm:$0xff] %v7349_v5  ;;  %v7356_v19 = vpop.eup %5704 }
 0x2a3   :  { %v4337_v3 = vmul.f32 %v9774_v9, %v9766_v10  ;;  %v4338_v42 = vmul.f32 %v9776_v22, %v9766_v10  ;;  %v4342_v18 = vsel %vm1748_vm1, %v4317_v46, 0.0  ;;  %v4344_v29 = vsel %vm1748_vm1, %v4325_v60, 0.0  ;;  %9781 = vst [vmem:[#allocation86_spill] sm:$0xff] %v7356_v19 }
 0x2a4   :  { %v4343_v34 = vadd.f32 %v4342_v18, %v4341_v12  ;;  %v4346_v55 = vsel %vm1748_vm1, %v4333_v20, 0.0  ;;  %v4348_v61 = vsel %vm1748_vm1, %v4310_v13, 0.0  ;;  %v3621_v62 = vsel %vm1748_vm1, %v7344_v37, 0.0  ;;  %v7360_v13 = vpop.eup %5706 }
 0x2a5   :  { %v4349_v7 = vsel %vm1748_vm1, %v4318_v44, 0.0  ;;  %v4351_v11 = vsel %vm1748_vm1, %v4326_v31, 0.0  ;;  %v4353_v46 = vsel %vm1748_vm1, %v4334_v30, 0.0  ;;  %v3622_v57 = vrot.slane %v3621_v62, 4  ;;  %9782 = vst [vmem:[#allocation77_spill] sm:$0xff] %v7360_v13  ;;  %v7368_v58 = vpop.eup %5708 }
 0x2a6   :  { %v3628_v60 = vsel %vm1748_vm1, %v7349_v5, 0.0  ;;  %v4345_v45 = vadd.f32 %v4344_v29, %v4343_v34  ;;  %v4350_v17 = vadd.f32 %v4349_v7, %v4348_v61  ;;  %v7364_v10 = vsel %vm1748_vm1, %v7356_v19, 0.0  ;;  %9784 = vst [vmem:[#allocation87_spill] sm:$0xff] %v7368_v58  ;;  %v7373_v30 = vpop.eup %5710 }
 0x2a7   :  { %v3629_v24 = vrot.slane %v3628_v60, 4  ;;  %9783 = vst [vmem:[#allocation79_spill] sm:$0xff] %v7364_v10  ;;  %v4355_v44 = vsel %vm1748_vm1, %v4311_v48, 0.0  ;;  %v4356_v31 = vsel %vm1748_vm1, %v4319_v0, 0.0  ;;  %v7370_v63 = vadd.f32 %v3622_v57, %v3621_v62  ;;  %9786 = vst [vmem:[#allocation80_spill] sm:$0xff] %v7373_v30  ;;  %v7383_v35 = vpop.eup %5712 }
 0x2a8   :  { %v4347_v2 = vadd.f32 %v4346_v55, %v4345_v45  ;;  %v4352_v59 = vadd.f32 %v4351_v11, %v4350_v17  ;;  %v4357_v33 = vadd.f32 %v4356_v31, %v4355_v44  ;;  %v4358_v25 = vsel %vm1748_vm1, %v4327_v26, 0.0  ;;  %9788 = vst [vmem:[#allocation89_spill] sm:$0xff] %v7383_v35 }
 0x2a9   :  { %9785 = vst [vmem:[#allocation88_spill] sm:$0xff] %v7370_v63  ;;  %v7375_v40 = vadd.f32 %v3629_v24, %v3628_v60  ;;  %v4360_v9 = vsel %vm1748_vm1, %v4335_v36, 0.0  ;;  %v4362_v0 = vsel %vm1748_vm1, %v7236_v4, 0.0  ;;  %v4363_v39 = vsel %vm1748_vm1, %v4320_v27, 0.0 }
 0x2aa   :  { %v4354_v48 = vadd.f32 %v4353_v46, %v4352_v59  ;;  %v4365_v22 = vsel %vm1748_vm1, %v4328_v56, 0.0  ;;  %v4359_v21 = vadd.f32 %v4358_v25, %v4357_v33  ;;  %v4364_v12 = vadd.f32 %v4363_v39, %v4362_v0 }
 0x2ab   :  { %9787 = vst [vmem:[#allocation82_spill] sm:$0xff] %v7375_v40  ;;  %v4367_v18 = vsel %vm1748_vm1, %v4336_v16, 0.0  ;;  %v4369_v34 = vsel %vm1748_vm1, %v7242_v23, 0.0  ;;  %v4370_v26 = vsel %vm1748_vm1, %v4321_v49, 0.0  ;;  %v4372_v36 = vsel %vm1748_vm1, %v4329_v52, 0.0 }
 0x2ac   :  { %v4374_v29 = vsel %vm1748_vm1, %v4337_v3, 0.0  ;;  %v4376_v4 = vsel %vm1748_vm1, %v7248_v43, 0.0  ;;  %v4361_v27 = vadd.f32 %v4360_v9, %v4359_v21  ;;  %v4366_v56 = vadd.f32 %v4365_v22, %v4364_v12 }
 0x2ad   :  { %v4371_v55 = vadd.f32 %v4370_v26, %v4369_v34  ;;  %v4377_v61 = vsel %vm1748_vm1, %v7278_v6, 0.0  ;;  %v4379_v16 = vsel %vm1748_vm1, %v4330_v1, 0.0  ;;  %v4381_v23 = vsel %vm1748_vm1, %v4338_v42, 0.0 }
 0x2ae   :  { %v4378_v62 = vadd.f32 %v4377_v61, %v4376_v4  ;;  %v4383_v49 = vsel %vm1748_vm1, %v7252_v15, 0.0  ;;  %v4368_v52 = vadd.f32 %v4367_v18, %v4366_v56  ;;  %v4384_v3 = vsel %vm1748_vm1, %v7282_v41, 0.0 }
 0x2af   :  { %v4373_v7 = vadd.f32 %v4372_v36, %v4371_v55  ;;  %v4386_v43 = vsel %vm1748_vm1, %v7310_v53, 0.0  ;;  %v4385_v46 = vadd.f32 %v4384_v3, %v4383_v49  ;;  %v4388_v6 = vsel %vm1748_vm1, %v4339_v47, 0.0 }
 0x2b0   :  { %v4380_v11 = vadd.f32 %v4379_v16, %v4378_v62  ;;  %v4390_v1 = vsel %vm1748_vm1, %v7256_v8, 0.0  ;;  %v4391_v42 = vsel %vm1748_vm1, %v7286_v50, 0.0  ;;  %v4393_v15 = vsel %vm1748_vm1, %v7314_v38, 0.0 }
 0x2b1   :  { %v4375_v57 = vadd.f32 %v4374_v29, %v4373_v7  ;;  %v4395_v41 = vsel %vm1748_vm1, %v7340_v51, 0.0  ;;  %v4387_v45 = vadd.f32 %v4386_v43, %v4385_v46  ;;  %v4392_v53 = vadd.f32 %v4391_v42, %v4390_v1 }
 0x2b2   :  { %v4382_v60 = vadd.f32 %v4381_v23, %v4380_v11  ;;  %v7412_v17 = vmul.f32 0.5, %v4347_v2  ;;  %v7414_v24 = vmul.f32 0.5, %v4354_v48  ;;  %v7416_v47 = vmul.f32 0.5, %v4361_v27 }
 0x2b3   :  { %v7418_v8 = vmul.f32 0.5, %v4368_v52  ;;  %v7420_v44 = vmul.f32 0.5, %v4375_v57  ;;  %v4389_v50 = vadd.f32 %v4388_v6, %v4387_v45  ;;  %v4394_v31 = vadd.f32 %v4393_v15, %v4392_v53 }
 0x2b4   :  { %v7422_v59 = vmul.f32 0.5, %v4382_v60  ;;  %v4405_v38 = vsel %vm1748_vm1, %v7412_v17, -inf  ;;  %v4412_v2 = vsel %vm1748_vm1, %v7414_v24, -inf  ;;  %v4419_v33 = vsel %vm1748_vm1, %v7416_v47, -inf }
 0x2b5   :  { %v4406_v51 = vrot.slane %v4405_v38, 4  ;;  %v4426_v25 = vsel %vm1748_vm1, %v7418_v8, -inf  ;;  %v4396_v9 = vadd.f32 %v4395_v41, %v4394_v31  ;;  %v7432_v48 = vmul.f32 0.5, %v4389_v50 }
 0x2b6   :  { %v4413_v0 = vrot.slane %v4412_v2, 4  ;;  %v4420_v39 = vrot.slane %v4419_v33, 4  ;;  %v4427_v21 = vrot.slane %v4426_v25, 4  ;;  %v4433_v12 = vsel %vm1748_vm1, %v7420_v44, -inf }
 0x2b7   :  { %v4407_v22 = vmax.f32 %v4405_v38, %v4406_v51  ;;  %v4440_v18 = vsel %vm1748_vm1, %v7422_v59, -inf  ;;  %v7438_v34 = vmul.f32 0.5, %v4396_v9  ;;  %v4434_v29 = vrot.slane %v4433_v12, 4 }
 0x2b8   :  { %v4414_v26 = vmax.f32 %v4412_v2, %v4413_v0  ;;  %v4421_v36 = vmax.f32 %v4419_v33, %v4420_v39  ;;  %v4428_v27 = vmax.f32 %v4426_v25, %v4427_v21  ;;  %v4441_v56 = vrot.slane %v4440_v18, 4 }
 0x2b9   :  { %9789 = vst [vmem:[#allocation90_spill] sm:$0xff] %v7438_v34  ;;  %v4408_v4 = vrot.slane %v4407_v22, 2  ;;  %v4447_v55 = vsel %vm1748_vm1, %v7432_v48, -inf  ;;  %v4435_v16 = vmax.f32 %v4433_v12, %v4434_v29  ;;  %v4454_v3 = vsel %vm1748_vm1, %v7438_v34, -inf }
 0x2ba   :  { %v4415_v61 = vrot.slane %v4414_v26, 2  ;;  %v4422_v62 = vrot.slane %v4421_v36, 2  ;;  %v4448_v23 = vrot.slane %v4447_v55, 4  ;;  %v4429_v52 = vrot.slane %v4428_v27, 2 }
 0x2bb   :  { %v4409_v49 = vmax.f32 %v4407_v22, %v4408_v4  ;;  %v4442_v7 = vmax.f32 %v4440_v18, %v4441_v56  ;;  %v4436_v46 = vrot.slane %v4435_v16, 2  ;;  %v4455_v15 = vrot.slane %v4454_v3, 4 }
 0x2bc   :  { %v4416_v43 = vmax.f32 %v4414_v26, %v4415_v61  ;;  %v4423_v11 = vmax.f32 %v4421_v36, %v4422_v62  ;;  %v4449_v6 = vmax.f32 %v4447_v55, %v4448_v23  ;;  %v4430_v57 = vmax.f32 %v4428_v27, %v4429_v52 }
 0x2bd   :  { %v4410_v1 = vrot.slane %v4409_v49, 1  ;;  %v4443_v42 = vrot.slane %v4442_v7, 2  ;;  %v4437_v45 = vmax.f32 %v4435_v16, %v4436_v46  ;;  %v4456_v51 = vmax.f32 %v4454_v3, %v4455_v15  ;;  %v9793_v46 = vld [vmem:[#allocation110_spill] sm:$0xff] }
 0x2be   :  { %v4417_v41 = vrot.slane %v4416_v43, 1  ;;  %v4424_v60 = vrot.slane %v4423_v11, 1  ;;  %v4450_v53 = vrot.slane %v4449_v6, 2  ;;  %v4431_v31 = vrot.slane %v4430_v57, 1 }
 0x2bf   :  { %v4411_v50 = vmax.f32 %v4409_v49, %v4410_v1  ;;  %v4444_v38 = vmax.f32 %v4442_v7, %v4443_v42  ;;  %v4438_v25 = vrot.slane %v4437_v45, 1  ;;  %v4457_v22 = vrot.slane %v4456_v51, 2  ;;  %v9791_v7 = vld [vmem:[#allocation72_spill] sm:$0xff]  ;;  %v9796_v42 = vld [vmem:[#allocation74_spill] sm:$0xff]  ;;  %v9847_v1 = vld [vmem:[#allocation45_spill] sm:$0xff] }
 0x2c0   :  { %v4418_v2 = vmax.f32 %v4416_v43, %v4417_v41  ;;  %v4425_v33 = vmax.f32 %v4423_v11, %v4424_v60  ;;  %v4451_v9 = vmax.f32 %v4449_v6, %v4450_v53  ;;  %v4432_v0 = vmax.f32 %v4430_v57, %v4431_v31  ;;  %v9795_v57 = vld [vmem:[#allocation111_spill] sm:$0xff]  ;;  %v9797_v60 = vld [vmem:[#allocation112_spill] sm:$0xff] }
 0x2c1   :  { %v4445_v39 = vrot.slane %v4444_v38, 1  ;;  %v4461_v21 = vsub.f32 %v7412_v17, %v4411_v50  ;;  %v4439_v12 = vmax.f32 %v4437_v45, %v4438_v25  ;;  %v4458_v4 = vmax.f32 %v4456_v51, %v4457_v22  ;;  %v9798_v45 = vld [vmem:[#allocation75_spill] sm:$0xff]  ;;  %v9799_v31 = vld [vmem:[#allocation8_spill] sm:$0xff] }
 0x2c2   :  { %v4452_v18 = vrot.slane %v4451_v9, 1  ;;  %v4462_v26 = vsub.f32 %v7414_v24, %v4418_v2  ;;  %v4463_v36 = vsub.f32 %v7416_v47, %v4425_v33  ;;  %v4464_v27 = vsub.f32 %v7418_v8, %v4432_v0  ;;  %v9790_v47 = vld [vmem:[#allocation109_spill] sm:$0xff]  ;;  %v9801_v2 = vld [vmem:[#allocation11_spill] sm:$0xff] }
 0x2c3   :  { %v4446_v29 = vmax.f32 %v4444_v38, %v4445_v39  ;;  %v4469_v56 = vmul.f32 1.442695, %v4461_v21  ;;  %v4465_v61 = vsub.f32 %v7420_v44, %v4439_v12  ;;  %v4459_v23 = vrot.slane %v4458_v4, 1  ;;  %v9804_v39 = vld [vmem:[#allocation25_spill] sm:$0xff]  ;;  %v9805_v21 = vld [vmem:[#allocation10_spill] sm:$0xff] }
 0x2c4   :  { %v4453_v55 = vmax.f32 %v4451_v9, %v4452_v18  ;;  %v4471_v62 = vmul.f32 1.442695, %v4462_v26  ;;  %v4473_v16 = vmul.f32 1.442695, %v4463_v36  ;;  %v4475_v17 = vmul.f32 1.442695, %v4464_v27 }
 0x2c5   :  { %v4466_v49 = vsub.f32 %v7422_v59, %v4446_v29  ;;  %5714 = vpow2.f32 %v4469_v56  ;;  %v4477_v24 = vmul.f32 1.442695, %v4465_v61  ;;  %v900_v3 = vcombine.low %v9791_v7, %v9790_v47  ;;  %v9794_v59 = vld [vmem:[#allocation73_spill] sm:$0xff]  ;;  %v9803_v9 = vld [vmem:[#allocation24_spill] sm:$0xff]  ;;  %v9807_v26 = vld [vmem:[#allocation14_spill] sm:$0xff] }
 0x2c6   :  { %v4467_v52 = vsub.f32 %v7432_v48, %v4453_v55  ;;  %5716 = vpow2.f32 %v4471_v62  ;;  %v7453_v43 = vmax.f32 %v4458_v4, %v4459_v23  ;;  %v901_v44 = vcombine.high %v9791_v7, %v9790_v47  ;;  %v9809_v4 = vld [vmem:[#allocation26_spill] sm:$0xff]  ;;  %v9810_v56 = vld [vmem:[#allocation27_spill] sm:$0xff]  ;;  %v9811_v61 = vld [vmem:[#allocation9_spill] sm:$0xff] }
 0x2c7   :  { %5718 = vpow2.f32 %v4473_v16  ;;  %v4479_v8 = vmul.f32 1.442695, %v4466_v49  ;;  %v902_v6 = vcombine.low %v9794_v59, %v9793_v46  ;;  %v903_v48 = vcombine.high %v9794_v59, %v9793_v46  ;;  %v9813_v23 = vld [vmem:[#allocation13_spill] sm:$0xff]  ;;  %v9819_v59 = vld [vmem:[#allocation15_spill] sm:$0xff] }
 0x2c8   :  { %9792 = vst [vmem:[#allocation81_spill] sm:$0xff] %v7453_v43  ;;  %5720 = vpow2.f32 %v4475_v17  ;;  %v4481_v11 = vmul.f32 1.442695, %v4467_v52  ;;  %v7465_v15 = vcombine.low %v9796_v42, %v9795_v57  ;;  %v7469_v41 = vcombine.high %v9796_v42, %v9795_v57  ;;  %v9815_v52 = vld [vmem:[#allocation28_spill] sm:$0xff]  ;;  %v9816_v47 = vld [vmem:[#allocation29_spill] sm:$0xff]  ;;  %v9821_v42 = vld [vmem:[#allocation30_spill] sm:$0xff] }
 0x2c9   :  { %5722 = vpow2.f32 %v4477_v24  ;;  %v7473_v53 = vcombine.low %v9798_v45, %v9797_v60  ;;  %v7477_v50 = vcombine.high %v9798_v45, %v9797_v60  ;;  %v9800_v38 = vrot.slane %v9799_v31, %v6166_v28  ;;  %v9822_v45 = vld [vmem:[#allocation31_spill] sm:$0xff] }
 0x2ca   :  { %5724 = vpow2.f32 %v4479_v8  ;;  %v9802_v33 = vrot.slane %v9801_v2, %v6166_v28  ;;  %v1718_v0 = vmul.f32 %v9803_v9, %v900_v3  ;;  %v1719_v22 = vmul.f32 %v9804_v39, %v900_v3  ;;  %v9817_v8 = vld [vmem:[#allocation12_spill] sm:$0xff]  ;;  %v9825_v9 = vld [vmem:[#allocation18_spill] sm:$0xff] }
 0x2cb   :  { %v1716_v51 = vmul.f32 %v9800_v38, %v900_v3  ;;  %5726 = vpow2.f32 %v4481_v11  ;;  %v9806_v12 = vrot.slane %v9805_v21, %v6166_v28  ;;  %v9808_v36 = vrot.slane %v9807_v26, %v6166_v28  ;;  %v9823_v38 = vld [vmem:[#allocation16_spill] sm:$0xff] }
 0x2cc   :  { %v1717_v25 = vmul.f32 %v9802_v33, %v900_v3  ;;  %v7498_v27 = vmul.f32 %v9809_v4, %v900_v3  ;;  %v7501_v55 = vmul.f32 %v9810_v56, %v900_v3  ;;  %v9812_v62 = vrot.slane %v9811_v61, %v6166_v28  ;;  %v9829_v56 = vld [vmem:[#allocation17_spill] sm:$0xff] }
 0x2cd   :  { %v7490_v18 = vmul.f32 %v9806_v12, %v900_v3  ;;  %v7495_v29 = vmul.f32 %v9808_v36, %v900_v3  ;;  %v9814_v49 = vrot.slane %v9813_v23, %v6166_v28  ;;  %v1726_v24 = vmul.f32 %v9815_v52, %v901_v44  ;;  %v9827_v12 = vld [vmem:[#allocation32_spill] sm:$0xff]  ;;  %v9828_v36 = vld [vmem:[#allocation33_spill] sm:$0xff]  ;;  %v9831_v23 = vld [vmem:[#allocation19_spill] sm:$0xff] }
 0x2ce   :  { %v1724_v16 = vmul.f32 %v9812_v62, %v901_v44  ;;  %v1727_v7 = vmul.f32 %v9816_v47, %v901_v44  ;;  %v9818_v11 = vrot.slane %v9817_v8, %v6166_v28  ;;  %v9820_v3 = vrot.slane %v9819_v59, %v6166_v28  ;;  %v9833_v52 = vld [vmem:[#allocation34_spill] sm:$0xff]  ;;  %v9834_v8 = vld [vmem:[#allocation35_spill] sm:$0xff]  ;;  %v9835_v59 = vld [vmem:[#allocation20_spill] sm:$0xff] }
 0x2cf   :  { %v1725_v17 = vmul.f32 %v9814_v49, %v901_v44  ;;  %v7520_v60 = vmul.f32 %v9821_v42, %v901_v44  ;;  %v7523_v31 = vmul.f32 %v9822_v45, %v901_v44  ;;  %v9824_v2 = vrot.slane %v9823_v38, %v6166_v28  ;;  %v9837_v45 = vld [vmem:[#allocation22_spill] sm:$0xff] }
 0x2d0   :  { %v1728_v46 = vmul.f32 %v9818_v11, %v901_v44  ;;  %v7517_v57 = vmul.f32 %v9820_v3, %v901_v44  ;;  %v9826_v39 = vrot.slane %v9825_v9, %v6166_v28  ;;  %v1734_v26 = vmul.f32 %v9827_v12, %v902_v6  ;;  %v9839_v9 = vld [vmem:[#allocation36_spill] sm:$0xff]  ;;  %v9840_v12 = vld [vmem:[#allocation37_spill] sm:$0xff] }
 0x2d1   :  { %v1732_v33 = vmul.f32 %v9824_v2, %v902_v6  ;;  %v1735_v4 = vmul.f32 %v9828_v36, %v902_v6  ;;  %v9830_v61 = vrot.slane %v9829_v56, %v6166_v28  ;;  %v9832_v44 = vrot.slane %v9831_v23, %v6166_v28 }
 0x2d2   :  { %v1733_v21 = vmul.f32 %v9826_v39, %v902_v6  ;;  %v7540_v47 = vmul.f32 %v9833_v52, %v902_v6  ;;  %v7543_v11 = vmul.f32 %v9834_v8, %v902_v6  ;;  %v9836_v3 = vrot.slane %v9835_v59, %v6166_v28  ;;  %v7553_v56 = vpop.eup %5714  ;;  %v9846_v59 = vld [vmem:[#allocation40_spill] sm:$0xff] }
 0x2d3   :  { %v1736_v62 = vmul.f32 %v9830_v61, %v902_v6  ;;  %v1737_v49 = vmul.f32 %v9832_v44, %v902_v6  ;;  %v9838_v38 = vrot.slane %v9837_v45, %v6166_v28  ;;  %v1742_v39 = vmul.f32 %v9839_v9, %v903_v48  ;;  %9841 = vst [vmem:[#allocation83_spill] sm:$0xff] %v7553_v56  ;;  %v9842_v61 = vld [vmem:[#allocation21_spill] sm:$0xff]  ;;  %v9844_v6 = vld [vmem:[#allocation23_spill] sm:$0xff]  ;;  %v7565_v45 = vpop.eup %5716 }
 0x2d4   :  { %v1740_v42 = vmul.f32 %v9836_v3, %v903_v48  ;;  %v1743_v36 = vmul.f32 %v9840_v12, %v903_v48  ;;  %v9843_v23 = vrot.slane %v9842_v61, %v6166_v28  ;;  %v9845_v52 = vrot.slane %v9844_v6, %v6166_v28  ;;  %9848 = vst [vmem:[#allocation92_spill] sm:$0xff] %v7565_v45 }
 0x2d5   :  { %v1741_v2 = vmul.f32 %v9838_v38, %v903_v48  ;;  %v1746_v3 = vmul.f32 %v9846_v59, %v903_v48  ;;  %v7563_v20 = vmul.f32 %v9847_v1, %v903_v48  ;;  %v4485_v38 = vsel %vm1748_vm1, %v7553_v56, 0.0 }
 0x2d6   :  { %v1744_v44 = vmul.f32 %v9843_v23, %v903_v48  ;;  %v1745_v8 = vmul.f32 %v9845_v52, %v903_v48  ;;  %v1749_v9 = vsel %vm1748_vm1, %v1716_v51, 0.0  ;;  %v1750_v12 = vsel %vm1748_vm1, %v1724_v16, 0.0  ;;  %v7572_v23 = vpop.eup %5718 }
 0x2d7   :  { %v1752_v61 = vsel %vm1748_vm1, %v1732_v33, 0.0  ;;  %9849 = vst [vmem:[#allocation93_spill] sm:$0xff] %v7572_v23  ;;  %v4486_v6 = vrot.slane %v4485_v38, 4  ;;  %v4492_v52 = vsel %vm1748_vm1, %v7565_v45, 0.0  ;;  %v1751_v59 = vadd.f32 %v1750_v12, %v1749_v9  ;;  %v7577_v1 = vpop.eup %5720 }
 0x2d8   :  { %v1754_v48 = vsel %vm1748_vm1, %v1740_v42, 0.0  ;;  %9850 = vst [vmem:[#allocation91_spill] sm:$0xff] %v7577_v1  ;;  %v4493_v54 = vrot.slane %v4492_v52, 4  ;;  %v7581_v56 = vsel %vm1748_vm1, %v7572_v23, 0.0  ;;  %v1756_v51 = vsel %vm1748_vm1, %v1717_v25, 0.0  ;;  %v7585_v33 = vpop.eup %5722 }
 0x2d9   :  { %9851 = vst [vmem:[#allocation99_spill] sm:$0xff] %v7581_v56  ;;  %v1757_v16 = vsel %vm1748_vm1, %v1725_v17, 0.0  ;;  %9852 = vst [vmem:[#allocation100_spill] sm:$0xff] %v7585_v33  ;;  %v7587_v19 = vadd.f32 %v4486_v6, %v4485_v38  ;;  %v1753_v9 = vadd.f32 %v1752_v61, %v1751_v59  ;;  %v7590_v42 = vpop.eup %5724  ;;  %v1759_v37 = vsel %vm1748_vm1, %v1733_v21, 0.0 }
 0x2da   :  { %v1758_v12 = vadd.f32 %v1757_v16, %v1756_v51  ;;  %9854 = vst [vmem:[#allocation102_spill] sm:$0xff] %v7590_v42  ;;  %v7592_v5 = vadd.f32 %v4493_v54, %v4492_v52  ;;  %v1761_v23 = vsel %vm1748_vm1, %v1741_v2, 0.0  ;;  %v1763_v25 = vsel %vm1748_vm1, %v1718_v0, 0.0  ;;  %v7597_v1 = vpop.eup %5726 }
 0x2db   :  { %9853 = vst [vmem:[#allocation101_spill] sm:$0xff] %v7587_v19  ;;  %9856 = vst [vmem:[#allocation103_spill] sm:$0xff] %v7597_v1  ;;  %v1755_v17 = vadd.f32 %v1754_v48, %v1753_v9  ;;  %v1764_v38 = vsel %vm1748_vm1, %v1726_v24, 0.0  ;;  %v1766_v6 = vsel %vm1748_vm1, %v1734_v26, 0.0  ;;  %v1768_v59 = vsel %vm1748_vm1, %v1742_v39, 0.0 }
 0x2dc   :  { %9855 = vst [vmem:[#allocation94_spill] sm:$0xff] %v7592_v5  ;;  %v1760_v33 = vadd.f32 %v1759_v37, %v1758_v12  ;;  %v1765_v61 = vadd.f32 %v1764_v38, %v1763_v25  ;;  %v1770_v54 = vsel %vm1748_vm1, %v1719_v22, 0.0  ;;  %v1771_v52 = vsel %vm1748_vm1, %v1727_v7, 0.0 }
 0x2dd   :  { %v1772_v51 = vadd.f32 %v1771_v52, %v1770_v54  ;;  %v1773_v2 = vsel %vm1748_vm1, %v1735_v4, 0.0  ;;  %v1775_v0 = vsel %vm1748_vm1, %v1743_v36, 0.0  ;;  %v1777_v37 = vsel %vm1748_vm1, %v7490_v18, 0.0 }
 0x2de   :  { %v1762_v21 = vadd.f32 %v1761_v23, %v1760_v33  ;;  %v1767_v16 = vadd.f32 %v1766_v6, %v1765_v61  ;;  %v1778_v24 = vsel %vm1748_vm1, %v1728_v46, 0.0  ;;  %v1780_v26 = vsel %vm1748_vm1, %v1736_v62, 0.0 }
 0x2df   :  { %v1774_v48 = vadd.f32 %v1773_v2, %v1772_v51  ;;  %v1779_v39 = vadd.f32 %v1778_v24, %v1777_v37  ;;  %v1782_v22 = vsel %vm1748_vm1, %v1744_v44, 0.0  ;;  %v1784_v7 = vsel %vm1748_vm1, %v7495_v29, 0.0 }
 0x2e0   :  { %v1769_v23 = vadd.f32 %v1768_v59, %v1767_v16  ;;  %v1785_v4 = vsel %vm1748_vm1, %v7517_v57, 0.0  ;;  %v1787_v36 = vsel %vm1748_vm1, %v1737_v49, 0.0  ;;  %v1789_v33 = vsel %vm1748_vm1, %v1745_v8, 0.0 }
 0x2e1   :  { %v1776_v18 = vadd.f32 %v1775_v0, %v1774_v48  ;;  %v1781_v9 = vadd.f32 %v1780_v26, %v1779_v39  ;;  %v1786_v46 = vadd.f32 %v1785_v4, %v1784_v7  ;;  %v1791_v62 = vsel %vm1748_vm1, %v7498_v27, 0.0 }
 0x2e2   :  { %v1792_v44 = vsel %vm1748_vm1, %v7520_v60, 0.0  ;;  %v1794_v29 = vsel %vm1748_vm1, %v7540_v47, 0.0  ;;  %v1796_v12 = vsel %vm1748_vm1, %v1746_v3, 0.0  ;;  %v1798_v57 = vsel %vm1748_vm1, %v7501_v55, 0.0 }
 0x2e3   :  { %v1783_v49 = vadd.f32 %v1782_v22, %v1781_v9  ;;  %v1788_v25 = vadd.f32 %v1787_v36, %v1786_v46  ;;  %v1793_v8 = vadd.f32 %v1792_v44, %v1791_v62  ;;  %v1799_v38 = vsel %vm1748_vm1, %v7523_v31, 0.0 }
 0x2e4   :  { %v1800_v6 = vadd.f32 %v1799_v38, %v1798_v57  ;;  %v1801_v27 = vsel %vm1748_vm1, %v7543_v11, 0.0  ;;  %v1803_v60 = vsel %vm1748_vm1, %v7563_v20, 0.0  ;;  %v7632_v61 = vmul.f32 0.5, %v1755_v17 }
 0x2e5   :  { %v1790_v47 = vadd.f32 %v1789_v33, %v1788_v25  ;;  %v1795_v3 = vadd.f32 %v1794_v29, %v1793_v8  ;;  %v7634_v59 = vmul.f32 0.5, %v1762_v21  ;;  %v7636_v55 = vmul.f32 0.5, %v1769_v23 }
 0x2e6   :  { %v1802_v54 = vadd.f32 %v1801_v27, %v1800_v6  ;;  %v7638_v52 = vmul.f32 0.5, %v1776_v18  ;;  %v7640_v51 = vmul.f32 0.5, %v1783_v49  ;;  %v1813_v31 = vsel %vm1748_vm1, %v7632_v61, -inf }
 0x2e7   :  { %v1797_v11 = vadd.f32 %v1796_v12, %v1795_v3  ;;  %v7644_v2 = vmul.f32 0.5, %v1790_v47  ;;  %v1814_v20 = vrot.slane %v1813_v31, 4  ;;  %v1820_v17 = vsel %vm1748_vm1, %v7634_v59, -inf }
 0x2e8   :  { %v1804_v0 = vadd.f32 %v1803_v60, %v1802_v54  ;;  %v1821_v21 = vrot.slane %v1820_v17, 4  ;;  %v1827_v16 = vsel %vm1748_vm1, %v7636_v55, -inf  ;;  %v1834_v37 = vsel %vm1748_vm1, %v7638_v52, -inf }
 0x2e9   :  { %v7652_v24 = vmul.f32 0.5, %v1797_v11  ;;  %v1815_v26 = vmax.f32 %v1813_v31, %v1814_v20  ;;  %v1828_v48 = vrot.slane %v1827_v16, 4  ;;  %v1835_v39 = vrot.slane %v1834_v37, 4 }
 0x2ea   :  { %v7654_v22 = vmul.f32 0.5, %v1804_v0  ;;  %v1822_v7 = vmax.f32 %v1820_v17, %v1821_v21  ;;  %v1841_v23 = vsel %vm1748_vm1, %v7640_v51, -inf  ;;  %v1848_v4 = vsel %vm1748_vm1, %v7644_v2, -inf }
 0x2eb   :  { %v1816_v36 = vrot.slane %v1815_v26, 2  ;;  %v1829_v33 = vmax.f32 %v1827_v16, %v1828_v48  ;;  %v1836_v18 = vmax.f32 %v1834_v37, %v1835_v39  ;;  %v1842_v9 = vrot.slane %v1841_v23, 4 }
 0x2ec   :  { %v1823_v46 = vrot.slane %v1822_v7, 2  ;;  %v1849_v62 = vrot.slane %v1848_v4, 4  ;;  %v1855_v44 = vsel %vm1748_vm1, %v7652_v24, -inf  ;;  %v1862_v29 = vsel %vm1748_vm1, %v7654_v22, -inf }
 0x2ed   :  { %v1817_v12 = vmax.f32 %v1815_v26, %v1816_v36  ;;  %v1830_v57 = vrot.slane %v1829_v33, 2  ;;  %v1837_v49 = vrot.slane %v1836_v18, 2  ;;  %v1843_v25 = vmax.f32 %v1841_v23, %v1842_v9 }
 0x2ee   :  { %v1824_v8 = vmax.f32 %v1822_v7, %v1823_v46  ;;  %v1850_v38 = vmax.f32 %v1848_v4, %v1849_v62  ;;  %v1856_v6 = vrot.slane %v1855_v44, 4  ;;  %v1863_v27 = vrot.slane %v1862_v29, 4 }
 0x2ef   :  { %v1818_v60 = vrot.slane %v1817_v12, 1  ;;  %v1831_v47 = vmax.f32 %v1829_v33, %v1830_v57  ;;  %v1838_v3 = vmax.f32 %v1836_v18, %v1837_v49  ;;  %v1844_v54 = vrot.slane %v1843_v25, 2 }
 0x2f0   :  { %v1825_v31 = vrot.slane %v1824_v8, 1  ;;  %v1851_v11 = vrot.slane %v1850_v38, 2  ;;  %v1857_v20 = vmax.f32 %v1855_v44, %v1856_v6  ;;  %v1864_v17 = vmax.f32 %v1862_v29, %v1863_v27 }
 0x2f1   :  { %v1819_v0 = vmax.f32 %v1817_v12, %v1818_v60  ;;  %v1832_v21 = vrot.slane %v1831_v47, 1  ;;  %v1839_v16 = vrot.slane %v1838_v3, 1  ;;  %v1845_v37 = vmax.f32 %v1843_v25, %v1844_v54 }
 0x2f2   :  { %v1826_v26 = vmax.f32 %v1824_v8, %v1825_v31  ;;  %v1852_v48 = vmax.f32 %v1850_v38, %v1851_v11  ;;  %v1858_v39 = vrot.slane %v1857_v20, 2  ;;  %v1865_v23 = vrot.slane %v1864_v17, 2  ;;  %v9859_v31 = vld [vmem:[#allocation42_spill] sm:$0xff] }
 0x2f3   :  { %v1833_v7 = vmax.f32 %v1831_v47, %v1832_v21  ;;  %v1840_v4 = vmax.f32 %v1838_v3, %v1839_v16  ;;  %v1846_v36 = vrot.slane %v1845_v37, 1  ;;  %v1869_v9 = vsub.f32 %v7632_v61, %v1819_v0  ;;  %v9861_v0 = vld [vmem:[#allocation56_spill] sm:$0xff]  ;;  %v9862_v16 = vld [vmem:[#allocation57_spill] sm:$0xff] }
 0x2f4   :  { %v1853_v33 = vrot.slane %v1852_v48, 1  ;;  %v1859_v18 = vmax.f32 %v1857_v20, %v1858_v39  ;;  %v1866_v46 = vmax.f32 %v1864_v17, %v1865_v23  ;;  %v1870_v62 = vsub.f32 %v7634_v59, %v1826_v26  ;;  %v9863_v26 = vld [vmem:[#allocation41_spill] sm:$0xff]  ;;  %v9865_v23 = vld [vmem:[#allocation46_spill] sm:$0xff] }
 0x2f5   :  { %v1847_v44 = vmax.f32 %v1845_v37, %v1846_v36  ;;  %v1871_v29 = vsub.f32 %v7636_v55, %v1833_v7  ;;  %v1872_v12 = vsub.f32 %v7638_v52, %v1840_v4  ;;  %v1877_v57 = vmul.f32 1.442695, %v1869_v9  ;;  %v9857_v52 = vld [vmem:[#allocation38_spill] sm:$0xff] }
 0x2f6   :  { %v1854_v49 = vmax.f32 %v1852_v48, %v1853_v33  ;;  %v1860_v25 = vrot.slane %v1859_v18, 1  ;;  %v1867_v8 = vrot.slane %v1866_v46, 1  ;;  %v1879_v38 = vmul.f32 1.442695, %v1870_v62  ;;  %v9867_v36 = vld [vmem:[#allocation58_spill] sm:$0xff]  ;;  %v9868_v33 = vld [vmem:[#allocation59_spill] sm:$0xff] }
 0x2f7   :  { %v1873_v6 = vsub.f32 %v7640_v51, %v1847_v44  ;;  %5728 = vpow2.f32 %v1877_v57  ;;  %v1881_v27 = vmul.f32 1.442695, %v1871_v29  ;;  %v1883_v61 = vmul.f32 1.442695, %v1872_v12  ;;  %v9871_v29 = vld [vmem:[#allocation44_spill] sm:$0xff] }
 0x2f8   :  { %v1861_v60 = vmax.f32 %v1859_v18, %v1860_v25  ;;  %v7669_v47 = vmax.f32 %v1866_v46, %v1867_v8  ;;  %v1874_v59 = vsub.f32 %v7644_v2, %v1854_v49  ;;  %5730 = vpow2.f32 %v1879_v38  ;;  %v9869_v46 = vld [vmem:[#allocation39_spill] sm:$0xff]  ;;  %v9873_v49 = vld [vmem:[#allocation60_spill] sm:$0xff]  ;;  %v9874_v8 = vld [vmem:[#allocation61_spill] sm:$0xff] }
 0x2f9   :  { %5732 = vpow2.f32 %v1881_v27  ;;  %v1885_v55 = vmul.f32 1.442695, %v1873_v6  ;;  %v9858_v3 = vrot.slane %v9857_v52, %v6166_v28  ;;  %v9860_v51 = vrot.slane %v9859_v31, %v6166_v28 }
 0x2fa   :  { %v1875_v20 = vsub.f32 %v7652_v24, %v1861_v60  ;;  %5734 = vpow2.f32 %v1883_v61  ;;  %v1887_v2 = vmul.f32 1.442695, %v1874_v59  ;;  %v2583_v21 = vmul.f32 %v9861_v0, %v7465_v15  ;;  %v9877_v61 = vld [vmem:[#allocation47_spill] sm:$0xff]  ;;  %v9883_v0 = vld [vmem:[#allocation50_spill] sm:$0xff] }
 0x2fb   :  { %v2581_v54 = vmul.f32 %v9858_v3, %v7465_v15  ;;  %v2582_v11 = vmul.f32 %v9860_v51, %v7465_v15  ;;  %5736 = vpow2.f32 %v1885_v55  ;;  %v7687_v37 = vmul.f32 %v9862_v16, %v7465_v15  ;;  %v9879_v55 = vld [vmem:[#allocation62_spill] sm:$0xff]  ;;  %v9880_v3 = vld [vmem:[#allocation63_spill] sm:$0xff]  ;;  %v9881_v51 = vld [vmem:[#allocation48_spill] sm:$0xff] }
 0x2fc   :  { %v9864_v48 = vrot.slane %v9863_v26, %v6166_v28  ;;  %5738 = vpow2.f32 %v1887_v2  ;;  %v1889_v24 = vmul.f32 1.442695, %v1875_v20  ;;  %v9866_v7 = vrot.slane %v9865_v23, %v6166_v28  ;;  %v9886_v23 = vld [vmem:[#allocation65_spill] sm:$0xff] }
 0x2fd   :  { %v7703_v9 = vmul.f32 %v9867_v36, %v7465_v15  ;;  %v7707_v18 = vmul.f32 %v9868_v33, %v7465_v15  ;;  %v9870_v62 = vrot.slane %v9869_v46, %v6166_v28  ;;  %v9872_v12 = vrot.slane %v9871_v29, %v6166_v28  ;;  %v9887_v36 = vld [vmem:[#allocation49_spill] sm:$0xff]  ;;  %v9889_v46 = vld [vmem:[#allocation51_spill] sm:$0xff] }
 0x2fe   :  { %v7693_v39 = vmul.f32 %v9864_v48, %v7465_v15  ;;  %v7699_v4 = vmul.f32 %v9866_v7, %v7465_v15  ;;  %v2591_v25 = vmul.f32 %v9873_v49, %v7469_v41  ;;  %5740 = vpow2.f32 %v1889_v24  ;;  %v9875_v15 = vld [vmem:[#allocation43_spill] sm:$0xff]  ;;  %v9885_v48 = vld [vmem:[#allocation64_spill] sm:$0xff] }
 0x2ff   :  { %v2589_v44 = vmul.f32 %v9870_v62, %v7469_v41  ;;  %v2590_v57 = vmul.f32 %v9872_v12, %v7469_v41  ;;  %v2592_v38 = vmul.f32 %v9874_v8, %v7469_v41  ;;  %v9876_v6 = vrot.slane %v9875_v15, %v6166_v28  ;;  %v9891_v12 = vld [vmem:[#allocation66_spill] sm:$0xff]  ;;  %v9892_v8 = vld [vmem:[#allocation67_spill] sm:$0xff] }
 0x300   :  { %v9878_v60 = vrot.slane %v9877_v61, %v6166_v28  ;;  %v7733_v52 = vmul.f32 %v9879_v55, %v7469_v41  ;;  %v7737_v31 = vmul.f32 %v9880_v3, %v7469_v41  ;;  %v9882_v20 = vrot.slane %v9881_v51, %v6166_v28  ;;  %v9895_v55 = vld [vmem:[#allocation54_spill] sm:$0xff] }
 0x301   :  { %v2593_v27 = vmul.f32 %v9876_v6, %v7469_v41  ;;  %v9884_v16 = vrot.slane %v9883_v0, %v6166_v28  ;;  %v2599_v24 = vmul.f32 %v9885_v48, %v7473_v53  ;;  %v2600_v7 = vmul.f32 %v9886_v23, %v7473_v53  ;;  %v9893_v6 = vld [vmem:[#allocation52_spill] sm:$0xff]  ;;  %v9899_v23 = vld [vmem:[#allocation53_spill] sm:$0xff] }
 0x302   :  { %v7729_v59 = vmul.f32 %v9878_v60, %v7469_v41  ;;  %v2597_v2 = vmul.f32 %v9882_v20, %v7473_v53  ;;  %v9888_v41 = vrot.slane %v9887_v36, %v6166_v28  ;;  %v9890_v62 = vrot.slane %v9889_v46, %v6166_v28  ;;  %v9897_v20 = vld [vmem:[#allocation68_spill] sm:$0xff] }
 0x303   :  { %v2598_v26 = vmul.f32 %v9884_v16, %v7473_v53  ;;  %v7761_v49 = vmul.f32 %v9891_v12, %v7473_v53  ;;  %v7765_v15 = vmul.f32 %v9892_v8, %v7473_v53  ;;  %v9894_v61 = vrot.slane %v9893_v6, %v6166_v28  ;;  %v9898_v16 = vld [vmem:[#allocation69_spill] sm:$0xff]  ;;  %v9903_v12 = vld [vmem:[#allocation70_spill] sm:$0xff]  ;;  %v9904_v6 = vld [vmem:[#allocation71_spill] sm:$0xff] }
 0x304   :  { %v2601_v33 = vmul.f32 %v9888_v41, %v7473_v53  ;;  %v2602_v29 = vmul.f32 %v9890_v62, %v7473_v53  ;;  %v9896_v3 = vrot.slane %v9895_v55, %v6166_v28  ;;  %v2607_v0 = vmul.f32 %v9897_v20, %v7477_v50  ;;  %v9901_v41 = vld [vmem:[#allocation55_spill] sm:$0xff]  ;;  %v7795_v20 = vpop.eup %5728 }
 0x305   :  { %v2605_v60 = vmul.f32 %v9894_v61, %v7477_v50  ;;  %v2608_v48 = vmul.f32 %v9898_v16, %v7477_v50  ;;  %v9900_v53 = vrot.slane %v9899_v23, %v6166_v28  ;;  %v9902_v46 = vrot.slane %v9901_v41, %v6166_v28  ;;  %v7800_v41 = vpop.eup %5730 }
 0x306   :  { %v2606_v51 = vmul.f32 %v9896_v3, %v7477_v50  ;;  %v2611_v8 = vmul.f32 %v9903_v12, %v7477_v50  ;;  %v7791_v61 = vmul.f32 %v9904_v6, %v7477_v50  ;;  %v2613_v55 = vsel %vm1748_vm1, %v2581_v54, 0.0  ;;  %v7807_v12 = vpop.eup %5732 }
 0x307   :  { %v2609_v36 = vmul.f32 %v9900_v53, %v7477_v50  ;;  %v2610_v62 = vmul.f32 %v9902_v46, %v7477_v50  ;;  %v2614_v3 = vsel %vm1748_vm1, %v2589_v44, 0.0  ;;  %v2616_v23 = vsel %vm1748_vm1, %v2597_v2, 0.0 }
 0x308   :  { %v2615_v16 = vadd.f32 %v2614_v3, %v2613_v55  ;;  %v2618_v53 = vsel %vm1748_vm1, %v2605_v60, 0.0  ;;  %v2620_v28 = vsel %vm1748_vm1, %v2582_v11, 0.0  ;;  %v1893_v46 = vsel %vm1748_vm1, %v7795_v20, 0.0  ;;  %v7811_v11 = vpop.eup %5734 }
 0x309   :  { %v2621_v50 = vsel %vm1748_vm1, %v2590_v57, 0.0  ;;  %v2623_v54 = vsel %vm1748_vm1, %v2598_v26, 0.0  ;;  %v2625_v44 = vsel %vm1748_vm1, %v2606_v51, 0.0  ;;  %v1894_v6 = vrot.slane %v1893_v46, 4  ;;  %v7819_v51 = vpop.eup %5736 }
 0x30a   :  { %v1900_v2 = vsel %vm1748_vm1, %v7800_v41, 0.0  ;;  %v2617_v60 = vadd.f32 %v2616_v23, %v2615_v16  ;;  %v2622_v55 = vadd.f32 %v2621_v50, %v2620_v28  ;;  %v7815_v45 = vsel %vm1748_vm1, %v7807_v12, 0.0  ;;  %v7824_v23 = vpop.eup %5738 }
 0x30b   :  { %v1901_v3 = vrot.slane %v1900_v2, 4  ;;  %v2627_v57 = vsel %vm1748_vm1, %v2583_v21, 0.0  ;;  %v2628_v26 = vsel %vm1748_vm1, %v2591_v25, 0.0  ;;  %v7821_v17 = vadd.f32 %v1894_v6, %v1893_v46  ;;  %v7834_v1 = vpop.eup %5740 }
 0x30c   :  { %v2619_v42 = vadd.f32 %v2618_v53, %v2617_v60  ;;  %v2624_v16 = vadd.f32 %v2623_v54, %v2622_v55  ;;  %v2629_v50 = vadd.f32 %v2628_v26, %v2627_v57  ;;  %v2630_v56 = vsel %vm1748_vm1, %v2599_v24, 0.0 }
 0x30d   :  { %v7826_v28 = vadd.f32 %v1901_v3, %v1900_v2  ;;  %v2632_v5 = vsel %vm1748_vm1, %v2607_v0, 0.0  ;;  %v2634_v25 = vsel %vm1748_vm1, %v7687_v37, 0.0  ;;  %v2635_v46 = vsel %vm1748_vm1, %v2592_v38, 0.0 }
 0x30e   :  { %v2626_v21 = vadd.f32 %v2625_v44, %v2624_v16  ;;  %v2637_v6 = vsel %vm1748_vm1, %v2600_v7, 0.0  ;;  %v2631_v53 = vadd.f32 %v2630_v56, %v2629_v50  ;;  %v2636_v54 = vadd.f32 %v2635_v46, %v2634_v25 }
 0x30f   :  { %v2639_v2 = vsel %vm1748_vm1, %v2608_v48, 0.0  ;;  %v2641_v60 = vsel %vm1748_vm1, %v7693_v39, 0.0  ;;  %v2642_v24 = vsel %vm1748_vm1, %v2593_v27, 0.0  ;;  %v2644_v0 = vsel %vm1748_vm1, %v2601_v33, 0.0 }
 0x310   :  { %v2646_v44 = vsel %vm1748_vm1, %v2609_v36, 0.0  ;;  %v2648_v37 = vsel %vm1748_vm1, %v7699_v4, 0.0  ;;  %v2633_v38 = vadd.f32 %v2632_v5, %v2631_v53  ;;  %v2638_v7 = vadd.f32 %v2637_v6, %v2636_v54  ;;  %v7854_v4 = vpop.permute.xlu0 %1046  ;;  %v7867_v53 = vpop.permute.xlu1 %1052 }
 0x311   :  { %v2643_v55 = vadd.f32 %v2642_v24, %v2641_v60  ;;  %v2649_v56 = vsel %vm1748_vm1, %v7729_v59, 0.0  ;;  %v2651_v48 = vsel %vm1748_vm1, %v2602_v29, 0.0  ;;  %v2653_v39 = vsel %vm1748_vm1, %v2610_v62, 0.0 }
 0x312   :  { %v2650_v3 = vadd.f32 %v2649_v56, %v2648_v37  ;;  %v2655_v27 = vsel %vm1748_vm1, %v7703_v9, 0.0  ;;  %v2640_v33 = vadd.f32 %v2639_v2, %v2638_v7  ;;  %v2656_v36 = vsel %vm1748_vm1, %v7733_v52, 0.0 }
 0x313   :  { %v2645_v57 = vadd.f32 %v2644_v0, %v2643_v55  ;;  %v2658_v5 = vsel %vm1748_vm1, %v7761_v49, 0.0  ;;  %v2657_v59 = vadd.f32 %v2656_v36, %v2655_v27  ;;  %v2660_v16 = vsel %vm1748_vm1, %v2611_v8, 0.0 }
 0x314   :  { %v2652_v26 = vadd.f32 %v2651_v48, %v2650_v3  ;;  %v2662_v29 = vsel %vm1748_vm1, %v7707_v18, 0.0  ;;  %v2663_v9 = vsel %vm1748_vm1, %v7737_v31, 0.0  ;;  %v2665_v50 = vsel %vm1748_vm1, %v7765_v15, 0.0  ;;  %v7889_v55 = vpop.permute.xlu0 %1058 }
 0x315   :  { %v2647_v62 = vadd.f32 %v2646_v44, %v2645_v57  ;;  %v2667_v52 = vsel %vm1748_vm1, %v7791_v61, 0.0  ;;  %v2659_v25 = vadd.f32 %v2658_v5, %v2657_v59  ;;  %v2664_v46 = vadd.f32 %v2663_v9, %v2662_v29  ;;  %v7897_v5 = vpop.permute.xlu1 %1066 }
 0x316   :  { %v2654_v49 = vadd.f32 %v2653_v39, %v2652_v26  ;;  %v7865_v6 = vmul.f32 0.5, %v2619_v42  ;;  %v7869_v8 = vmul.f32 0.5, %v2626_v21  ;;  %v7871_v18 = vmul.f32 0.5, %v2633_v38 }
 0x317   :  { %v7873_v54 = vmul.f32 0.5, %v2640_v33  ;;  %v7875_v31 = vmul.f32 0.5, %v2647_v62  ;;  %v2661_v2 = vadd.f32 %v2660_v16, %v2659_v25  ;;  %v2666_v15 = vadd.f32 %v2665_v50, %v2664_v46 }
 0x318   :  { %v7877_v60 = vmul.f32 0.5, %v2654_v49  ;;  %v2677_v61 = vsel %vm1748_vm1, %v7865_v6, -inf  ;;  %v2684_v42 = vsel %vm1748_vm1, %v7869_v8, -inf  ;;  %v2691_v21 = vsel %vm1748_vm1, %v7871_v18, -inf }
 0x319   :  { %v2678_v24 = vrot.slane %v2677_v61, 4  ;;  %v2698_v0 = vsel %vm1748_vm1, %v7873_v54, -inf  ;;  %v2668_v44 = vadd.f32 %v2667_v52, %v2666_v15  ;;  %v7887_v37 = vmul.f32 0.5, %v2661_v2 }
 0x31a   :  { %v2685_v38 = vrot.slane %v2684_v42, 4  ;;  %v2692_v7 = vrot.slane %v2691_v21, 4  ;;  %v2699_v3 = vrot.slane %v2698_v0, 4  ;;  %v2705_v48 = vsel %vm1748_vm1, %v7875_v31, -inf }
 0x31b   :  { %v2679_v56 = vmax.f32 %v2677_v61, %v2678_v24  ;;  %v2712_v39 = vsel %vm1748_vm1, %v7877_v60, -inf  ;;  %v7895_v27 = vmul.f32 0.5, %v2668_v44  ;;  %v2706_v36 = vrot.slane %v2705_v48, 4 }
 0x31c   :  { %v2686_v33 = vmax.f32 %v2684_v42, %v2685_v38  ;;  %v2693_v57 = vmax.f32 %v2691_v21, %v2692_v7  ;;  %v2700_v59 = vmax.f32 %v2698_v0, %v2699_v3  ;;  %v2713_v16 = vrot.slane %v2712_v39, 4  ;;  %v7903_v21 = vpop.permute.xlu0 %1048 }
 0x31d   :  { %v2680_v26 = vrot.slane %v2679_v56, 2  ;;  %v2719_v29 = vsel %vm1748_vm1, %v7887_v37, -inf  ;;  %v2707_v50 = vmax.f32 %v2705_v48, %v2706_v36  ;;  %v2726_v2 = vsel %vm1748_vm1, %v7895_v27, -inf }
 0x31e   :  { %v2687_v62 = vrot.slane %v2686_v33, 2  ;;  %v2694_v9 = vrot.slane %v2693_v57, 2  ;;  %v2720_v52 = vrot.slane %v2719_v29, 4  ;;  %v2701_v25 = vrot.slane %v2700_v59, 2 }
 0x31f   :  { %v2681_v49 = vmax.f32 %v2679_v56, %v2680_v26  ;;  %v2714_v46 = vmax.f32 %v2712_v39, %v2713_v16  ;;  %v2708_v24 = vrot.slane %v2707_v50, 2  ;;  %v2727_v7 = vrot.slane %v2726_v2, 4  ;;  %v7905_v56 = vpop.permute.xlu1 %1054 }
 0x320   :  { %v2688_v15 = vmax.f32 %v2686_v33, %v2687_v62  ;;  %v2695_v61 = vmax.f32 %v2693_v57, %v2694_v9  ;;  %v2721_v42 = vmax.f32 %v2719_v29, %v2720_v52  ;;  %v2702_v44 = vmax.f32 %v2700_v59, %v2701_v25  ;;  %v1061_v30 = vpop.permute.xlu0 %1060 }
 0x321   :  { %v2682_v0 = vrot.slane %v2681_v49, 1  ;;  %v2715_v38 = vrot.slane %v2714_v46, 2  ;;  %v2709_v48 = vmax.f32 %v2707_v50, %v2708_v24  ;;  %v2728_v43 = vmax.f32 %v2726_v2, %v2727_v7 }
 0x322   :  { %v2689_v3 = vrot.slane %v2688_v15, 1  ;;  %v2696_v19 = vrot.slane %v2695_v61, 1  ;;  %v2722_v36 = vrot.slane %v2721_v42, 2  ;;  %v2703_v26 = vrot.slane %v2702_v44, 1 }
 0x323   :  { %v2683_v39 = vmax.f32 %v2681_v49, %v2682_v0  ;;  %v2716_v16 = vmax.f32 %v2714_v46, %v2715_v38  ;;  %v2710_v62 = vrot.slane %v2709_v48, 1  ;;  %v2729_v34 = vrot.slane %v2728_v43, 2 }
 0x324   :  { %v2690_v33 = vmax.f32 %v2688_v15, %v2689_v3  ;;  %v2697_v57 = vmax.f32 %v2695_v61, %v2696_v19  ;;  %v2723_v29 = vmax.f32 %v2721_v42, %v2722_v36  ;;  %v2704_v9 = vmax.f32 %v2702_v44, %v2703_v26  ;;  %v7912_v44 = vpop.permute.xlu1 %1068  ;;  %v9905_v3 = vld [vmem:[#allocation6_spill] sm:$0xff] }
 0x325   :  { %v2717_v52 = vrot.slane %v2716_v16, 1  ;;  %v2733_v59 = vsub.f32 %v7865_v6, %v2683_v39  ;;  %v2711_v25 = vmax.f32 %v2709_v48, %v2710_v62  ;;  %v2730_v0 = vmax.f32 %v2728_v43, %v2729_v34  ;;  %v9906_v48 = vld [vmem:[#allocation2_spill] sm:$0xff] }
 0x326   :  { %v2724_v35 = vrot.slane %v2723_v29, 1  ;;  %v2734_v50 = vsub.f32 %v7869_v8, %v2690_v33  ;;  %v2735_v24 = vsub.f32 %v7871_v18, %v2697_v57  ;;  %v2736_v46 = vsub.f32 %v7873_v54, %v2704_v9 }
 0x327   :  { %v2718_v49 = vmax.f32 %v2716_v16, %v2717_v52  ;;  %v2741_v2 = vmul.f32 1.442695, %v2733_v59  ;;  %v2737_v15 = vsub.f32 %v7875_v31, %v2711_v25  ;;  %v2731_v6 = vrot.slane %v2730_v0, 1 }
 0x328   :  { %v2725_v19 = vmax.f32 %v2723_v29, %v2724_v35  ;;  %v2743_v61 = vmul.f32 1.442695, %v2734_v50  ;;  %v2745_v42 = vmul.f32 1.442695, %v2735_v24  ;;  %v2747_v8 = vmul.f32 1.442695, %v2736_v46  ;;  %v1081_v57 = vpop.permute.xlu1 %1080 }
 0x329   :  { %v2738_v38 = vsub.f32 %v7877_v60, %v2718_v49  ;;  %5742 = vpow2.f32 %v2741_v2  ;;  %v2749_v7 = vmul.f32 1.442695, %v2737_v15  ;;  %v1100_v34 = vcombine.low %v7854_v4, %v7889_v55  ;;  %v9907_v29 = vld [vmem:[#allocation3_spill] sm:$0xff] }
 0x32a   :  { %v2739_v18 = vsub.f32 %v7887_v37, %v2725_v19  ;;  %5744 = vpow2.f32 %v2743_v61  ;;  %v7918_v43 = vmax.f32 %v2730_v0, %v2731_v6  ;;  %v1101_v54 = vcombine.high %v7854_v4, %v7889_v55  ;;  %v1075_v37 = vpop.permute.xlu0 %1074  ;;  %v9908_v0 = vld [vmem:[#allocation7_spill] sm:$0xff]  ;;  %v9909_v19 = vld [vmem:[#allocation5_spill] sm:$0xff] }
 0x32b   :  { %5746 = vpow2.f32 %v2745_v42  ;;  %v2751_v35 = vmul.f32 1.442695, %v2738_v38  ;;  %v1108_v60 = vrot.slane %v1100_v34, %v9905_v3  ;;  %v1084_v36 = vcombine.low %v9906_v48, %v7867_v53 }
 0x32c   :  { %5748 = vpow2.f32 %v2747_v8  ;;  %v2753_v31 = vmul.f32 1.442695, %v2739_v18  ;;  %v2740_v39 = vsub.f32 %v7895_v27, %v7918_v43  ;;  %v1115_v26 = vrot.slane %v1101_v54, %v9905_v3  ;;  %v1079_v54 = vpop.permute.xlu1 %1078 }
 0x32d   :  { %5750 = vpow2.f32 %v2749_v7  ;;  %v1085_v16 = vcombine.high %v9906_v48, %v7867_v53  ;;  %v1092_v4 = vrot.slane %v1084_v36, %v9905_v3  ;;  %v1236_v55 = vcombine.low %v7903_v21, %v1061_v30  ;;  %v9910_v48 = vld [vmem:[#allocation4_spill] sm:$0xff] }
 0x32e   :  { %5752 = vpow2.f32 %v2751_v35  ;;  %v1237_v33 = vcombine.high %v7903_v21, %v1061_v30  ;;  %v1220_v9 = vcombine.low %v9907_v29, %v7905_v56  ;;  %v1221_v52 = vcombine.high %v9907_v29, %v7905_v56  ;;  %v1073_v61 = vpop.permute.xlu0 %1072 }
 0x32f   :  { %5754 = vpow2.f32 %v2753_v31  ;;  %v1099_v62 = vrot.slane %v1085_v16, %v9905_v3  ;;  %v1148_v59 = vcombine.low %v1092_v4, %v1108_v60  ;;  %v1149_v25 = vcombine.high %v1092_v4, %v1108_v60 }
 0x330   :  { %v1244_v53 = vrot.slane %v1236_v55, %v9905_v3  ;;  %v1251_v50 = vrot.slane %v1237_v33, %v9905_v3  ;;  %v1228_v30 = vrot.slane %v1220_v9, %v9905_v3  ;;  %v1235_v21 = vrot.slane %v1221_v52, %v9905_v3 }
 0x331   :  { %v1164_v24 = vcombine.low %v1099_v62, %v1115_v26  ;;  %v1165_v49 = vcombine.high %v1099_v62, %v1115_v26  ;;  %v7943_v46 = vrot.slane %v1148_v59, %v9908_v0  ;;  %v7946_v2 = vrot.slane %v1149_v25, %v9908_v0 }
 0x332   :  { %v1252_v56 = vcombine.low %v9909_v19, %v1075_v37  ;;  %v1253_v15 = vcombine.high %v9909_v19, %v1075_v37  ;;  %v1284_v38 = vcombine.low %v1228_v30, %v1244_v53  ;;  %v1285_v8 = vcombine.high %v1228_v30, %v1244_v53 }
 0x333   :  { %v7951_v42 = vrot.slane %v1164_v24, %v9908_v0  ;;  %v7954_v6 = vrot.slane %v1165_v49, %v9908_v0  ;;  %v1300_v18 = vcombine.low %v1235_v21, %v1251_v50  ;;  %v1301_v7 = vcombine.high %v1235_v21, %v1251_v50 }
 0x334   :  { %v1260_v34 = vrot.slane %v1252_v56, %v9905_v3  ;;  %v1267_v35 = vrot.slane %v1253_v15, %v9905_v3  ;;  %v1292_v31 = vrot.slane %v1284_v38, %v9908_v0  ;;  %v1299_v60 = vrot.slane %v1285_v8, %v9908_v0 }
 0x335   :  { %v1116_v36 = vcombine.low %v9910_v48, %v1073_v61  ;;  %v1117_v37 = vcombine.high %v9910_v48, %v1073_v61  ;;  %v1308_v16 = vrot.slane %v1300_v18, %v9908_v0  ;;  %v1315_v4 = vrot.slane %v1301_v7, %v9908_v0 }
 0x336   :  { %v7962_v26 = vpop.eup %5742  ;;  %v1268_v55 = vcombine.low %v7912_v44, %v1081_v57  ;;  %v1269_v33 = vcombine.high %v7912_v44, %v1081_v57  ;;  %v1132_v59 = vcombine.low %v7897_v5, %v1079_v54  ;;  %v1133_v21 = vcombine.high %v7897_v5, %v1079_v54 }
 0x337   :  { %v7968_v62 = vpop.eup %5744  ;;  %v2757_v29 = vsel %vm1748_vm1, %v7962_v26, 0.0  ;;  %v1124_v9 = vrot.slane %v1116_v36, %v9905_v3  ;;  %v1131_v52 = vrot.slane %v1117_v37, %v9905_v3 }
 0x338   :  { %9911 = vst [vmem:[#allocation104_spill] sm:$0xff] %v7968_v62  ;;  %v7975_v25 = vpop.eup %5746  ;;  %v2758_v53 = vrot.slane %v2757_v29, 4  ;;  %v2764_v50 = vsel %vm1748_vm1, %v7968_v62, 0.0  ;;  %v1276_v24 = vrot.slane %v1268_v55, %v9905_v3  ;;  %v1283_v44 = vrot.slane %v1269_v33, %v9905_v3 }
 0x339   :  { %9912 = vst [vmem:[#allocation113_spill] sm:$0xff] %v7975_v25  ;;  %v7981_v57 = vpop.eup %5748  ;;  %v2765_v49 = vrot.slane %v2764_v50, 4  ;;  %v7985_v30 = vsel %vm1748_vm1, %v7975_v25, 0.0  ;;  %v1140_v19 = vrot.slane %v1132_v59, %v9905_v3  ;;  %v1147_v37 = vrot.slane %v1133_v21, %v9905_v3 }
 0x33a   :  { %9913 = vst [vmem:[#allocation95_spill] sm:$0xff] %v7981_v57  ;;  %v7989_v56 = vpop.eup %5750  ;;  %v7991_v15 = vadd.f32 %v2758_v53, %v2757_v29  ;;  %v1316_v38 = vcombine.low %v1260_v34, %v1276_v24  ;;  %v1317_v8 = vcombine.high %v1260_v34, %v1276_v24  ;;  %v1332_v48 = vcombine.low %v1267_v35, %v1283_v44 }
 0x33b   :  { %9914 = vst [vmem:[#allocation97_spill] sm:$0xff] %v7989_v56  ;;  %v7994_v18 = vpop.eup %5752  ;;  %v7996_v7 = vadd.f32 %v2765_v49, %v2764_v50  ;;  %v1333_v36 = vcombine.high %v1267_v35, %v1283_v44  ;;  %v1180_v33 = vcombine.low %v1124_v9, %v1140_v19  ;;  %v1181_v29 = vcombine.high %v1124_v9, %v1140_v19 }
 0x33c   :  { %9915 = vst [vmem:[#allocation105_spill] sm:$0xff] %v7994_v18  ;;  %v7999_v55 = vpop.eup %5754  ;;  %v1324_v5 = vrot.slane %v1316_v38, %v9908_v0  ;;  %v1331_v54 = vrot.slane %v1317_v8, %v9908_v0  ;;  %v1340_v59 = vrot.slane %v1332_v48, %v9908_v0  ;;  %v1196_v53 = vcombine.low %v1131_v52, %v1147_v37 }
 0x33d   :  { %9916 = vst [vmem:[#allocation106_spill] sm:$0xff] %v7999_v55  ;;  %v1347_v34 = vrot.slane %v1333_v36, %v9908_v0  ;;  %v1197_v24 = vcombine.high %v1131_v52, %v1147_v37  ;;  %v1188_v19 = vrot.slane %v1180_v33, %v9908_v0  ;;  %v1195_v52 = vrot.slane %v1181_v29, %v9908_v0 }
 0x33e   :  { %v8005_v50 = vcombine.low %v1292_v31, %v1324_v5  ;;  %v8007_v49 = vcombine.high %v1292_v31, %v1324_v5  ;;  %v8009_v35 = vcombine.low %v1299_v60, %v1331_v54  ;;  %v8011_v44 = vcombine.high %v1299_v60, %v1331_v54 }
 0x33f   :  { %v8013_v21 = vcombine.low %v1308_v16, %v1340_v59  ;;  %v8015_v38 = vcombine.high %v1308_v16, %v1340_v59  ;;  %v8017_v8 = vcombine.low %v1315_v4, %v1347_v34  ;;  %v8019_v9 = vcombine.high %v1315_v4, %v1347_v34 }
 0x340   :  { %9917 = vst [vmem:[#allocation96_spill] sm:$0xff] %v8005_v50  ;;  %9918 = vst [vmem:[#allocation98_spill] sm:$0xff] %v8007_v49  ;;  %v1204_v48 = vrot.slane %v1196_v53, %v9908_v0  ;;  %v1211_v31 = vrot.slane %v1197_v24, %v9908_v0  ;;  %v9925_v60 = vsub.f32 %v7654_v22, %v7669_v47  ;;  %v1896_v37 = vrot.slane %v7821_v17, 2 }
 0x341   :  { %9919 = vst [vmem:[#allocation107_spill] sm:$0xff] %v8009_v35  ;;  %9920 = vst [vmem:[#allocation108_spill] sm:$0xff] %v8011_v44  ;;  %v1903_v16 = vrot.slane %v7826_v28, 2  ;;  %v9926_v4 = vrot.slane %v7815_v45, 4  ;;  %v8034_v54 = vcombine.low %v7943_v46, %v1188_v19  ;;  %v8037_v33 = vcombine.high %v7943_v46, %v1188_v19 }
 0x342   :  { %9921 = vst [vmem:[#allocation109_spill] sm:$0xff] %v8013_v21  ;;  %9922 = vst [vmem:[#allocation72_spill] sm:$0xff] %v8015_v38  ;;  %v1891_v36 = vmul.f32 1.442695, %v9925_v60  ;;  %v8040_v29 = vcombine.low %v7946_v2, %v1195_v52  ;;  %v8043_v22 = vcombine.high %v7946_v2, %v1195_v52  ;;  %v8046_v47 = vcombine.low %v7951_v42, %v1204_v48 }
 0x343   :  { %9923 = vst [vmem:[#allocation110_spill] sm:$0xff] %v8017_v8  ;;  %9924 = vst [vmem:[#allocation73_spill] sm:$0xff] %v8019_v9  ;;  %v1909_v5 = vadd.f32 %v9926_v4, %v7815_v45  ;;  %v8049_v59 = vcombine.high %v7951_v42, %v1204_v48  ;;  %v8052_v45 = vcombine.low %v7954_v6, %v1211_v31  ;;  %v1914_v2 = vsel %vm1748_vm1, %v7811_v11, 0.0 }
 0x344   :  { %9927 = vst [vmem:[#allocation111_spill] sm:$0xff] %v8046_v47  ;;  %v8055_v34 = vcombine.high %v7954_v6, %v1211_v31  ;;  %5756 = vpow2.f32 %v1891_v36  ;;  %v1897_v46 = vadd.f32 %v1896_v37, %v7821_v17  ;;  %v1904_v53 = vadd.f32 %v1903_v16, %v7826_v28 }
 0x345   :  { %9928 = vst [vmem:[#allocation74_spill] sm:$0xff] %v8049_v59  ;;  %9929 = vst [vmem:[#allocation112_spill] sm:$0xff] %v8052_v45  ;;  %v1910_v24 = vrot.slane %v1909_v5, 2  ;;  %v1921_v19 = vsel %vm1748_vm1, %v7819_v51, 0.0  ;;  %v1928_v42 = vsel %vm1748_vm1, %v7824_v23, 0.0  ;;  %v1935_v52 = vsel %vm1748_vm1, %v7834_v1, 0.0 }
 0x346   :  { %9930 = vst [vmem:[#allocation75_spill] sm:$0xff] %v8055_v34  ;;  %v1898_v6 = vrot.slane %v1897_v46, 1  ;;  %v1905_v48 = vrot.slane %v1904_v53, 1  ;;  %v1915_v60 = vrot.slane %v1914_v2, 4  ;;  %v1922_v17 = vrot.slane %v1921_v19, 4 }
 0x347   :  { %v1911_v31 = vadd.f32 %v1910_v24, %v1909_v5  ;;  %v1929_v36 = vrot.slane %v1928_v42, 4  ;;  %v1936_v28 = vrot.slane %v1935_v52, 4  ;;  %v2755_v37 = vmul.f32 1.442695, %v2740_v39 }
 0x348   :  { %v1899_v16 = vadd.f32 %v1898_v6, %v1897_v46  ;;  %v1906_v4 = vadd.f32 %v1905_v48, %v1904_v53  ;;  %v1916_v9 = vadd.f32 %v1915_v60, %v1914_v2  ;;  %v1923_v8 = vadd.f32 %v1922_v17, %v1921_v19 }
 0x349   :  { %v1912_v61 = vrot.slane %v1911_v31, 1  ;;  %v1930_v38 = vadd.f32 %v1929_v36, %v1928_v42  ;;  %v1937_v21 = vadd.f32 %v1936_v28, %v1935_v52  ;;  %5758 = vpow2.f32 %v2755_v37 }
 0x34a   :  { %v1917_v35 = vrot.slane %v1916_v9, 2  ;;  %5760 = vrcp.f32 %v1899_v16  ;;  %v2760_v5 = vrot.slane %v7991_v15, 2  ;;  %v1924_v24 = vrot.slane %v1923_v8, 2 }
 0x34b   :  { %v1913_v44 = vadd.f32 %v1912_v61, %v1911_v31  ;;  %v1931_v49 = vrot.slane %v1930_v38, 2  ;;  %v1938_v50 = vrot.slane %v1937_v21, 2  ;;  %5762 = vrcp.f32 %v1906_v4 }
 0x34c   :  { %v1918_v58 = vadd.f32 %v1917_v35, %v1916_v9  ;;  %v2761_v27 = vadd.f32 %v2760_v5, %v7991_v15  ;;  %v2767_v43 = vrot.slane %v7996_v7, 2  ;;  %v1925_v39 = vadd.f32 %v1924_v24, %v1923_v8 }
 0x34d   :  { %5764 = vrcp.f32 %v1913_v44  ;;  %v1932_v46 = vadd.f32 %v1931_v49, %v1930_v38  ;;  %v1939_v53 = vadd.f32 %v1938_v50, %v1937_v21  ;;  %v9931_v61 = vrot.slane %v7985_v30, 4 }
 0x34e   :  { %v1919_v19 = vrot.slane %v1918_v58, 1  ;;  %v2762_v42 = vrot.slane %v2761_v27, 1  ;;  %v2768_v52 = vadd.f32 %v2767_v43, %v7996_v7  ;;  %v2778_v6 = vsel %vm1748_vm1, %v7981_v57, 0.0 }
 0x34f   :  { %v2773_v2 = vadd.f32 %v9931_v61, %v7985_v30  ;;  %v1926_v35 = vrot.slane %v1925_v39, 1  ;;  %v1933_v44 = vrot.slane %v1932_v46, 1  ;;  %v1940_v9 = vrot.slane %v1939_v53, 1 }
 0x350   :  { %v1920_v48 = vadd.f32 %v1919_v19, %v1918_v58  ;;  %v2763_v31 = vadd.f32 %v2762_v42, %v2761_v27  ;;  %v2769_v8 = vrot.slane %v2768_v52, 1  ;;  %v2779_v49 = vrot.slane %v2778_v6, 4 }
 0x351   :  { %v2774_v15 = vrot.slane %v2773_v2, 2  ;;  %v8079_v50 = vpop.eup %5756  ;;  %v1927_v21 = vadd.f32 %v1926_v35, %v1925_v39  ;;  %v1934_v38 = vadd.f32 %v1933_v44, %v1932_v46  ;;  %v1941_v30 = vadd.f32 %v1940_v9, %v1939_v53 }
 0x352   :  { %v1942_v7 = vsel %vm1748_vm1, %v8079_v50, 0.0  ;;  %5766 = vrcp.f32 %v1920_v48  ;;  %v8083_v17 = vadd.f32 %v2769_v8, %v2768_v52  ;;  %v2780_v36 = vadd.f32 %v2779_v49, %v2778_v6 }
 0x353   :  { %v2775_v60 = vadd.f32 %v2774_v15, %v2773_v2  ;;  %v1943_v28 = vrot.slane %v1942_v7, 4  ;;  %5768 = vrcp.f32 %v1927_v21  ;;  %v2785_v58 = vsel %vm1748_vm1, %v7989_v56, 0.0 }
 0x354   :  { %5770 = vrcp.f32 %v1934_v38  ;;  %v2781_v16 = vrot.slane %v2780_v36, 2  ;;  %v2786_v4 = vrot.slane %v2785_v58, 4  ;;  %v2792_v5 = vsel %vm1748_vm1, %v7994_v18, 0.0 }
 0x355   :  { %v2776_v37 = vrot.slane %v2775_v60, 1  ;;  %v1944_v24 = vadd.f32 %v1943_v28, %v1942_v7  ;;  %5772 = vrcp.f32 %v1941_v30  ;;  %v2793_v43 = vrot.slane %v2792_v5, 4 }
 0x356   :  { %v8091_v39 = vpop.eup %5758  ;;  %v8093_v46 = vadd.f32 %v2781_v16, %v2780_v36  ;;  %v8095_v53 = vadd.f32 %v2786_v4, %v2785_v58  ;;  %v2799_v61 = vsel %vm1748_vm1, %v7999_v55, 0.0  ;;  %5774 = vrcp.f32 %v2763_v31 }
 0x357   :  { %v8089_v27 = vadd.f32 %v2776_v37, %v2775_v60  ;;  %9932 = vst [vmem:[#allocation8_spill] sm:$0xff] %v8091_v39  ;;  %v5761_v2 = vpop.eup %5760  ;;  %v1945_v19 = vrot.slane %v1944_v24, 2  ;;  %v8099_v42 = vadd.f32 %v2793_v43, %v2792_v5  ;;  %v2800_v52 = vrot.slane %v2799_v61, 4 }
 0x358   :  { %v8103_v6 = vsel %vm1748_vm1, %v8091_v39, 0.0  ;;  %v5763_v35 = vpop.eup %5762  ;;  %v1957_v44 = vmul.f32 %v5761_v2, %v7795_v20 }
 0x359   :  { %v1946_v31 = vadd.f32 %v1945_v19, %v1944_v24  ;;  %v1958_v49 = vmul.f32 %v5763_v35, %v7800_v41  ;;  %v8111_v38 = vadd.f32 %v2800_v52, %v2799_v61 }
 0x35a   :  { %v5765_v8 = vpop.eup %5764  ;;  %v1965_v60 = vmul.f32 %v1957_v44, %v8034_v54  ;;  %v1973_v20 = vmul.f32 %v1957_v44, %v8037_v33  ;;  %v8117_v7 = vmul.f32 %v1957_v44, %v8040_v29  ;;  %v8130_v4 = vmul.f32 %v1957_v44, %v8043_v22 }
 0x35b   :  { %v1959_v30 = vmul.f32 %v5765_v8, %v7807_v12  ;;  %v1947_v36 = vrot.slane %v1946_v31, 1  ;;  %v1966_v28 = vmul.f32 %v1958_v49, %v8034_v54  ;;  %v1974_v37 = vmul.f32 %v1958_v49, %v8037_v33 }
 0x35c   :  { %v8122_v41 = vmul.f32 %v1958_v49, %v8040_v29  ;;  %v8133_v24 = vmul.f32 %v1958_v49, %v8043_v22  ;;  %v1997_v61 = vsel %vm1748_vm1, %v1965_v60, 0.0  ;;  %v2053_v35 = vsel %vm1748_vm1, %v1973_v20, 0.0 }
 0x35d   :  { %v1967_v58 = vmul.f32 %v1959_v30, %v8034_v54  ;;  %v1975_v16 = vmul.f32 %v1959_v30, %v8037_v33  ;;  %v8127_v12 = vmul.f32 %v1959_v30, %v8040_v29  ;;  %v1948_v5 = vadd.f32 %v1947_v36, %v1946_v31 }
 0x35e   :  { %v8136_v43 = vmul.f32 %v1959_v30, %v8043_v22  ;;  %v1998_v2 = vrot.slane %v1997_v61, 4  ;;  %v2004_v19 = vsel %vm1748_vm1, %v1966_v28, 0.0  ;;  %v2054_v31 = vrot.slane %v2053_v35, 4 }
 0x35f   :  { %v2011_v52 = vsel %vm1748_vm1, %v1967_v58, 0.0  ;;  %v5767_v8 = vpop.eup %5766  ;;  %5776 = vrcp.f32 %v1948_v5  ;;  %v2005_v44 = vrot.slane %v2004_v19, 4  ;;  %v8144_v30 = vsel %vm1748_vm1, %v1974_v37, 0.0 }
 0x360   :  { %v2012_v48 = vrot.slane %v2011_v52, 4  ;;  %v5769_v36 = vpop.eup %5768  ;;  %v1960_v49 = vmul.f32 %v5767_v8, %v7811_v11  ;;  %v1999_v21 = vadd.f32 %v1998_v2, %v1997_v61  ;;  %v8147_v60 = vsel %vm1748_vm1, %v1975_v16, 0.0 }
 0x361   :  { %v5771_v28 = vpop.eup %5770  ;;  %v1961_v58 = vmul.f32 %v5769_v36, %v7819_v51  ;;  %v2006_v15 = vadd.f32 %v2005_v44, %v2004_v19  ;;  %v2055_v9 = vadd.f32 %v2054_v31, %v2053_v35  ;;  %5778 = vrcp.f32 %v8083_v17 }
 0x362   :  { %v2013_v20 = vadd.f32 %v2012_v48, %v2011_v52  ;;  %v5773_v5 = vpop.eup %5772  ;;  %v1962_v13 = vmul.f32 %v5771_v28, %v7824_v23  ;;  %v1968_v10 = vmul.f32 %v1960_v49, %v8034_v54  ;;  %v8153_v11 = vmul.f32 %v1960_v49, %v8037_v33 }
 0x363   :  { %v8156_v37 = vmul.f32 %v1960_v49, %v8040_v29  ;;  %v8158_v61 = vpop.eup %5774  ;;  %v1963_v16 = vmul.f32 %v5773_v5, %v7834_v1  ;;  %v1969_v51 = vmul.f32 %v1961_v58, %v8034_v54  ;;  %v8163_v48 = vmul.f32 %v1961_v58, %v8037_v33 }
 0x364   :  { %v8166_v2 = vmul.f32 %v1961_v58, %v8040_v29  ;;  %v1970_v23 = vmul.f32 %v1962_v13, %v8034_v54  ;;  %v8170_v19 = vmul.f32 %v1962_v13, %v8037_v33  ;;  %v8173_v52 = vmul.f32 %v1962_v13, %v8040_v29 }
 0x365   :  { %v8176_v35 = vmul.f32 %v1960_v49, %v8043_v22  ;;  %v1971_v1 = vmul.f32 %v1963_v16, %v8034_v54  ;;  %v8180_v8 = vmul.f32 %v1963_v16, %v8037_v33  ;;  %v8183_v44 = vmul.f32 %v1963_v16, %v8040_v29 }
 0x366   :  { %v8186_v31 = vmul.f32 %v1961_v58, %v8043_v22  ;;  %v8189_v36 = vmul.f32 %v1962_v13, %v8043_v22  ;;  %v8192_v28 = vmul.f32 %v1963_v16, %v8043_v22  ;;  %v2000_v5 = vrot.slane %v1999_v21, 2 }
 0x367   :  { %v2007_v49 = vrot.slane %v2006_v15, 2  ;;  %v2014_v40 = vrot.slane %v2013_v20, 2  ;;  %v2018_v63 = vsel %vm1748_vm1, %v1968_v10, 0.0  ;;  %v2025_v0 = vsel %vm1748_vm1, %v1969_v51, 0.0 }
 0x368   :  { %v2032_v32 = vsel %vm1748_vm1, %v1970_v23, 0.0  ;;  %v2001_v14 = vadd.f32 %v2000_v5, %v1999_v21  ;;  %v2019_v39 = vrot.slane %v2018_v63, 4  ;;  %v2026_v58 = vrot.slane %v2025_v0, 4 }
 0x369   :  { %v2008_v3 = vadd.f32 %v2007_v49, %v2006_v15  ;;  %v2015_v55 = vadd.f32 %v2014_v40, %v2013_v20  ;;  %v2033_v18 = vrot.slane %v2032_v32, 4  ;;  %v2039_v13 = vsel %vm1748_vm1, %v1971_v1, 0.0 }
 0x36a   :  { %v2056_v56 = vrot.slane %v2055_v9, 2  ;;  %v2002_v16 = vrot.slane %v2001_v14, 1  ;;  %v2020_v25 = vadd.f32 %v2019_v39, %v2018_v63  ;;  %v2027_v62 = vadd.f32 %v2026_v58, %v2025_v0 }
 0x36b   :  { %v2009_v57 = vrot.slane %v2008_v3, 1  ;;  %v2016_v34 = vrot.slane %v2015_v55, 1  ;;  %v2034_v45 = vadd.f32 %v2033_v18, %v2032_v32  ;;  %v2040_v10 = vrot.slane %v2039_v13, 4 }
 0x36c   :  { %v2057_v59 = vadd.f32 %v2056_v56, %v2055_v9  ;;  %v5777_v51 = vpop.eup %5776  ;;  %v8198_v47 = vadd.f32 %v2002_v16, %v2001_v14  ;;  %v2021_v15 = vrot.slane %v2020_v25, 2  ;;  %v2028_v23 = vrot.slane %v2027_v62, 2 }
 0x36d   :  { %v8200_v21 = vadd.f32 %v2009_v57, %v2008_v3  ;;  %v1964_v40 = vmul.f32 %v5777_v51, %v8079_v50  ;;  %v8203_v20 = vadd.f32 %v2016_v34, %v2015_v55  ;;  %v2035_v1 = vrot.slane %v2034_v45, 2 }
 0x36e   :  { %v2041_v5 = vadd.f32 %v2040_v10, %v2039_v13  ;;  %v2022_v49 = vadd.f32 %v2021_v15, %v2020_v25  ;;  %v2029_v63 = vadd.f32 %v2028_v23, %v2027_v62  ;;  %v2058_v0 = vrot.slane %v2057_v59, 1 }
 0x36f   :  { %v2061_v32 = vrot.slane %v8144_v30, 4  ;;  %v1972_v56 = vmul.f32 %v1964_v40, %v8034_v54  ;;  %v1980_v14 = vmul.f32 %v1964_v40, %v8037_v33  ;;  %v8209_v3 = vmul.f32 %v1964_v40, %v8040_v29 }
 0x370   :  { %v8212_v57 = vmul.f32 %v1964_v40, %v8043_v22  ;;  %v2023_v18 = vrot.slane %v2022_v49, 1  ;;  %v2030_v55 = vrot.slane %v2029_v63, 1  ;;  %v2036_v34 = vadd.f32 %v2035_v1, %v2034_v45 }
 0x371   :  { %v2042_v50 = vrot.slane %v2041_v5, 2  ;;  %v2046_v25 = vsel %vm1748_vm1, %v1972_v56, 0.0  ;;  %v8215_v62 = vadd.f32 %v2058_v0, %v2057_v59  ;;  %v2062_v39 = vadd.f32 %v2061_v32, %v8144_v30 }
 0x372   :  { %v2068_v54 = vrot.slane %v8147_v60, 4  ;;  %v8219_v9 = vadd.f32 %v2023_v18, %v2022_v49  ;;  %v8221_v33 = vadd.f32 %v2030_v55, %v2029_v63  ;;  %v2037_v29 = vrot.slane %v2036_v34, 1 }
 0x373   :  { %v2043_v58 = vadd.f32 %v2042_v50, %v2041_v5  ;;  %v2047_v22 = vrot.slane %v2046_v25, 4  ;;  %v2063_v13 = vrot.slane %v2062_v39, 2  ;;  %v2074_v45 = vsel %vm1748_vm1, %v8153_v11, 0.0 }
 0x374   :  { %v2069_v16 = vadd.f32 %v2068_v54, %v8147_v60  ;;  %v8226_v10 = vadd.f32 %v2037_v29, %v2036_v34  ;;  %v2075_v51 = vrot.slane %v2074_v45, 4  ;;  %v2081_v30 = vsel %vm1748_vm1, %v8163_v48, 0.0 }
 0x375   :  { %v2044_v59 = vrot.slane %v2043_v58, 1  ;;  %v2048_v15 = vadd.f32 %v2047_v22, %v2046_v25  ;;  %v2064_v23 = vadd.f32 %v2063_v13, %v2062_v39  ;;  %v2082_v1 = vrot.slane %v2081_v30, 4 }
 0x376   :  { %v2070_v40 = vrot.slane %v2069_v16, 2  ;;  %v2076_v5 = vadd.f32 %v2075_v51, %v2074_v45  ;;  %v2088_v60 = vsel %vm1748_vm1, %v8170_v19, 0.0  ;;  %v2095_v11 = vsel %vm1748_vm1, %v8180_v8, 0.0 }
 0x377   :  { %v8230_v49 = vadd.f32 %v2044_v59, %v2043_v58  ;;  %v2049_v63 = vrot.slane %v2048_v15, 2  ;;  %v2065_v0 = vrot.slane %v2064_v23, 1  ;;  %v2083_v56 = vadd.f32 %v2082_v1, %v2081_v30 }
 0x378   :  { %v2071_v32 = vadd.f32 %v2070_v40, %v2069_v16  ;;  %v2077_v18 = vrot.slane %v2076_v5, 2  ;;  %v2089_v55 = vrot.slane %v2088_v60, 4  ;;  %v2096_v48 = vrot.slane %v2095_v11, 4 }
 0x379   :  { %v2102_v34 = vsel %vm1748_vm1, %v1980_v14, 0.0  ;;  %v2050_v50 = vadd.f32 %v2049_v63, %v2048_v15  ;;  %v8237_v25 = vadd.f32 %v2065_v0, %v2064_v23  ;;  %v2084_v54 = vrot.slane %v2083_v56, 2 }
 0x37a   :  { %v2072_v39 = vrot.slane %v2071_v32, 1  ;;  %v2078_v29 = vadd.f32 %v2077_v18, %v2076_v5  ;;  %v2090_v58 = vadd.f32 %v2089_v55, %v2088_v60  ;;  %v2097_v19 = vadd.f32 %v2096_v48, %v2095_v11 }
 0x37b   :  { %v2103_v22 = vrot.slane %v2102_v34, 4  ;;  %v2051_v13 = vrot.slane %v2050_v50, 1  ;;  %v2085_v45 = vadd.f32 %v2084_v54, %v2083_v56  ;;  %v2109_v16 = vsel %vm1748_vm1, %v8117_v7, 0.0 }
 0x37c   :  { %v8239_v8 = vadd.f32 %v2072_v39, %v2071_v32  ;;  %v2079_v59 = vrot.slane %v2078_v29, 1  ;;  %v2091_v51 = vrot.slane %v2090_v58, 2  ;;  %v2098_v30 = vrot.slane %v2097_v19, 2 }
 0x37d   :  { %v2104_v14 = vadd.f32 %v2103_v22, %v2102_v34  ;;  %v8243_v15 = vadd.f32 %v2051_v13, %v2050_v50  ;;  %v2086_v23 = vrot.slane %v2085_v45, 1  ;;  %v2110_v40 = vrot.slane %v2109_v16, 4 }
 0x37e   :  { %v2116_v1 = vsel %vm1748_vm1, %v8122_v41, 0.0  ;;  %v8247_v5 = vadd.f32 %v2079_v59, %v2078_v29  ;;  %v2092_v60 = vadd.f32 %v2091_v51, %v2090_v58  ;;  %v2099_v11 = vadd.f32 %v2098_v30, %v2097_v19 }
 0x37f   :  { %v2105_v63 = vrot.slane %v2104_v14, 2  ;;  %v8249_v0 = vadd.f32 %v2086_v23, %v2085_v45  ;;  %v2111_v32 = vadd.f32 %v2110_v40, %v2109_v16  ;;  %v2117_v7 = vrot.slane %v2116_v1, 4 }
 0x380   :  { %v2123_v56 = vsel %vm1748_vm1, %v8127_v12, 0.0  ;;  %v2093_v18 = vrot.slane %v2092_v60, 1  ;;  %v2100_v55 = vrot.slane %v2099_v11, 1  ;;  %v2130_v41 = vsel %vm1748_vm1, %v8156_v37, 0.0 }
 0x381   :  { %v2106_v48 = vadd.f32 %v2105_v63, %v2104_v14  ;;  %v2124_v34 = vrot.slane %v2123_v56, 4  ;;  %v2112_v50 = vrot.slane %v2111_v32, 2  ;;  %v2118_v39 = vadd.f32 %v2117_v7, %v2116_v1 }
 0x382   :  { %v2137_v54 = vsel %vm1748_vm1, %v8166_v2, 0.0  ;;  %v8257_v29 = vadd.f32 %v2093_v18, %v2092_v60  ;;  %v8259_v58 = vadd.f32 %v2100_v55, %v2099_v11  ;;  %v2131_v45 = vrot.slane %v2130_v41, 4 }
 0x383   :  { %v2107_v19 = vrot.slane %v2106_v48, 1  ;;  %v2125_v22 = vadd.f32 %v2124_v34, %v2123_v56  ;;  %v2113_v13 = vadd.f32 %v2112_v50, %v2111_v32  ;;  %v2119_v12 = vrot.slane %v2118_v39, 2 }
 0x384   :  { %9933 = vst [vmem:[#allocation11_spill] sm:$0xff] %v8259_v58  ;;  %v2138_v16 = vrot.slane %v2137_v54, 4  ;;  %v2144_v30 = vsel %vm1748_vm1, %v8173_v52, 0.0  ;;  %v2151_v37 = vsel %vm1748_vm1, %v8183_v44, 0.0  ;;  %v2132_v23 = vadd.f32 %v2131_v45, %v2130_v41 }
 0x385   :  { %v8261_v59 = vadd.f32 %v2107_v19, %v2106_v48  ;;  %v2126_v51 = vrot.slane %v2125_v22, 2  ;;  %v2114_v2 = vrot.slane %v2113_v13, 1  ;;  %v2120_v14 = vadd.f32 %v2119_v12, %v2118_v39 }
 0x386   :  { %v2139_v40 = vadd.f32 %v2138_v16, %v2137_v54  ;;  %v2145_v60 = vrot.slane %v2144_v30, 4  ;;  %v2152_v11 = vrot.slane %v2151_v37, 4  ;;  %v2158_v63 = vsel %vm1748_vm1, %v8209_v3, 0.0 }
 0x387   :  { %9934 = vst [vmem:[#allocation24_spill] sm:$0xff] %v8261_v59  ;;  %v2127_v1 = vadd.f32 %v2126_v51, %v2125_v22  ;;  %v8269_v32 = vadd.f32 %v2114_v2, %v2113_v13  ;;  %v2121_v7 = vrot.slane %v2120_v14, 1  ;;  %v2133_v56 = vrot.slane %v2132_v23, 2 }
 0x388   :  { %v2140_v18 = vrot.slane %v2139_v40, 2  ;;  %v2146_v52 = vadd.f32 %v2145_v60, %v2144_v30  ;;  %v2153_v48 = vadd.f32 %v2152_v11, %v2151_v37  ;;  %v2159_v34 = vrot.slane %v2158_v63, 4 }
 0x389   :  { %9935 = vst [vmem:[#allocation25_spill] sm:$0xff] %v8269_v32  ;;  %v2128_v55 = vrot.slane %v2127_v1, 1  ;;  %v8271_v44 = vadd.f32 %v2121_v7, %v2120_v14  ;;  %v2134_v50 = vadd.f32 %v2133_v56, %v2132_v23  ;;  %v2165_v41 = vsel %vm1748_vm1, %v8130_v4, 0.0 }
 0x38a   :  { %v2141_v39 = vadd.f32 %v2140_v18, %v2139_v40  ;;  %v2147_v19 = vrot.slane %v2146_v52, 2  ;;  %v2154_v3 = vrot.slane %v2153_v48, 2  ;;  %v2160_v22 = vadd.f32 %v2159_v34, %v2158_v63 }
 0x38b   :  { %9936 = vst [vmem:[#allocation10_spill] sm:$0xff] %v8271_v44  ;;  %v8275_v54 = vadd.f32 %v2128_v55, %v2127_v1  ;;  %v2135_v13 = vrot.slane %v2134_v50, 1  ;;  %v2166_v45 = vrot.slane %v2165_v41, 4  ;;  %v2172_v16 = vsel %vm1748_vm1, %v8133_v24, 0.0 }
 0x38c   :  { %v2142_v12 = vrot.slane %v2141_v39, 1  ;;  %v2148_v51 = vadd.f32 %v2147_v19, %v2146_v52  ;;  %v2155_v30 = vadd.f32 %v2154_v3, %v2153_v48  ;;  %v2161_v37 = vrot.slane %v2160_v22, 2 }
 0x38d   :  { %9937 = vst [vmem:[#allocation14_spill] sm:$0xff] %v8275_v54  ;;  %v2173_v2 = vrot.slane %v2172_v16, 4  ;;  %v8279_v14 = vadd.f32 %v2135_v13, %v2134_v50  ;;  %v2167_v4 = vadd.f32 %v2166_v45, %v2165_v41  ;;  %v2179_v40 = vsel %vm1748_vm1, %v8136_v43, 0.0 }
 0x38e   :  { %v8281_v23 = vadd.f32 %v2142_v12, %v2141_v39  ;;  %v2149_v1 = vrot.slane %v2148_v51, 1  ;;  %v2156_v60 = vrot.slane %v2155_v30, 1  ;;  %v2162_v11 = vadd.f32 %v2161_v37, %v2160_v22 }
 0x38f   :  { %9938 = vst [vmem:[#allocation26_spill] sm:$0xff] %v8279_v14  ;;  %v2174_v63 = vadd.f32 %v2173_v2, %v2172_v16  ;;  %v2168_v7 = vrot.slane %v2167_v4, 2  ;;  %v2180_v56 = vrot.slane %v2179_v40, 4  ;;  %v2186_v24 = vsel %vm1748_vm1, %v8176_v35, 0.0 }
 0x390   :  { %9939 = vst [vmem:[#allocation27_spill] sm:$0xff] %v8281_v23  ;;  %v2193_v18 = vsel %vm1748_vm1, %v8186_v31, 0.0  ;;  %v8289_v55 = vadd.f32 %v2149_v1, %v2148_v51  ;;  %v8291_v52 = vadd.f32 %v2156_v60, %v2155_v30  ;;  %v2163_v48 = vrot.slane %v2162_v11, 1 }
 0x391   :  { %v2175_v34 = vrot.slane %v2174_v63, 2  ;;  %v2169_v50 = vadd.f32 %v2168_v7, %v2167_v4  ;;  %v2181_v43 = vadd.f32 %v2180_v56, %v2179_v40  ;;  %v2187_v39 = vrot.slane %v2186_v24, 4 }
 0x392   :  { %9940 = vst [vmem:[#allocation9_spill] sm:$0xff] %v8289_v55  ;;  %9941 = vst [vmem:[#allocation13_spill] sm:$0xff] %v8291_v52  ;;  %v2194_v41 = vrot.slane %v2193_v18, 4  ;;  %v8293_v19 = vadd.f32 %v2163_v48, %v2162_v11  ;;  %v2200_v22 = vsel %vm1748_vm1, %v8189_v36, 0.0  ;;  %v2207_v35 = vsel %vm1748_vm1, %v8192_v28, 0.0 }
 0x393   :  { %v2176_v3 = vadd.f32 %v2175_v34, %v2174_v63  ;;  %v2170_v31 = vrot.slane %v2169_v50, 1  ;;  %v2182_v13 = vrot.slane %v2181_v43, 2  ;;  %v2188_v12 = vadd.f32 %v2187_v39, %v2186_v24 }
 0x394   :  { %9942 = vst [vmem:[#allocation28_spill] sm:$0xff] %v8293_v19  ;;  %v2195_v45 = vadd.f32 %v2194_v41, %v2193_v18  ;;  %v2201_v51 = vrot.slane %v2200_v22, 4  ;;  %v2208_v30 = vrot.slane %v2207_v35, 4  ;;  %v2214_v37 = vsel %vm1748_vm1, %v8212_v57, 0.0 }
 0x395   :  { %v2177_v16 = vrot.slane %v2176_v3, 1  ;;  %v8301_v2 = vadd.f32 %v2170_v31, %v2169_v50  ;;  %v2183_v4 = vadd.f32 %v2182_v13, %v2181_v43  ;;  %v2189_v40 = vrot.slane %v2188_v12, 2 }
 0x396   :  { %v2196_v1 = vrot.slane %v2195_v45, 2  ;;  %v2202_v36 = vadd.f32 %v2201_v51, %v2200_v22  ;;  %v2209_v11 = vadd.f32 %v2208_v30, %v2207_v35  ;;  %v2215_v28 = vrot.slane %v2214_v37, 4 }
 0x397   :  { %9943 = vst [vmem:[#allocation29_spill] sm:$0xff] %v8301_v2  ;;  %v8303_v60 = vadd.f32 %v2177_v16, %v2176_v3  ;;  %v2184_v63 = vrot.slane %v2183_v4, 1  ;;  %v2190_v7 = vadd.f32 %v2189_v40, %v2188_v12  ;;  %v9945_v24 = vrot.slane %v8093_v46, 1 }
 0x398   :  { %v2197_v56 = vadd.f32 %v2196_v1, %v2195_v45  ;;  %v2203_v48 = vrot.slane %v2202_v36, 2  ;;  %v2210_v34 = vrot.slane %v2209_v11, 2  ;;  %v2216_v57 = vadd.f32 %v2215_v28, %v2214_v37 }
 0x399   :  { %9944 = vst [vmem:[#allocation12_spill] sm:$0xff] %v8303_v60  ;;  %v2784_v18 = vadd.f32 %v9945_v24, %v8093_v46  ;;  %v9946_v50 = vrot.slane %v8095_v53, 2  ;;  %v8311_v39 = vadd.f32 %v2184_v63, %v2183_v4  ;;  %v2191_v41 = vrot.slane %v2190_v7, 1 }
 0x39a   :  { %v2198_v3 = vrot.slane %v2197_v56, 1  ;;  %v9948_v22 = vrot.slane %v8099_v42, 2  ;;  %v2204_v31 = vadd.f32 %v2203_v48, %v2202_v36  ;;  %v2211_v13 = vadd.f32 %v2210_v34, %v2209_v11 }
 0x39b   :  { %v2789_v43 = vadd.f32 %v9946_v50, %v8095_v53  ;;  %9947 = vst [vmem:[#allocation15_spill] sm:$0xff] %v8311_v39  ;;  %v2217_v12 = vrot.slane %v2216_v57, 2  ;;  %v8316_v46 = vadd.f32 %v2191_v41, %v2190_v7  ;;  %v2802_v30 = vrot.slane %v8111_v38, 2 }
 0x39c   :  { %v2796_v35 = vadd.f32 %v9948_v22, %v8099_v42  ;;  %v8318_v16 = vadd.f32 %v2198_v3, %v2197_v56  ;;  %v2205_v53 = vrot.slane %v2204_v31, 1  ;;  %v2212_v37 = vrot.slane %v2211_v13, 1  ;;  %v9958_v22 = vld [vmem:[#allocation75_spill] sm:$0xff] }
 0x39d   :  { %v2790_v45 = vrot.slane %v2789_v43, 1  ;;  %9949 = vst [vmem:[#allocation30_spill] sm:$0xff] %v8316_v46  ;;  %v2218_v4 = vadd.f32 %v2217_v12, %v2216_v57  ;;  %v2803_v28 = vadd.f32 %v2802_v30, %v8111_v38  ;;  %v9951_v42 = vrot.slane %v8103_v6, 4  ;;  %v9955_v57 = vld [vmem:[#allocation111_spill] sm:$0xff] }
 0x39e   :  { %9950 = vst [vmem:[#allocation31_spill] sm:$0xff] %v8318_v16  ;;  %v2797_v51 = vrot.slane %v2796_v35, 1  ;;  %v8326_v11 = vadd.f32 %v2205_v53, %v2204_v31  ;;  %v8328_v63 = vadd.f32 %v2212_v37, %v2211_v13  ;;  %5780 = vrcp.f32 %v8089_v27  ;;  %v9957_v27 = vld [vmem:[#allocation112_spill] sm:$0xff] }
 0x39f   :  { %v2791_v40 = vadd.f32 %v2790_v45, %v2789_v43  ;;  %v2808_v36 = vadd.f32 %v9951_v42, %v8103_v6  ;;  %v2219_v7 = vrot.slane %v2218_v4, 1  ;;  %v2804_v56 = vrot.slane %v2803_v28, 1  ;;  %v9956_v43 = vld [vmem:[#allocation74_spill] sm:$0xff] }
 0x3a0   :  { %v2798_v1 = vadd.f32 %v2797_v51, %v2796_v35  ;;  %9952 = vst [vmem:[#allocation16_spill] sm:$0xff] %v8326_v11  ;;  %9953 = vst [vmem:[#allocation18_spill] sm:$0xff] %v8328_v63  ;;  %5782 = vrcp.f32 %v2784_v18  ;;  %v2821_v48 = vmul.f32 %v8158_v61, %v7962_v26  ;;  %v4941_v6 = vrot.slane %v8200_v21, 7  ;;  %v9966_v11 = vld [vmem:[#allocation8_spill] sm:$0xff] }
 0x3a1   :  { %v2809_v24 = vrot.slane %v2808_v36, 2  ;;  %v8333_v38 = vadd.f32 %v2219_v7, %v2218_v4  ;;  %5784 = vrcp.f32 %v2791_v40  ;;  %v2805_v17 = vadd.f32 %v2804_v56, %v2803_v28 }
 0x3a2   :  { %5786 = vrcp.f32 %v2798_v1  ;;  %v2829_v50 = vmul.f32 %v2821_v48, %v9955_v57  ;;  %v2837_v41 = vmul.f32 %v2821_v48, %v9956_v43  ;;  %v2845_v3 = vmul.f32 %v2821_v48, %v9957_v27 }
 0x3a3   :  { %9954 = vst [vmem:[#allocation32_spill] sm:$0xff] %v8333_v38  ;;  %v2810_v34 = vadd.f32 %v2809_v24, %v2808_v36  ;;  %v2853_v18 = vmul.f32 %v2821_v48, %v9958_v22  ;;  %v4943_v26 = vsel %vm4942_vm2, %v4941_v6, %v8198_v47  ;;  %5788 = vrcp.f32 %v2805_v17  ;;  %v5779_v6 = vpop.eup %5778 }
 0x3a4   :  { %v2861_v35 = vsel %vm1748_vm1, %v2829_v50, 0.0  ;;  %v4944_v21 = vrot.slane %v8203_v20, 6  ;;  %v2917_v13 = vsel %vm1748_vm1, %v2837_v41, 0.0  ;;  %v2973_v12 = vsel %vm1748_vm1, %v2845_v3, 0.0  ;;  %v9959_v41 = vld [vmem:[#allocation104_spill] sm:$0xff] }
 0x3a5   :  { %v2811_v61 = vrot.slane %v2810_v34, 1  ;;  %v2862_v31 = vrot.slane %v2861_v35, 4  ;;  %v3029_v45 = vsel %vm1748_vm1, %v2853_v18, 0.0  ;;  %v2918_v30 = vrot.slane %v2917_v13, 4 }
 0x3a6   :  { %v2974_v53 = vrot.slane %v2973_v12, 4  ;;  %v3030_v37 = vrot.slane %v3029_v45, 4  ;;  %v4947_v47 = vrot.slane %v8219_v9, 5  ;;  %v4946_v42 = vsel %vm4945_vm3, %v4944_v21, %v4943_v26 }
 0x3a7   :  { %v2812_v51 = vadd.f32 %v2811_v61, %v2810_v34  ;;  %v2863_v4 = vadd.f32 %v2862_v31, %v2861_v35  ;;  %v2919_v40 = vadd.f32 %v2918_v30, %v2917_v13  ;;  %v4950_v36 = vrot.slane %v8221_v33, 4  ;;  %v9960_v35 = vld [vmem:[#allocation113_spill] sm:$0xff] }
 0x3a8   :  { %v2975_v1 = vadd.f32 %v2974_v53, %v2973_v12  ;;  %v3031_v20 = vadd.f32 %v3030_v37, %v3029_v45  ;;  %v4949_v48 = vsel %vm4948_vm4, %v4947_v47, %v4946_v42  ;;  %v4953_v34 = vrot.slane %v8226_v10, 3  ;;  %v9961_v45 = vld [vmem:[#allocation95_spill] sm:$0xff]  ;;  %v9962_v47 = vld [vmem:[#allocation97_spill] sm:$0xff] }
 0x3a9   :  { %5790 = vrcp.f32 %v2812_v51  ;;  %v2864_v28 = vrot.slane %v2863_v4, 2  ;;  %v2920_v7 = vrot.slane %v2919_v40, 2  ;;  %v4952_v9 = vsel %vm4951_vm5, %v4950_v36, %v4949_v48  ;;  %v9963_v42 = vld [vmem:[#allocation105_spill] sm:$0xff] }
 0x3aa   :  { %v2976_v56 = vrot.slane %v2975_v1, 2  ;;  %v3032_v24 = vrot.slane %v3031_v20, 2  ;;  %v2822_v3 = vmul.f32 %v5779_v6, %v9959_v41  ;;  %v8362_v13 = vsel %vm4954_vm6, %v4953_v34, %v4952_v9  ;;  %v9964_v41 = vld [vmem:[#allocation106_spill] sm:$0xff] }
 0x3ab   :  { %v2865_v17 = vadd.f32 %v2864_v28, %v2863_v4  ;;  %v5781_v50 = vpop.eup %5780  ;;  %v8354_v18 = vadd.f32 %v2920_v7, %v2919_v40 }
 0x3ac   :  { %v8356_v26 = vadd.f32 %v2976_v56, %v2975_v1  ;;  %v8358_v33 = vadd.f32 %v3032_v24, %v3031_v20  ;;  %v2823_v21 = vmul.f32 %v5781_v50, %v9960_v35  ;;  %v2830_v30 = vmul.f32 %v2822_v3, %v9955_v57 }
 0x3ad   :  { %v5783_v61 = vpop.eup %5782  ;;  %v2866_v31 = vrot.slane %v2865_v17, 1  ;;  %v2838_v53 = vmul.f32 %v2822_v3, %v9956_v43  ;;  %v8369_v37 = vmul.f32 %v2822_v3, %v9957_v27  ;;  %v8395_v50 = vmul.f32 %v2822_v3, %v9958_v22 }
 0x3ae   :  { %v5785_v10 = vpop.eup %5784  ;;  %v2824_v51 = vmul.f32 %v5783_v61, %v9961_v45  ;;  %v2831_v1 = vmul.f32 %v2823_v21, %v9955_v57  ;;  %v8374_v20 = vmul.f32 %v2823_v21, %v9956_v43  ;;  %v8377_v28 = vmul.f32 %v2823_v21, %v9957_v27 }
 0x3af   :  { %v5787_v4 = vpop.eup %5786  ;;  %v2825_v40 = vmul.f32 %v5785_v10, %v9962_v47 }
 0x3b0   :  { %v2826_v36 = vmul.f32 %v5787_v4, %v9963_v42  ;;  %v2832_v7 = vmul.f32 %v2824_v51, %v9955_v57  ;;  %v8382_v56 = vmul.f32 %v2824_v51, %v9956_v43  ;;  %v8385_v24 = vmul.f32 %v2824_v51, %v9957_v27  ;;  %v5789_v48 = vpop.eup %5788 }
 0x3b1   :  { %v2833_v6 = vmul.f32 %v2825_v40, %v9955_v57  ;;  %v8389_v9 = vmul.f32 %v2825_v40, %v9956_v43  ;;  %v8392_v34 = vmul.f32 %v2825_v40, %v9957_v27  ;;  %v2827_v61 = vmul.f32 %v5789_v48, %v9964_v41 }
 0x3b2   :  { %v2834_v35 = vmul.f32 %v2826_v36, %v9955_v57  ;;  %v8400_v10 = vmul.f32 %v2826_v36, %v9956_v43  ;;  %v8403_v45 = vmul.f32 %v2826_v36, %v9957_v27  ;;  %v8406_v4 = vmul.f32 %v2823_v21, %v9958_v22 }
 0x3b3   :  { %v8409_v47 = vmul.f32 %v2824_v51, %v9958_v22  ;;  %v8412_v42 = vmul.f32 %v2825_v40, %v9958_v22  ;;  %v8415_v3 = vmul.f32 %v2826_v36, %v9958_v22  ;;  %v2835_v48 = vmul.f32 %v2827_v61, %v9955_v57 }
 0x3b4   :  { %v8419_v41 = vmul.f32 %v2827_v61, %v9956_v43  ;;  %v8422_v12 = vmul.f32 %v2827_v61, %v9957_v27  ;;  %v8425_v21 = vmul.f32 %v2827_v61, %v9958_v22  ;;  %v8427_v51 = vadd.f32 %v2866_v31, %v2865_v17 }
 0x3b5   :  { %v2868_v40 = vsel %vm1748_vm1, %v2830_v30, 0.0  ;;  %v2875_v63 = vsel %vm1748_vm1, %v2831_v1, 0.0  ;;  %v2882_v36 = vsel %vm1748_vm1, %v2832_v7, 0.0  ;;  %v2889_v60 = vsel %vm1748_vm1, %v2833_v6, 0.0 }
 0x3b6   :  { %v5791_v38 = vpop.eup %5790  ;;  %9965 = vst [vmem:[#allocation33_spill] sm:$0xff] %v8427_v51  ;;  %v2869_v2 = vrot.slane %v2868_v40, 4  ;;  %v2876_v46 = vrot.slane %v2875_v63, 4  ;;  %v2883_v39 = vrot.slane %v2882_v36, 4  ;;  %v2896_v19 = vsel %vm1748_vm1, %v2834_v35, 0.0 }
 0x3b7   :  { %v2828_v16 = vmul.f32 %v5791_v38, %v9966_v11  ;;  %v2903_v61 = vsel %vm1748_vm1, %v2835_v48, 0.0  ;;  %v2922_v17 = vrot.slane %v8354_v18, 1  ;;  %v2890_v51 = vrot.slane %v2889_v60, 4 }
 0x3b8   :  { %v2870_v38 = vadd.f32 %v2869_v2, %v2868_v40  ;;  %v2877_v7 = vadd.f32 %v2876_v46, %v2875_v63  ;;  %v2884_v6 = vadd.f32 %v2883_v39, %v2882_v36  ;;  %v2897_v35 = vrot.slane %v2896_v19, 4 }
 0x3b9   :  { %v2836_v31 = vmul.f32 %v2828_v16, %v9955_v57  ;;  %v8439_v30 = vmul.f32 %v2828_v16, %v9956_v43  ;;  %v8442_v1 = vmul.f32 %v2828_v16, %v9957_v27  ;;  %v8445_v11 = vmul.f32 %v2828_v16, %v9958_v22 }
 0x3ba   :  { %v2904_v52 = vrot.slane %v2903_v61, 4  ;;  %v8449_v55 = vadd.f32 %v2922_v17, %v8354_v18  ;;  %v2871_v57 = vrot.slane %v2870_v38, 2  ;;  %v2878_v43 = vrot.slane %v2877_v7, 2 }
 0x3bb   :  { %v2910_v48 = vsel %vm1748_vm1, %v2836_v31, 0.0  ;;  %v2885_v32 = vrot.slane %v2884_v6, 2  ;;  %v2891_v23 = vadd.f32 %v2890_v51, %v2889_v60  ;;  %v2898_v27 = vadd.f32 %v2897_v35, %v2896_v19 }
 0x3bc   :  { %9967 = vst [vmem:[#allocation17_spill] sm:$0xff] %v8449_v55  ;;  %v2905_v14 = vadd.f32 %v2904_v52, %v2903_v61  ;;  %v2911_v54 = vrot.slane %v2910_v48, 4  ;;  %v2924_v16 = vsel %vm1748_vm1, %v2838_v53, 0.0  ;;  %v2872_v2 = vadd.f32 %v2871_v57, %v2870_v38 }
 0x3bd   :  { %v2879_v46 = vadd.f32 %v2878_v43, %v2877_v7  ;;  %v2886_v39 = vadd.f32 %v2885_v32, %v2884_v6  ;;  %v2892_v63 = vrot.slane %v2891_v23, 2  ;;  %v2899_v22 = vrot.slane %v2898_v27, 2 }
 0x3be   :  { %v2906_v40 = vrot.slane %v2905_v14, 2  ;;  %v2912_v36 = vadd.f32 %v2911_v54, %v2910_v48  ;;  %v2925_v31 = vrot.slane %v2924_v16, 4  ;;  %v2873_v44 = vrot.slane %v2872_v2, 1 }
 0x3bf   :  { %v2880_v18 = vrot.slane %v2879_v46, 1  ;;  %v2887_v17 = vrot.slane %v2886_v39, 1  ;;  %v2893_v55 = vadd.f32 %v2892_v63, %v2891_v23  ;;  %v2900_v59 = vadd.f32 %v2899_v22, %v2898_v27 }
 0x3c0   :  { %v2907_v58 = vadd.f32 %v2906_v40, %v2905_v14  ;;  %v2913_v60 = vrot.slane %v2912_v36, 2  ;;  %v2926_v19 = vadd.f32 %v2925_v31, %v2924_v16  ;;  %v8452_v52 = vadd.f32 %v2873_v44, %v2872_v2 }
 0x3c1   :  { %v8454_v51 = vadd.f32 %v2880_v18, %v2879_v46  ;;  %v8456_v53 = vadd.f32 %v2887_v17, %v2886_v39  ;;  %v2894_v32 = vrot.slane %v2893_v55, 1  ;;  %v2901_v61 = vrot.slane %v2900_v59, 1 }
 0x3c2   :  { %v2908_v38 = vrot.slane %v2907_v58, 1  ;;  %v2914_v7 = vadd.f32 %v2913_v60, %v2912_v36  ;;  %v2927_v54 = vrot.slane %v2926_v19, 2  ;;  %v2931_v23 = vsel %vm1748_vm1, %v8374_v20, 0.0 }
 0x3c3   :  { %v8458_v6 = vadd.f32 %v2894_v32, %v2893_v55  ;;  %v2938_v14 = vsel %vm1748_vm1, %v8382_v56, 0.0  ;;  %v2945_v44 = vsel %vm1748_vm1, %v8389_v9, 0.0  ;;  %v8466_v35 = vadd.f32 %v2901_v61, %v2900_v59 }
 0x3c4   :  { %v8468_v48 = vadd.f32 %v2908_v38, %v2907_v58  ;;  %v2915_v57 = vrot.slane %v2914_v7, 1  ;;  %v2928_v43 = vadd.f32 %v2927_v54, %v2926_v19  ;;  %v2932_v27 = vrot.slane %v2931_v23, 4 }
 0x3c5   :  { %v2939_v16 = vrot.slane %v2938_v14, 4  ;;  %v2946_v2 = vrot.slane %v2945_v44, 4  ;;  %v2952_v55 = vsel %vm1748_vm1, %v8400_v10, 0.0  ;;  %v2959_v56 = vsel %vm1748_vm1, %v8419_v41, 0.0 }
 0x3c6   :  { %v8472_v46 = vadd.f32 %v2915_v57, %v2914_v7  ;;  %v2929_v20 = vrot.slane %v2928_v43, 1  ;;  %v2953_v39 = vrot.slane %v2952_v55, 4  ;;  %v2933_v9 = vadd.f32 %v2932_v27, %v2931_v23 }
 0x3c7   :  { %v2940_v59 = vadd.f32 %v2939_v16, %v2938_v14  ;;  %v2947_v63 = vadd.f32 %v2946_v2, %v2945_v44  ;;  %v2960_v58 = vrot.slane %v2959_v56, 4  ;;  %v2966_v36 = vsel %vm1748_vm1, %v8439_v30, 0.0 }
 0x3c8   :  { %v8476_v22 = vadd.f32 %v2929_v20, %v2928_v43  ;;  %v2954_v40 = vadd.f32 %v2953_v39, %v2952_v55  ;;  %v2978_v31 = vrot.slane %v8356_v26, 1  ;;  %v2934_v10 = vrot.slane %v2933_v9, 2 }
 0x3c9   :  { %v2941_v18 = vrot.slane %v2940_v59, 2  ;;  %v2948_v17 = vrot.slane %v2947_v63, 2  ;;  %v2961_v60 = vadd.f32 %v2960_v58, %v2959_v56  ;;  %v2967_v32 = vrot.slane %v2966_v36, 4 }
 0x3ca   :  { %v2955_v19 = vrot.slane %v2954_v40, 2  ;;  %v8482_v41 = vadd.f32 %v2978_v31, %v8356_v26  ;;  %v2980_v61 = vsel %vm1748_vm1, %v8369_v37, 0.0  ;;  %v2935_v38 = vadd.f32 %v2934_v10, %v2933_v9 }
 0x3cb   :  { %v2942_v7 = vadd.f32 %v2941_v18, %v2940_v59  ;;  %v2949_v54 = vadd.f32 %v2948_v17, %v2947_v63  ;;  %v2962_v23 = vrot.slane %v2961_v60, 2  ;;  %v2968_v30 = vadd.f32 %v2967_v32, %v2966_v36 }
 0x3cc   :  { %v2956_v14 = vadd.f32 %v2955_v19, %v2954_v40  ;;  %v2981_v44 = vrot.slane %v2980_v61, 4  ;;  %v2987_v57 = vsel %vm1748_vm1, %v8377_v28, 0.0  ;;  %v2936_v43 = vrot.slane %v2935_v38, 1 }
 0x3cd   :  { %v2943_v27 = vrot.slane %v2942_v7, 1  ;;  %v2950_v16 = vrot.slane %v2949_v54, 1  ;;  %v2963_v2 = vadd.f32 %v2962_v23, %v2961_v60  ;;  %v2969_v26 = vrot.slane %v2968_v30, 2 }
 0x3ce   :  { %v2957_v55 = vrot.slane %v2956_v14, 1  ;;  %v2982_v20 = vadd.f32 %v2981_v44, %v2980_v61  ;;  %v2988_v39 = vrot.slane %v2987_v57, 4  ;;  %v8488_v56 = vadd.f32 %v2936_v43, %v2935_v38 }
 0x3cf   :  { %v8490_v37 = vadd.f32 %v2943_v27, %v2942_v7  ;;  %v8492_v9 = vadd.f32 %v2950_v16, %v2949_v54  ;;  %v2964_v59 = vrot.slane %v2963_v2, 1  ;;  %v2970_v58 = vadd.f32 %v2969_v26, %v2968_v30 }
 0x3d0   :  { %v8494_v63 = vadd.f32 %v2957_v55, %v2956_v14  ;;  %v2983_v40 = vrot.slane %v2982_v20, 2  ;;  %v2989_v28 = vadd.f32 %v2988_v39, %v2987_v57  ;;  %v2994_v31 = vsel %vm1748_vm1, %v8385_v24, 0.0 }
 0x3d1   :  { %v8496_v36 = vadd.f32 %v2964_v59, %v2963_v2  ;;  %v3001_v10 = vsel %vm1748_vm1, %v8392_v34, 0.0  ;;  %v3008_v18 = vsel %vm1748_vm1, %v8403_v45, 0.0  ;;  %v2971_v17 = vrot.slane %v2970_v58, 1 }
 0x3d2   :  { %v2984_v60 = vadd.f32 %v2983_v40, %v2982_v20  ;;  %v2990_v19 = vrot.slane %v2989_v28, 2  ;;  %v2995_v32 = vrot.slane %v2994_v31, 4  ;;  %v3002_v61 = vrot.slane %v3001_v10, 4 }
 0x3d3   :  { %v3009_v38 = vrot.slane %v3008_v18, 4  ;;  %v3015_v7 = vsel %vm1748_vm1, %v8422_v12, 0.0  ;;  %v3022_v54 = vsel %vm1748_vm1, %v8442_v1, 0.0  ;;  %v8508_v23 = vadd.f32 %v2971_v17, %v2970_v58 }
 0x3d4   :  { %v2985_v24 = vrot.slane %v2984_v60, 1  ;;  %v2991_v14 = vadd.f32 %v2990_v19, %v2989_v28  ;;  %v2996_v34 = vadd.f32 %v2995_v32, %v2994_v31  ;;  %v3003_v30 = vadd.f32 %v3002_v61, %v3001_v10 }
 0x3d5   :  { %v3010_v44 = vadd.f32 %v3009_v38, %v3008_v18  ;;  %v3016_v45 = vrot.slane %v3015_v7, 4  ;;  %v3023_v57 = vrot.slane %v3022_v54, 4  ;;  %v3034_v2 = vrot.slane %v8358_v33, 1 }
 0x3d6   :  { %v8510_v43 = vadd.f32 %v2985_v24, %v2984_v60  ;;  %v2992_v27 = vrot.slane %v2991_v14, 1  ;;  %v2997_v16 = vrot.slane %v2996_v34, 2  ;;  %v3004_v55 = vrot.slane %v3003_v30, 2 }
 0x3d7   :  { %v3011_v12 = vrot.slane %v3010_v44, 2  ;;  %v3017_v26 = vadd.f32 %v3016_v45, %v3015_v7  ;;  %v3024_v20 = vadd.f32 %v3023_v57, %v3022_v54  ;;  %v8516_v59 = vadd.f32 %v3034_v2, %v8358_v33 }
 0x3d8   :  { %v8513_v1 = vadd.f32 %v2992_v27, %v2991_v14  ;;  %v2998_v39 = vadd.f32 %v2997_v16, %v2996_v34  ;;  %v3036_v58 = vsel %vm1748_vm1, %v8395_v50, 0.0  ;;  %v3005_v40 = vadd.f32 %v3004_v55, %v3003_v30 }
 0x3d9   :  { %v3012_v28 = vadd.f32 %v3011_v12, %v3010_v44  ;;  %v3018_v31 = vrot.slane %v3017_v26, 2  ;;  %v3025_v10 = vrot.slane %v3024_v20, 2  ;;  %v3037_v17 = vrot.slane %v3036_v58, 4 }
 0x3da   :  { %v2999_v18 = vrot.slane %v2998_v39, 1  ;;  %v3043_v60 = vsel %vm1748_vm1, %v8406_v4, 0.0  ;;  %v3050_v19 = vsel %vm1748_vm1, %v8409_v47, 0.0  ;;  %v3006_v32 = vrot.slane %v3005_v40, 1 }
 0x3db   :  { %v3013_v61 = vrot.slane %v3012_v28, 1  ;;  %v3019_v38 = vadd.f32 %v3018_v31, %v3017_v26  ;;  %v3026_v33 = vadd.f32 %v3025_v10, %v3024_v20  ;;  %v3038_v54 = vadd.f32 %v3037_v17, %v3036_v58 }
 0x3dc   :  { %v8524_v7 = vadd.f32 %v2999_v18, %v2998_v39  ;;  %v3044_v50 = vrot.slane %v3043_v60, 4  ;;  %v3051_v24 = vrot.slane %v3050_v19, 4  ;;  %v8526_v14 = vadd.f32 %v3006_v32, %v3005_v40 }
 0x3dd   :  { %v8528_v34 = vadd.f32 %v3013_v61, %v3012_v28  ;;  %v3020_v30 = vrot.slane %v3019_v38, 1  ;;  %v3027_v44 = vrot.slane %v3026_v33, 1  ;;  %v3039_v45 = vrot.slane %v3038_v54, 2 }
 0x3de   :  { %v3045_v4 = vadd.f32 %v3044_v50, %v3043_v60  ;;  %v3052_v57 = vadd.f32 %v3051_v24, %v3050_v19  ;;  %v3057_v47 = vsel %vm1748_vm1, %v8412_v42, 0.0  ;;  %v3064_v55 = vsel %vm1748_vm1, %v8415_v3, 0.0 }
 0x3df   :  { %v8532_v27 = vadd.f32 %v3020_v30, %v3019_v38  ;;  %v8534_v16 = vadd.f32 %v3027_v44, %v3026_v33  ;;  %v3058_v2 = vrot.slane %v3057_v47, 4  ;;  %v3040_v12 = vadd.f32 %v3039_v45, %v3038_v54 }
 0x3e0   :  { %v3046_v26 = vrot.slane %v3045_v4, 2  ;;  %v3053_v20 = vrot.slane %v3052_v57, 2  ;;  %v3065_v39 = vrot.slane %v3064_v55, 4  ;;  %v3071_v40 = vsel %vm1748_vm1, %v8425_v21, 0.0 }
 0x3e1   :  { %v3059_v58 = vadd.f32 %v3058_v2, %v3057_v47  ;;  %v3078_v28 = vsel %vm1748_vm1, %v8445_v11, 0.0  ;;  %v3041_v42 = vrot.slane %v3040_v12, 1  ;;  %v3072_v60 = vrot.slane %v3071_v40, 4 }
 0x3e2   :  { %v3047_v31 = vadd.f32 %v3046_v26, %v3045_v4  ;;  %v3054_v10 = vadd.f32 %v3053_v20, %v3052_v57  ;;  %v3066_v18 = vadd.f32 %v3065_v39, %v3064_v55  ;;  %v3079_v19 = vrot.slane %v3078_v28, 4 }
 0x3e3   :  { %v3060_v17 = vrot.slane %v3059_v58, 2  ;;  %v9968_v3 = vrot.slane %v8230_v49, 2  ;;  %v8546_v61 = vadd.f32 %v3041_v42, %v3040_v12  ;;  %v3073_v11 = vadd.f32 %v3072_v60, %v3071_v40  ;;  %v9969_v42 = vld [vmem:[#allocation11_spill] sm:$0xff]  ;;  %v9971_v60 = vld [vmem:[#allocation10_spill] sm:$0xff] }
 0x3e4   :  { %v3048_v38 = vrot.slane %v3047_v31, 1  ;;  %v3055_v21 = vrot.slane %v3054_v10, 1  ;;  %v3067_v33 = vrot.slane %v3066_v18, 2  ;;  %v3080_v50 = vadd.f32 %v3079_v19, %v3078_v28 }
 0x3e5   :  { %v4958_v32 = vsel %vm4957_vm7, %v9968_v3, %v8362_v13  ;;  %v3061_v54 = vadd.f32 %v3060_v17, %v3059_v58  ;;  %v4959_v24 = vrot.slane %v8243_v15, 1  ;;  %v3074_v49 = vrot.slane %v3073_v11, 2 }
 0x3e6   :  { %v8549_v30 = vadd.f32 %v3048_v38, %v3047_v31  ;;  %v8551_v44 = vadd.f32 %v3055_v21, %v3054_v10  ;;  %v3068_v45 = vadd.f32 %v3067_v33, %v3066_v18  ;;  %v3081_v57 = vrot.slane %v3080_v50, 2  ;;  %v9974_v33 = vld [vmem:[#allocation27_spill] sm:$0xff] }
 0x3e7   :  { %v3062_v4 = vrot.slane %v3061_v54, 1  ;;  %v8554_v13 = vsel %vm4960_vm8, %v4959_v24, %v4958_v32  ;;  %v4962_v2 = vrot.slane %v8237_v25, 7  ;;  %v4964_v55 = vrot.slane %v8239_v8, 6  ;;  %v9973_v32 = vld [vmem:[#allocation26_spill] sm:$0xff] }
 0x3e8   :  { %v3069_v47 = vrot.slane %v3068_v45, 1  ;;  %v4966_v12 = vrot.slane %v8247_v5, 5  ;;  %v3075_v26 = vadd.f32 %v3074_v49, %v3073_v11  ;;  %v3082_v20 = vadd.f32 %v3081_v57, %v3080_v50  ;;  %v9970_v5 = vld [vmem:[#allocation24_spill] sm:$0xff]  ;;  %v9975_v50 = vld [vmem:[#allocation25_spill] sm:$0xff] }
 0x3e9   :  { %v8559_v15 = vadd.f32 %v3062_v4, %v3061_v54  ;;  %v4968_v39 = vrot.slane %v8249_v0, 4  ;;  %v4963_v40 = vsel %vm4942_vm2, %v4962_v2, %v8215_v62  ;;  %v4970_v28 = vrot.slane %v8257_v29, 3  ;;  %v9972_v0 = vld [vmem:[#allocation14_spill] sm:$0xff]  ;;  %v9977_v49 = vld [vmem:[#allocation13_spill] sm:$0xff] }
 0x3ea   :  { %v8562_v58 = vadd.f32 %v3069_v47, %v3068_v45  ;;  %v4972_v31 = vrot.slane %v9969_v42, 2  ;;  %v3076_v25 = vrot.slane %v3075_v26, 1  ;;  %v3083_v10 = vrot.slane %v3082_v20, 1  ;;  %v9976_v45 = vld [vmem:[#allocation9_spill] sm:$0xff] }
 0x3eb   :  { %v4965_v8 = vsel %vm4945_vm3, %v4964_v55, %v4963_v40  ;;  %v4974_v18 = vrot.slane %v9970_v5, 1  ;;  %v4976_v19 = vrot.slane %v9971_v60, 7  ;;  %v4978_v3 = vrot.slane %v9972_v0, 6  ;;  %v9978_v55 = vld [vmem:[#allocation28_spill] sm:$0xff]  ;;  %v9982_v5 = vld [vmem:[#allocation29_spill] sm:$0xff] }
 0x3ec   :  { %v4967_v17 = vsel %vm4948_vm4, %v4966_v12, %v4965_v8  ;;  %v4980_v38 = vrot.slane %v9973_v32, 5  ;;  %v8574_v21 = vadd.f32 %v3076_v25, %v3075_v26  ;;  %v8576_v62 = vadd.f32 %v3083_v10, %v3082_v20  ;;  %v9979_v26 = vld [vmem:[#allocation12_spill] sm:$0xff]  ;;  %v9981_v25 = vld [vmem:[#allocation30_spill] sm:$0xff] }
 0x3ed   :  { %v4969_v29 = vsel %vm4951_vm5, %v4968_v39, %v4967_v17  ;;  %v4982_v54 = vrot.slane %v9974_v33, 4  ;;  %v4977_v24 = vsel %vm4942_vm2, %v4976_v19, %v9975_v50  ;;  %v4984_v4 = vrot.slane %v9976_v45, 3  ;;  %v9983_v17 = vld [vmem:[#allocation31_spill] sm:$0xff]  ;;  %v9984_v19 = vld [vmem:[#allocation16_spill] sm:$0xff]  ;;  %v9985_v32 = vld [vmem:[#allocation18_spill] sm:$0xff] }
 0x3ee   :  { %v4971_v11 = vsel %vm4954_vm6, %v4970_v28, %v4969_v29  ;;  %v4986_v57 = vrot.slane %v9977_v49, 2  ;;  %v4979_v2 = vsel %vm4945_vm3, %v4978_v3, %v4977_v24  ;;  %v4988_v12 = vrot.slane %v9978_v55, 1  ;;  %v9980_v28 = vld [vmem:[#allocation15_spill] sm:$0xff]  ;;  %v9987_v55 = vld [vmem:[#allocation33_spill] sm:$0xff] }
 0x3ef   :  { %v4973_v47 = vsel %vm4957_vm7, %v4972_v31, %v4971_v11  ;;  %v4990_v20 = vrot.slane %v9979_v26, 7  ;;  %v4981_v40 = vsel %vm4948_vm4, %v4980_v38, %v4979_v2  ;;  %v4992_v42 = vrot.slane %v9980_v28, 6  ;;  %v9986_v38 = vld [vmem:[#allocation32_spill] sm:$0xff] }
 0x3f0   :  { %v8590_v39 = vsel %vm4960_vm8, %v4974_v18, %v4973_v47  ;;  %v4994_v10 = vrot.slane %v9981_v25, 5  ;;  %v4983_v8 = vsel %vm4951_vm5, %v4982_v54, %v4981_v40  ;;  %v4996_v60 = vrot.slane %v9983_v17, 4  ;;  %v9988_v25 = vld [vmem:[#allocation17_spill] sm:$0xff] }
 0x3f1   :  { %v4991_v31 = vsel %vm4942_vm2, %v4990_v20, %v9982_v5  ;;  %v4998_v0 = vrot.slane %v9984_v19, 3  ;;  %v4985_v3 = vsel %vm4954_vm6, %v4984_v4, %v4983_v8  ;;  %v5000_v29 = vrot.slane %v9985_v32, 2 }
 0x3f2   :  { %v4993_v18 = vsel %vm4945_vm3, %v4992_v42, %v4991_v31  ;;  %v5002_v33 = vrot.slane %v9986_v38, 1  ;;  %v4987_v11 = vsel %vm4957_vm7, %v4986_v57, %v4985_v3  ;;  %v5004_v54 = vrot.slane %v8452_v52, 7 }
 0x3f3   :  { %v4995_v50 = vsel %vm4948_vm4, %v4994_v10, %v4993_v18  ;;  %v5006_v24 = vrot.slane %v8454_v51, 6  ;;  %v8609_v45 = vsel %vm4960_vm8, %v4988_v12, %v4987_v11  ;;  %v5008_v4 = vrot.slane %v8456_v53, 5 }
 0x3f4   :  { %v4997_v49 = vsel %vm4951_vm5, %v4996_v60, %v4995_v50  ;;  %v5010_v47 = vrot.slane %v8458_v6, 4  ;;  %v5005_v57 = vsel %vm4942_vm2, %v5004_v54, %v9987_v55  ;;  %v5012_v26 = vrot.slane %v8466_v35, 3 }
 0x3f5   :  { %v4999_v2 = vsel %vm4954_vm6, %v4998_v0, %v4997_v49  ;;  %v5014_v52 = vrot.slane %v8468_v48, 2  ;;  %v5007_v12 = vsel %vm4945_vm3, %v5006_v24, %v5005_v57  ;;  %v5016_v20 = vrot.slane %v8472_v46, 1 }
 0x3f6   :  { %v5001_v51 = vsel %vm4957_vm7, %v5000_v29, %v4999_v2  ;;  %v5018_v40 = vrot.slane %v8476_v22, 7  ;;  %v5009_v6 = vsel %vm4948_vm4, %v5008_v4, %v5007_v12  ;;  %v5020_v28 = vrot.slane %v8488_v56, 6  ;;  %v9989_v4 = vld [vmem:[#allocation6_spill] sm:$0xff]  ;;  %v9995_v12 = vld [vmem:[#allocation84_spill] sm:$0xff] }
 0x3f7   :  { %v5003_v53 = vsel %vm4960_vm8, %v5002_v33, %v5001_v51  ;;  %v5022_v42 = vrot.slane %v8490_v37, 5  ;;  %v5011_v35 = vsel %vm4951_vm5, %v5010_v47, %v5009_v6  ;;  %v5024_v10 = vrot.slane %v8492_v9, 4 }
 0x3f8   :  { %v5019_v48 = vsel %vm4942_vm2, %v5018_v40, %v9988_v25  ;;  %v5026_v8 = vrot.slane %v8494_v63, 3  ;;  %v5013_v46 = vsel %vm4954_vm6, %v5012_v26, %v5011_v35  ;;  %v5028_v5 = vrot.slane %v8496_v36, 2  ;;  %v9999_v25 = vld [vmem:[#allocation7_spill] sm:$0xff] }
 0x3f9   :  { %v5021_v22 = vsel %vm4945_vm3, %v5020_v28, %v5019_v48  ;;  %v5030_v31 = vrot.slane %v8508_v23, 1  ;;  %v5015_v56 = vsel %vm4957_vm7, %v5014_v52, %v5013_v46  ;;  %v5032_v17 = vrot.slane %v8510_v43, 7  ;;  %v10002_v46 = vld [vmem:[#allocation82_spill] sm:$0xff] }
 0x3fa   :  { %v5023_v37 = vsel %vm4948_vm4, %v5022_v42, %v5021_v22  ;;  %v5034_v60 = vrot.slane %v8513_v1, 6  ;;  %v5017_v9 = vsel %vm4960_vm8, %v5016_v20, %v5015_v56  ;;  %v5036_v19 = vrot.slane %v8524_v7, 5  ;;  %v9996_v20 = vld [vmem:[#allocation76_spill] sm:$0xff] }
 0x3fb   :  { %v5025_v63 = vsel %vm4951_vm5, %v5024_v10, %v5023_v37  ;;  %v5038_v0 = vrot.slane %v8526_v14, 4  ;;  %v5033_v23 = vsel %vm4942_vm2, %v5032_v17, %v8482_v41  ;;  %v5040_v3 = vrot.slane %v8528_v34, 3  ;;  %v10001_v10 = vld [vmem:[#allocation88_spill] sm:$0xff]  ;;  %v10006_v37 = vld [vmem:[#allocation79_spill] sm:$0xff] }
 0x3fc   :  { %v5027_v36 = vsel %vm4954_vm6, %v5026_v8, %v5025_v63  ;;  %v5042_v18 = vrot.slane %v8532_v27, 2  ;;  %v5035_v1 = vsel %vm4945_vm3, %v5034_v60, %v5033_v23  ;;  %v5044_v32 = vrot.slane %v8534_v16, 1 }
 0x3fd   :  { %v5029_v43 = vsel %vm4957_vm7, %v5028_v5, %v5027_v36  ;;  %v5046_v29 = vrot.slane %v8546_v61, 7  ;;  %v5037_v14 = vsel %vm4948_vm4, %v5036_v19, %v5035_v1  ;;  %v5048_v38 = vrot.slane %v8549_v30, 6  ;;  %v10008_v19 = vld [vmem:[#allocation77_spill] sm:$0xff]  ;;  %v10009_v36 = vld [vmem:[#allocation87_spill] sm:$0xff] }
 0x3fe   :  { %v5031_v7 = vsel %vm4960_vm8, %v5030_v31, %v5029_v43  ;;  %v5050_v41 = vrot.slane %v8551_v44, 5  ;;  %v5039_v34 = vsel %vm4951_vm5, %v5038_v0, %v5037_v14  ;;  %v5052_v33 = vrot.slane %v8559_v15, 4  ;;  %v10010_v14 = vld [vmem:[#allocation80_spill] sm:$0xff] }
 0x3ff   :  { %v5047_v27 = vsel %vm4942_vm2, %v5046_v29, %v8516_v59  ;;  %v5054_v11 = vrot.slane %v8562_v58, 3  ;;  %v5041_v16 = vsel %vm4954_vm6, %v5040_v3, %v5039_v34  ;;  %v5056_v50 = vrot.slane %v8574_v21, 2 }
 0x400   :  { %v5049_v61 = vsel %vm4945_vm3, %v5048_v38, %v5047_v27  ;;  %v5058_v54 = vrot.slane %v8576_v62, 1  ;;  %v5043_v30 = vsel %vm4957_vm7, %v5042_v18, %v5041_v16  ;;  %v5189_v24 = vcombine.high %v8554_v13, %v8609_v45 }
 0x401   :  { %v5051_v44 = vsel %vm4948_vm4, %v5050_v41, %v5049_v61  ;;  %v5205_v59 = vcombine.high %v8590_v39, %v5003_v53  ;;  %v5045_v15 = vsel %vm4960_vm8, %v5044_v32, %v5043_v30  ;;  %v5188_v49 = vcombine.low %v8554_v13, %v8609_v45 }
 0x402   :  { %v5053_v58 = vsel %vm4951_vm5, %v5052_v33, %v5051_v44  ;;  %v5204_v21 = vcombine.low %v8590_v39, %v5003_v53  ;;  %v8678_v47 = vrot.slane %v5189_v24, %v9989_v4  ;;  %v5221_v55 = vcombine.high %v5017_v9, %v5045_v15 }
 0x403   :  { %v5055_v62 = vsel %vm4954_vm6, %v5054_v11, %v5053_v58  ;;  %v8681_v2 = vrot.slane %v5205_v59, %v9989_v4  ;;  %v8685_v26 = vrot.slane %v5188_v49, %v9989_v4  ;;  %v5220_v13 = vcombine.low %v5017_v9, %v5045_v15  ;;  %v10013_v58 = vld [vmem:[#allocation89_spill] sm:$0xff] }
 0x404   :  { %9990 = vst [vmem:[#allocation19_spill] sm:$0xff] %v8678_v47  ;;  %v5057_v57 = vsel %vm4957_vm7, %v5056_v50, %v5055_v62  ;;  %v8688_v52 = vrot.slane %v5204_v21, %v9989_v4  ;;  %v8692_v45 = vrot.slane %v5221_v55, %v9989_v4  ;;  %v9997_v40 = vsub.f32 %v9995_v12, %v9996_v20 }
 0x405   :  { %9991 = vst [vmem:[#allocation34_spill] sm:$0xff] %v8681_v2  ;;  %9992 = vst [vmem:[#allocation35_spill] sm:$0xff] %v8685_v26  ;;  %v5059_v39 = vsel %vm4960_vm8, %v5058_v54, %v5057_v57  ;;  %v5268_v51 = vcombine.low %v8678_v47, %v8681_v2  ;;  %v8700_v28 = vrot.slane %v5220_v13, %v9989_v4  ;;  %v3624_v8 = vrot.slane %v10001_v10, 2 }
 0x406   :  { %9993 = vst [vmem:[#allocation20_spill] sm:$0xff] %v8688_v52  ;;  %9994 = vst [vmem:[#allocation22_spill] sm:$0xff] %v8692_v45  ;;  %v3619_v53 = vmul.f32 1.442695, %v9997_v40  ;;  %v5237_v6 = vcombine.high %v5031_v7, %v5059_v39  ;;  %v5236_v42 = vcombine.low %v5031_v7, %v5059_v39  ;;  %v5253_v35 = vcombine.high %v8685_v26, %v8688_v52  ;;  %v10014_v39 = vld [vmem:[#allocation90_spill] sm:$0xff]  ;;  %v10017_v40 = vld [vmem:[#allocation101_spill] sm:$0xff] }
 0x407   :  { %9998 = vst [vmem:[#allocation36_spill] sm:$0xff] %v8700_v28  ;;  %v8705_v48 = vrot.slane %v5268_v51, %v9999_v25  ;;  %v3631_v22 = vrot.slane %v10002_v46, 2  ;;  %v10007_v17 = vrot.slane %v10006_v37, 4  ;;  %v3625_v9 = vadd.f32 %v3624_v8, %v10001_v10  ;;  %v10015_v51 = vld [vmem:[#allocation81_spill] sm:$0xff] }
 0x408   :  { %5792 = vpow2.f32 %v3619_v53  ;;  %v8710_v5 = vrot.slane %v5237_v6, %v9989_v4  ;;  %v8713_v31 = vrot.slane %v5236_v42, %v9989_v4  ;;  %v8716_v56 = vrot.slane %v5253_v35, %v9999_v25  ;;  %v10018_v35 = vld [vmem:[#allocation94_spill] sm:$0xff] }
 0x409   :  { %10000 = vst [vmem:[#allocation37_spill] sm:$0xff] %v8705_v48  ;;  %v3637_v60 = vadd.f32 %v10007_v17, %v10006_v37  ;;  %v3632_v63 = vadd.f32 %v3631_v22, %v10002_v46  ;;  %v3642_v0 = vsel %vm1748_vm1, %v10008_v19, 0.0  ;;  %v3649_v23 = vsel %vm1748_vm1, %v10009_v36, 0.0 }
 0x40a   :  { %10003 = vst [vmem:[#allocation21_spill] sm:$0xff] %v8710_v5  ;;  %10004 = vst [vmem:[#allocation23_spill] sm:$0xff] %v8713_v31  ;;  %v5300_v3 = vcombine.low %v8692_v45, %v8710_v5  ;;  %v5285_v18 = vcombine.high %v8700_v28, %v8713_v31  ;;  %v3643_v1 = vrot.slane %v3642_v0, 4  ;;  %v3626_v32 = vrot.slane %v3625_v9, 1 }
 0x40b   :  { %10005 = vst [vmem:[#allocation40_spill] sm:$0xff] %v8716_v56  ;;  %v3638_v43 = vrot.slane %v3637_v60, 2  ;;  %v3633_v29 = vrot.slane %v3632_v63, 1  ;;  %v3650_v7 = vrot.slane %v3649_v23, 4  ;;  %v3656_v38 = vsel %vm1748_vm1, %v10010_v14, 0.0 }
 0x40c   :  { %v8734_v41 = vrot.slane %v5300_v3, %v9999_v25  ;;  %v8737_v34 = vrot.slane %v5285_v18, %v9999_v25  ;;  %v3644_v33 = vadd.f32 %v3643_v1, %v3642_v0  ;;  %v3627_v11 = vadd.f32 %v3626_v32, %v3625_v9 }
 0x40d   :  { %v3639_v27 = vadd.f32 %v3638_v43, %v3637_v60  ;;  %v3634_v16 = vadd.f32 %v3633_v29, %v3632_v63  ;;  %v3651_v61 = vadd.f32 %v3650_v7, %v3649_v23  ;;  %v3657_v50 = vrot.slane %v3656_v38, 4  ;;  %v10019_v63 = vld [vmem:[#allocation99_spill] sm:$0xff] }
 0x40e   :  { %10011 = vst [vmem:[#allocation45_spill] sm:$0xff] %v8734_v41  ;;  %10012 = vst [vmem:[#allocation38_spill] sm:$0xff] %v8737_v34  ;;  %v5321_v54 = vcombine.high %v8705_v48, %v8734_v41  ;;  %v5318_v30 = vcombine.low %v8716_v56, %v8737_v34  ;;  %v3645_v24 = vrot.slane %v3644_v33, 2  ;;  %v3663_v49 = vsel %vm1748_vm1, %v10013_v58, 0.0 }
 0x40f   :  { %v3640_v44 = vrot.slane %v3639_v27, 1  ;;  %v3652_v59 = vrot.slane %v3651_v61, 2  ;;  %v3658_v15 = vadd.f32 %v3657_v50, %v3656_v38  ;;  %5794 = vrcp.f32 %v3627_v11  ;;  %v10021_v50 = vld [vmem:[#allocation91_spill] sm:$0xff] }
 0x410   :  { %5486 = vrot.lane.b32.xlu0 %v5321_v54, %s5835_s10  ;;  %5470 = vrot.lane.b32.xlu1 %v5318_v30, %s5833_s5  ;;  %v3646_v62 = vadd.f32 %v3645_v24, %v3644_v33  ;;  %v3664_v55 = vrot.slane %v3663_v49, 4  ;;  %5796 = vrcp.f32 %v3634_v16  ;;  %v10016_v12 = vsub.f32 %v10014_v39, %v10015_v51  ;;  %v10022_v24 = vld [vmem:[#allocation100_spill] sm:$0xff]  ;;  %v10024_v51 = vld [vmem:[#allocation103_spill] sm:$0xff] }
 0x411   :  { %v3641_v21 = vadd.f32 %v3640_v44, %v3639_v27  ;;  %v3653_v57 = vadd.f32 %v3652_v59, %v3651_v61  ;;  %v3659_v13 = vrot.slane %v3658_v15, 2  ;;  %v4488_v53 = vrot.slane %v10017_v40, 2 }
 0x412   :  { %v4483_v20 = vmul.f32 1.442695, %v10016_v12  ;;  %v3647_v6 = vrot.slane %v3646_v62, 1  ;;  %v3665_v42 = vadd.f32 %v3664_v55, %v3663_v49  ;;  %v4495_v10 = vrot.slane %v10018_v35, 2 }
 0x413   :  { %5798 = vrcp.f32 %v3641_v21  ;;  %v3654_v8 = vrot.slane %v3653_v57, 1  ;;  %v3660_v46 = vadd.f32 %v3659_v13, %v3658_v15  ;;  %v4489_v22 = vadd.f32 %v4488_v53, %v10017_v40 }
 0x414   :  { %5800 = vpow2.f32 %v4483_v20  ;;  %v3648_v17 = vadd.f32 %v3647_v6, %v3646_v62  ;;  %v3666_v60 = vrot.slane %v3665_v42, 2  ;;  %v4496_v9 = vadd.f32 %v4495_v10, %v10018_v35  ;;  %v10023_v62 = vld [vmem:[#allocation102_spill] sm:$0xff] }
 0x415   :  { %v8753_v37 = vpop.eup %5792  ;;  %v10020_v0 = vrot.slane %v10019_v63, 4  ;;  %v3655_v3 = vadd.f32 %v3654_v8, %v3653_v57  ;;  %v3661_v18 = vrot.slane %v3660_v46, 1  ;;  %v4490_v1 = vrot.slane %v4489_v22, 1  ;;  %v10025_v35 = vld [vmem:[#allocation78_spill] sm:$0xff] }
 0x416   :  { %v3670_v43 = vsel %vm1748_vm1, %v8753_v37, 0.0  ;;  %v3667_v32 = vadd.f32 %v3666_v60, %v3665_v42  ;;  %5802 = vrcp.f32 %v3648_v17  ;;  %v4497_v7 = vrot.slane %v4496_v9, 1  ;;  %v10026_v60 = vld [vmem:[#allocation85_spill] sm:$0xff] }
 0x417   :  { %v4501_v23 = vadd.f32 %v10020_v0, %v10019_v63  ;;  %v3671_v29 = vrot.slane %v3670_v43, 4  ;;  %v3662_v38 = vadd.f32 %v3661_v18, %v3660_v46  ;;  %5804 = vrcp.f32 %v3655_v3  ;;  %v10027_v3 = vld [vmem:[#allocation96_spill] sm:$0xff] }
 0x418   :  { %v8761_v27 = vadd.f32 %v4490_v1, %v4489_v22  ;;  %v3668_v11 = vrot.slane %v3667_v32, 1  ;;  %v8763_v61 = vadd.f32 %v4497_v7, %v4496_v9  ;;  %v4506_v54 = vsel %vm1748_vm1, %v10021_v50, 0.0  ;;  %v10030_v7 = vld [vmem:[#allocation108_spill] sm:$0xff] }
 0x419   :  { %v4502_v33 = vrot.slane %v4501_v23, 2  ;;  %v3672_v16 = vadd.f32 %v3671_v29, %v3670_v43  ;;  %5806 = vrcp.f32 %v3662_v38  ;;  %v4507_v44 = vrot.slane %v4506_v54, 4  ;;  %v10028_v43 = vld [vmem:[#allocation98_spill] sm:$0xff] }
 0x41a   :  { %v4513_v59 = vsel %vm1748_vm1, %v10022_v24, 0.0  ;;  %v3669_v15 = vadd.f32 %v3668_v11, %v3667_v32  ;;  %v4520_v55 = vsel %vm1748_vm1, %v10023_v62, 0.0  ;;  %v4527_v12 = vsel %vm1748_vm1, %v10024_v51, 0.0  ;;  %v10029_v32 = vld [vmem:[#allocation107_spill] sm:$0xff] }
 0x41b   :  { %v4503_v30 = vadd.f32 %v4502_v33, %v4501_v23  ;;  %v3673_v49 = vrot.slane %v3672_v16, 2  ;;  %v4514_v21 = vrot.slane %v4513_v59, 4  ;;  %v8771_v13 = vadd.f32 %v4507_v44, %v4506_v54 }
 0x41c   :  { %v4521_v39 = vrot.slane %v4520_v55, 4  ;;  %v5795_v20 = vpop.eup %5794  ;;  %5808 = vrcp.f32 %v3669_v15  ;;  %v4528_v6 = vrot.slane %v4527_v12, 4 }
 0x41d   :  { %v4504_v57 = vrot.slane %v4503_v30, 1  ;;  %v3674_v40 = vadd.f32 %v3673_v49, %v3672_v16  ;;  %v8775_v53 = vadd.f32 %v4514_v21, %v4513_v59  ;;  %v5797_v42 = vpop.eup %5796  ;;  %v3685_v10 = vmul.f32 %v5795_v20, %v10025_v35  ;;  %v10031_v16 = vld [vmem:[#allocation86_spill] sm:$0xff] }
 0x41e   :  { %v8781_v22 = vadd.f32 %v4521_v39, %v4520_v55  ;;  %v3686_v9 = vmul.f32 %v5797_v42, %v10026_v60  ;;  %v8785_v0 = vadd.f32 %v4528_v6, %v4527_v12 }
 0x41f   :  { %v8778_v8 = vadd.f32 %v4504_v57, %v4503_v30  ;;  %v3675_v17 = vrot.slane %v3674_v40, 1  ;;  %v3693_v18 = vmul.f32 %v3685_v10, %v10027_v3  ;;  %v3701_v1 = vmul.f32 %v3685_v10, %v10028_v43 }
 0x420   :  { %v5799_v23 = vpop.eup %5798  ;;  %v8790_v29 = vmul.f32 %v3685_v10, %v10029_v32  ;;  %v8793_v38 = vmul.f32 %v3685_v10, %v10030_v7  ;;  %v3694_v30 = vmul.f32 %v3686_v9, %v10027_v3  ;;  %v3702_v44 = vmul.f32 %v3686_v9, %v10028_v43 }
 0x421   :  { %v8795_v33 = vpop.eup %5800  ;;  %v3676_v11 = vadd.f32 %v3675_v17, %v3674_v40  ;;  %v3687_v54 = vmul.f32 %v5799_v23, %v10031_v16  ;;  %v8801_v59 = vmul.f32 %v3686_v9, %v10029_v32  ;;  %v8804_v15 = vmul.f32 %v3686_v9, %v10030_v7 }
 0x422   :  { %v3725_v49 = vsel %vm1748_vm1, %v3693_v18, 0.0  ;;  %v3781_v21 = vsel %vm1748_vm1, %v3701_v1, 0.0  ;;  %v3732_v6 = vsel %vm1748_vm1, %v3694_v30, 0.0  ;;  %v8822_v9 = vsel %vm1748_vm1, %v3702_v44, 0.0 }
 0x423   :  { %5810 = vrcp.f32 %v3676_v11  ;;  %v3695_v55 = vmul.f32 %v3687_v54, %v10027_v3  ;;  %v8810_v57 = vmul.f32 %v3687_v54, %v10028_v43  ;;  %v8813_v39 = vmul.f32 %v3687_v54, %v10029_v32  ;;  %v5803_v12 = vpop.eup %5802 }
 0x424   :  { %v8816_v20 = vmul.f32 %v3687_v54, %v10030_v7  ;;  %v3726_v40 = vrot.slane %v3725_v49, 4  ;;  %v3782_v42 = vrot.slane %v3781_v21, 4  ;;  %v5805_v35 = vpop.eup %5804  ;;  %v3688_v10 = vmul.f32 %v5803_v12, %v10008_v19 }
 0x425   :  { %v3733_v17 = vrot.slane %v3732_v6, 4  ;;  %v3739_v60 = vsel %vm1748_vm1, %v3695_v55, 0.0  ;;  %v3689_v23 = vmul.f32 %v5805_v35, %v10009_v36  ;;  %5812 = vrcp.f32 %v8761_v27 }
 0x426   :  { %v3727_v18 = vadd.f32 %v3726_v40, %v3725_v49  ;;  %v3740_v1 = vrot.slane %v3739_v60, 4  ;;  %v3783_v11 = vadd.f32 %v3782_v42, %v3781_v21  ;;  %v5807_v16 = vpop.eup %5806  ;;  %v3696_v54 = vmul.f32 %v3688_v10, %v10027_v3 }
 0x427   :  { %v8827_v30 = vmul.f32 %v3688_v10, %v10028_v43  ;;  %v8830_v63 = vmul.f32 %v3688_v10, %v10029_v32  ;;  %v8833_v19 = vmul.f32 %v3688_v10, %v10030_v7  ;;  %v3690_v44 = vmul.f32 %v5807_v16, %v10010_v14 }
 0x428   :  { %v3697_v55 = vmul.f32 %v3689_v23, %v10027_v3  ;;  %v8838_v36 = vmul.f32 %v3689_v23, %v10028_v43  ;;  %v8841_v49 = vmul.f32 %v3689_v23, %v10029_v32  ;;  %v8844_v21 = vmul.f32 %v3689_v23, %v10030_v7 }
 0x429   :  { %v3728_v12 = vrot.slane %v3727_v18, 2  ;;  %v3734_v40 = vadd.f32 %v3733_v17, %v3732_v6  ;;  %v3741_v42 = vadd.f32 %v3740_v1, %v3739_v60  ;;  %v5809_v35 = vpop.eup %5808  ;;  %v3698_v10 = vmul.f32 %v3690_v44, %v10027_v3 }
 0x42a   :  { %v8848_v46 = vmul.f32 %v3690_v44, %v10028_v43  ;;  %v8851_v14 = vmul.f32 %v3690_v44, %v10029_v32  ;;  %v8854_v16 = vmul.f32 %v3690_v44, %v10030_v7  ;;  %v3691_v48 = vmul.f32 %v5809_v35, %v10013_v58 }
 0x42b   :  { %v3729_v41 = vadd.f32 %v3728_v12, %v3727_v18  ;;  %v3735_v23 = vrot.slane %v3734_v40, 2  ;;  %v3742_v56 = vrot.slane %v3741_v42, 2  ;;  %v3746_v6 = vsel %vm1748_vm1, %v3696_v54, 0.0 }
 0x42c   :  { %v3753_v17 = vsel %vm1748_vm1, %v3697_v55, 0.0  ;;  %v3760_v60 = vsel %vm1748_vm1, %v3698_v10, 0.0  ;;  %v3784_v1 = vrot.slane %v3783_v11, 2  ;;  %v3699_v34 = vmul.f32 %v3691_v48, %v10027_v3 }
 0x42d   :  { %v8862_v45 = vmul.f32 %v3691_v48, %v10028_v43  ;;  %v8865_v44 = vmul.f32 %v3691_v48, %v10029_v32  ;;  %v8868_v58 = vmul.f32 %v3691_v48, %v10030_v7  ;;  %v3730_v18 = vrot.slane %v3729_v41, 1 }
 0x42e   :  { %v3736_v12 = vadd.f32 %v3735_v23, %v3734_v40  ;;  %v3743_v35 = vadd.f32 %v3742_v56, %v3741_v42  ;;  %v3747_v54 = vrot.slane %v3746_v6, 4  ;;  %v3754_v5 = vrot.slane %v3753_v17, 4 }
 0x42f   :  { %v3761_v55 = vrot.slane %v3760_v60, 4  ;;  %v3767_v10 = vsel %vm1748_vm1, %v3699_v34, 0.0  ;;  %v3785_v47 = vadd.f32 %v3784_v1, %v3783_v11  ;;  %v8871_v25 = vadd.f32 %v3730_v18, %v3729_v41 }
 0x430   :  { %v5811_v2 = vpop.eup %5810  ;;  %v3737_v28 = vrot.slane %v3736_v12, 1  ;;  %v3744_v31 = vrot.slane %v3743_v35, 1  ;;  %v3748_v4 = vadd.f32 %v3747_v54, %v3746_v6  ;;  %v3755_v52 = vadd.f32 %v3754_v5, %v3753_v17 }
 0x431   :  { %v3692_v26 = vmul.f32 %v5811_v2, %v8753_v37  ;;  %v3762_v48 = vadd.f32 %v3761_v55, %v3760_v60  ;;  %v3768_v51 = vrot.slane %v3767_v10, 4  ;;  %v3786_v42 = vrot.slane %v3785_v47, 1 }
 0x432   :  { %v8874_v62 = vadd.f32 %v3737_v28, %v3736_v12  ;;  %v8876_v56 = vadd.f32 %v3744_v31, %v3743_v35  ;;  %v3749_v40 = vrot.slane %v3748_v4, 2  ;;  %v3756_v5 = vrot.slane %v3755_v52, 2 }
 0x433   :  { %v3700_v34 = vmul.f32 %v3692_v26, %v10027_v3  ;;  %v3708_v11 = vmul.f32 %v3692_v26, %v10028_v43  ;;  %v8881_v41 = vmul.f32 %v3692_v26, %v10029_v32  ;;  %v8884_v23 = vmul.f32 %v3692_v26, %v10030_v7 }
 0x434   :  { %v3750_v2 = vadd.f32 %v3749_v40, %v3748_v4  ;;  %v3763_v37 = vrot.slane %v3762_v48, 2  ;;  %v3769_v6 = vadd.f32 %v3768_v51, %v3767_v10  ;;  %v8887_v31 = vadd.f32 %v3786_v42, %v3785_v47 }
 0x435   :  { %v3774_v28 = vsel %vm1748_vm1, %v3700_v34, 0.0  ;;  %v3789_v17 = vrot.slane %v8822_v9, 4  ;;  %v3795_v3 = vsel %vm1748_vm1, %v8810_v57, 0.0  ;;  %v3757_v60 = vadd.f32 %v3756_v5, %v3755_v52 }
 0x436   :  { %v3751_v43 = vrot.slane %v3750_v2, 1  ;;  %v3764_v32 = vadd.f32 %v3763_v37, %v3762_v48  ;;  %v3770_v1 = vrot.slane %v3769_v6, 2  ;;  %v3775_v18 = vrot.slane %v3774_v28, 4 }
 0x437   :  { %v3790_v26 = vadd.f32 %v3789_v17, %v8822_v9  ;;  %v3796_v4 = vrot.slane %v3795_v3, 4  ;;  %v3802_v51 = vsel %vm1748_vm1, %v8827_v30, 0.0  ;;  %v3758_v47 = vrot.slane %v3757_v60, 1 }
 0x438   :  { %v8895_v7 = vadd.f32 %v3751_v43, %v3750_v2  ;;  %v3765_v12 = vrot.slane %v3764_v32, 1  ;;  %v3771_v35 = vadd.f32 %v3770_v1, %v3769_v6  ;;  %v3776_v54 = vadd.f32 %v3775_v18, %v3774_v28 }
 0x439   :  { %v3791_v55 = vrot.slane %v3790_v26, 2  ;;  %v3797_v10 = vadd.f32 %v3796_v4, %v3795_v3  ;;  %v3803_v57 = vrot.slane %v3802_v51, 4  ;;  %v8897_v40 = vadd.f32 %v3758_v47, %v3757_v60 }
 0x43a   :  { %v8899_v52 = vadd.f32 %v3765_v12, %v3764_v32  ;;  %v3772_v48 = vrot.slane %v3771_v35, 1  ;;  %v3809_v9 = vsel %vm1748_vm1, %v8838_v36, 0.0  ;;  %v3777_v42 = vrot.slane %v3776_v54, 2 }
 0x43b   :  { %v3792_v34 = vadd.f32 %v3791_v55, %v3790_v26  ;;  %v3798_v30 = vrot.slane %v3797_v10, 2  ;;  %v3804_v2 = vadd.f32 %v3803_v57, %v3802_v51  ;;  %v3810_v37 = vrot.slane %v3809_v9, 4 }
 0x43c   :  { %v8903_v5 = vadd.f32 %v3772_v48, %v3771_v35  ;;  %v3816_v6 = vsel %vm1748_vm1, %v8848_v46, 0.0  ;;  %v3823_v28 = vsel %vm1748_vm1, %v8862_v45, 0.0  ;;  %v3778_v17 = vadd.f32 %v3777_v42, %v3776_v54 }
 0x43d   :  { %v3793_v3 = vrot.slane %v3792_v34, 1  ;;  %v3799_v43 = vadd.f32 %v3798_v30, %v3797_v10  ;;  %v3805_v60 = vrot.slane %v3804_v2, 2  ;;  %v3811_v32 = vadd.f32 %v3810_v37, %v3809_v9 }
 0x43e   :  { %v3817_v1 = vrot.slane %v3816_v6, 4  ;;  %v3824_v36 = vrot.slane %v3823_v28, 4  ;;  %v3830_v18 = vsel %vm1748_vm1, %v3708_v11, 0.0  ;;  %v3779_v26 = vrot.slane %v3778_v17, 1 }
 0x43f   :  { %v8910_v4 = vadd.f32 %v3793_v3, %v3792_v34  ;;  %v3800_v51 = vrot.slane %v3799_v43, 1  ;;  %v3806_v47 = vadd.f32 %v3805_v60, %v3804_v2  ;;  %v3812_v12 = vrot.slane %v3811_v32, 2 }
 0x440   :  { %v3818_v35 = vadd.f32 %v3817_v1, %v3816_v6  ;;  %v3825_v46 = vadd.f32 %v3824_v36, %v3823_v28  ;;  %v3831_v55 = vrot.slane %v3830_v18, 4  ;;  %v8912_v57 = vadd.f32 %v3779_v26, %v3778_v17 }
 0x441   :  { %v8914_v45 = vadd.f32 %v3800_v51, %v3799_v43  ;;  %v3807_v54 = vrot.slane %v3806_v47, 1  ;;  %v3837_v10 = vsel %vm1748_vm1, %v8790_v29, 0.0  ;;  %v3813_v48 = vadd.f32 %v3812_v12, %v3811_v32 }
 0x442   :  { %v3819_v9 = vrot.slane %v3818_v35, 2  ;;  %v3826_v11 = vrot.slane %v3825_v46, 2  ;;  %v3832_v42 = vadd.f32 %v3831_v55, %v3830_v18  ;;  %v3838_v30 = vrot.slane %v3837_v10, 4 }
 0x443   :  { %v8918_v34 = vadd.f32 %v3807_v54, %v3806_v47  ;;  %v3844_v2 = vsel %vm1748_vm1, %v8801_v59, 0.0  ;;  %v3851_v37 = vsel %vm1748_vm1, %v8813_v39, 0.0  ;;  %v3814_v6 = vrot.slane %v3813_v48, 1 }
 0x444   :  { %v3820_v28 = vadd.f32 %v3819_v9, %v3818_v35  ;;  %v3827_v17 = vadd.f32 %v3826_v11, %v3825_v46  ;;  %v3833_v3 = vrot.slane %v3832_v42, 2  ;;  %v3839_v43 = vadd.f32 %v3838_v30, %v3837_v10 }
 0x445   :  { %v3845_v60 = vrot.slane %v3844_v2, 4  ;;  %v3852_v29 = vrot.slane %v3851_v37, 4  ;;  %v3858_v32 = vsel %vm1748_vm1, %v8830_v63, 0.0  ;;  %v8926_v1 = vadd.f32 %v3814_v6, %v3813_v48 }
 0x446   :  { %v3821_v36 = vrot.slane %v3820_v28, 1  ;;  %v3828_v18 = vrot.slane %v3827_v17, 1  ;;  %v3834_v26 = vadd.f32 %v3833_v3, %v3832_v42  ;;  %v3840_v51 = vrot.slane %v3839_v43, 2 }
 0x447   :  { %v3846_v59 = vadd.f32 %v3845_v60, %v3844_v2  ;;  %v3853_v47 = vadd.f32 %v3852_v29, %v3851_v37  ;;  %v3859_v12 = vrot.slane %v3858_v32, 4  ;;  %v3865_v55 = vsel %vm1748_vm1, %v8841_v49, 0.0 }
 0x448   :  { %v8928_v39 = vadd.f32 %v3821_v36, %v3820_v28  ;;  %v8930_v35 = vadd.f32 %v3828_v18, %v3827_v17  ;;  %v3835_v46 = vrot.slane %v3834_v26, 1  ;;  %v3841_v54 = vadd.f32 %v3840_v51, %v3839_v43 }
 0x449   :  { %v3847_v10 = vrot.slane %v3846_v59, 2  ;;  %v3854_v63 = vrot.slane %v3853_v47, 2  ;;  %v3860_v48 = vadd.f32 %v3859_v12, %v3858_v32  ;;  %v3866_v11 = vrot.slane %v3865_v55, 4 }
 0x44a   :  { %v8934_v9 = vadd.f32 %v3835_v46, %v3834_v26  ;;  %v3872_v42 = vsel %vm1748_vm1, %v8851_v14, 0.0  ;;  %v3879_v30 = vsel %vm1748_vm1, %v8865_v44, 0.0  ;;  %v3842_v2 = vrot.slane %v3841_v54, 1 }
 0x44b   :  { %v3848_v37 = vadd.f32 %v3847_v10, %v3846_v59  ;;  %v3855_v6 = vadd.f32 %v3854_v63, %v3853_v47  ;;  %v3861_v28 = vrot.slane %v3860_v48, 2  ;;  %v3867_v17 = vadd.f32 %v3866_v11, %v3865_v55 }
 0x44c   :  { %v3873_v3 = vrot.slane %v3872_v42, 4  ;;  %v3880_v49 = vrot.slane %v3879_v30, 4  ;;  %v3886_v43 = vsel %vm1748_vm1, %v8881_v41, 0.0  ;;  %v8942_v60 = vadd.f32 %v3842_v2, %v3841_v54 }
 0x44d   :  { %v3849_v29 = vrot.slane %v3848_v37, 1  ;;  %v3856_v32 = vrot.slane %v3855_v6, 1  ;;  %v3862_v36 = vadd.f32 %v3861_v28, %v3860_v48  ;;  %v3868_v18 = vrot.slane %v3867_v17, 2 }
 0x44e   :  { %v3874_v14 = vadd.f32 %v3873_v3, %v3872_v42  ;;  %v3881_v26 = vadd.f32 %v3880_v49, %v3879_v30  ;;  %v3887_v51 = vrot.slane %v3886_v43, 4  ;;  %v3893_v12 = vsel %vm1748_vm1, %v8793_v38, 0.0 }
 0x44f   :  { %v8944_v44 = vadd.f32 %v3849_v29, %v3848_v37  ;;  %v8946_v59 = vadd.f32 %v3856_v32, %v3855_v6  ;;  %v3863_v47 = vrot.slane %v3862_v36, 1  ;;  %v3869_v46 = vadd.f32 %v3868_v18, %v3867_v17 }
 0x450   :  { %v3875_v55 = vrot.slane %v3874_v14, 2  ;;  %v3882_v41 = vrot.slane %v3881_v26, 2  ;;  %v3888_v54 = vadd.f32 %v3887_v51, %v3886_v43  ;;  %v3894_v63 = vrot.slane %v3893_v12, 4 }
 0x451   :  { %v8950_v10 = vadd.f32 %v3863_v47, %v3862_v36  ;;  %v3900_v48 = vsel %vm1748_vm1, %v8804_v15, 0.0  ;;  %v3907_v11 = vsel %vm1748_vm1, %v8816_v20, 0.0  ;;  %v3870_v42 = vrot.slane %v3869_v46, 1 }
 0x452   :  { %v3876_v30 = vadd.f32 %v3875_v55, %v3874_v14  ;;  %v3883_v2 = vadd.f32 %v3882_v41, %v3881_v26  ;;  %v3889_v37 = vrot.slane %v3888_v54, 2  ;;  %v3895_v6 = vadd.f32 %v3894_v63, %v3893_v12 }
 0x453   :  { %v3901_v28 = vrot.slane %v3900_v48, 4  ;;  %v3908_v38 = vrot.slane %v3907_v11, 4  ;;  %v3914_v17 = vsel %vm1748_vm1, %v8833_v19, 0.0  ;;  %v8958_v3 = vadd.f32 %v3870_v42, %v3869_v46 }
 0x454   :  { %v3877_v49 = vrot.slane %v3876_v30, 1  ;;  %v3884_v43 = vrot.slane %v3883_v2, 1  ;;  %v3890_v29 = vadd.f32 %v3889_v37, %v3888_v54  ;;  %v3896_v32 = vrot.slane %v3895_v6, 2 }
 0x455   :  { %v3902_v15 = vadd.f32 %v3901_v28, %v3900_v48  ;;  %v3909_v36 = vadd.f32 %v3908_v38, %v3907_v11  ;;  %v3915_v18 = vrot.slane %v3914_v17, 4  ;;  %v3921_v51 = vsel %vm1748_vm1, %v8844_v21, 0.0 }
 0x456   :  { %v8960_v20 = vadd.f32 %v3877_v49, %v3876_v30  ;;  %v8962_v14 = vadd.f32 %v3884_v43, %v3883_v2  ;;  %v3891_v26 = vrot.slane %v3890_v29, 1  ;;  %v3897_v47 = vadd.f32 %v3896_v32, %v3895_v6 }
 0x457   :  { %v3903_v12 = vrot.slane %v3902_v15, 2  ;;  %v3910_v19 = vrot.slane %v3909_v36, 2  ;;  %v3916_v46 = vadd.f32 %v3915_v18, %v3914_v17  ;;  %v3922_v41 = vrot.slane %v3921_v51, 4 }
 0x458   :  { %v8966_v55 = vadd.f32 %v3891_v26, %v3890_v29  ;;  %v3928_v54 = vsel %vm1748_vm1, %v8854_v16, 0.0  ;;  %v3935_v63 = vsel %vm1748_vm1, %v8868_v58, 0.0  ;;  %v3898_v48 = vrot.slane %v3897_v47, 1 }
 0x459   :  { %v3904_v11 = vadd.f32 %v3903_v12, %v3902_v15  ;;  %v3911_v42 = vadd.f32 %v3910_v19, %v3909_v36  ;;  %v3917_v30 = vrot.slane %v3916_v46, 2  ;;  %v3923_v2 = vadd.f32 %v3922_v41, %v3921_v51 }
 0x45a   :  { %v3929_v37 = vrot.slane %v3928_v54, 4  ;;  %v3936_v21 = vrot.slane %v3935_v63, 4  ;;  %v3942_v6 = vsel %vm1748_vm1, %v8884_v23, 0.0  ;;  %v8974_v28 = vadd.f32 %v3898_v48, %v3897_v47 }
 0x45b   :  { %v3905_v38 = vrot.slane %v3904_v11, 1  ;;  %v3912_v17 = vrot.slane %v3911_v42, 1  ;;  %v3918_v49 = vadd.f32 %v3917_v30, %v3916_v46  ;;  %v3924_v43 = vrot.slane %v3923_v2, 2 }
 0x45c   :  { %v3930_v16 = vadd.f32 %v3929_v37, %v3928_v54  ;;  %v3937_v29 = vadd.f32 %v3936_v21, %v3935_v63  ;;  %v3943_v32 = vrot.slane %v3942_v6, 4  ;;  %v10032_v18 = vrot.slane %v8771_v13, 2 }
 0x45d   :  { %v8976_v58 = vadd.f32 %v3905_v38, %v3904_v11  ;;  %v8978_v15 = vadd.f32 %v3912_v17, %v3911_v42  ;;  %v3919_v36 = vrot.slane %v3918_v49, 1  ;;  %v3925_v51 = vadd.f32 %v3924_v43, %v3923_v2 }
 0x45e   :  { %v4510_v26 = vadd.f32 %v10032_v18, %v8771_v13  ;;  %v3931_v23 = vrot.slane %v3930_v16, 2  ;;  %v3938_v47 = vrot.slane %v3937_v29, 2  ;;  %v3944_v12 = vadd.f32 %v3943_v32, %v3942_v6 }
 0x45f   :  { %v8983_v19 = vadd.f32 %v3919_v36, %v3918_v49  ;;  %v10034_v41 = vrot.slane %v8775_v53, 2  ;;  %v4523_v63 = vrot.slane %v8781_v22, 2  ;;  %v3926_v48 = vrot.slane %v3925_v51, 1 }
 0x460   :  { %v4511_v46 = vrot.slane %v4510_v26, 1  ;;  %v3932_v11 = vadd.f32 %v3931_v23, %v3930_v16  ;;  %v3939_v42 = vadd.f32 %v3938_v47, %v3937_v29  ;;  %v3945_v30 = vrot.slane %v3944_v12, 2 }
 0x461   :  { %10033 = vst [vmem:[#allocation42_spill] sm:$0xff] %v8983_v19  ;;  %v4517_v54 = vadd.f32 %v10034_v41, %v8775_v53  ;;  %v4524_v13 = vadd.f32 %v4523_v63, %v8781_v22  ;;  %v4530_v2 = vrot.slane %v8785_v0, 2  ;;  %v8991_v6 = vadd.f32 %v3926_v48, %v3925_v51 }
 0x462   :  { %v4512_v37 = vadd.f32 %v4511_v46, %v4510_v26  ;;  %v3933_v38 = vrot.slane %v3932_v11, 1  ;;  %v3940_v17 = vrot.slane %v3939_v42, 1  ;;  %v3946_v49 = vadd.f32 %v3945_v30, %v3944_v12 }
 0x463   :  { %v4518_v21 = vrot.slane %v4517_v54, 1  ;;  %10035 = vst [vmem:[#allocation56_spill] sm:$0xff] %v8991_v6  ;;  %v4525_v32 = vrot.slane %v4524_v13, 1  ;;  %v4531_v53 = vadd.f32 %v4530_v2, %v8785_v0  ;;  %v4534_v16 = vsel %vm1748_vm1, %v8795_v33, 0.0 }
 0x464   :  { %v8996_v29 = vadd.f32 %v3933_v38, %v3932_v11  ;;  %v8998_v36 = vadd.f32 %v3940_v17, %v3939_v42  ;;  %v3947_v18 = vrot.slane %v3946_v49, 1  ;;  %v4535_v22 = vrot.slane %v4534_v16, 4 }
 0x465   :  { %v4519_v43 = vadd.f32 %v4518_v21, %v4517_v54  ;;  %v4526_v26 = vadd.f32 %v4525_v32, %v4524_v13  ;;  %v4532_v23 = vrot.slane %v4531_v53, 1  ;;  %v5060_v51 = vrot.slane %v8874_v62, 7 }
 0x466   :  { %10036 = vst [vmem:[#allocation57_spill] sm:$0xff] %v8996_v29  ;;  %10037 = vst [vmem:[#allocation41_spill] sm:$0xff] %v8998_v36  ;;  %v9002_v47 = vadd.f32 %v3947_v18, %v3946_v49  ;;  %v4536_v12 = vadd.f32 %v4535_v22, %v4534_v16  ;;  %5814 = vrcp.f32 %v8763_v61  ;;  %v5062_v0 = vrot.slane %v8876_v56, 6  ;;  %v10040_v22 = vld [vmem:[#allocation83_spill] sm:$0xff] }
 0x467   :  { %v4533_v46 = vadd.f32 %v4532_v23, %v4531_v53  ;;  %5816 = vrcp.f32 %v8778_v8  ;;  %v5061_v41 = vsel %vm4942_vm2, %v5060_v51, %v8871_v25  ;;  %v5064_v54 = vrot.slane %v8895_v7, 5  ;;  %v5813_v53 = vpop.eup %5812 }
 0x468   :  { %10038 = vst [vmem:[#allocation46_spill] sm:$0xff] %v9002_v47  ;;  %v4537_v63 = vrot.slane %v4536_v12, 2  ;;  %5818 = vrcp.f32 %v4512_v37  ;;  %v5063_v27 = vsel %vm4945_vm3, %v5062_v0, %v5061_v41  ;;  %v5066_v62 = vrot.slane %v8897_v40, 4  ;;  %v10042_v0 = vld [vmem:[#allocation92_spill] sm:$0xff] }
 0x469   :  { %5820 = vrcp.f32 %v4519_v43  ;;  %v5065_v48 = vsel %vm4948_vm4, %v5064_v54, %v5063_v27  ;;  %v5068_v61 = vrot.slane %v8899_v52, 3  ;;  %v5070_v56 = vrot.slane %v8903_v5, 2  ;;  %v10043_v27 = vld [vmem:[#allocation93_spill] sm:$0xff] }
 0x46a   :  { %v4538_v11 = vadd.f32 %v4537_v63, %v4536_v12  ;;  %5822 = vrcp.f32 %v4526_v26  ;;  %v5067_v8 = vsel %vm4951_vm5, %v5066_v62, %v5065_v48  ;;  %v5072_v25 = vrot.slane %v8912_v57, 1  ;;  %v10044_v48 = vld [vmem:[#allocation109_spill] sm:$0xff] }
 0x46b   :  { %5824 = vrcp.f32 %v4533_v46  ;;  %v5069_v7 = vsel %vm4954_vm6, %v5068_v61, %v5067_v8  ;;  %v5074_v42 = vrot.slane %v8910_v4, 7  ;;  %v5076_v40 = vrot.slane %v8914_v45, 6  ;;  %v10046_v8 = vld [vmem:[#allocation110_spill] sm:$0xff] }
 0x46c   :  { %v4539_v30 = vrot.slane %v4538_v11, 1  ;;  %v5071_v37 = vsel %vm4957_vm7, %v5070_v56, %v5069_v7  ;;  %v5078_v52 = vrot.slane %v8918_v34, 5  ;;  %v5080_v5 = vrot.slane %v8926_v1, 4  ;;  %v10045_v56 = vld [vmem:[#allocation72_spill] sm:$0xff] }
 0x46d   :  { %v9024_v21 = vsel %vm4960_vm8, %v5072_v25, %v5071_v37  ;;  %v5075_v57 = vsel %vm4942_vm2, %v5074_v42, %v8887_v31  ;;  %v5082_v13 = vrot.slane %v8928_v39, 3  ;;  %v5084_v2 = vrot.slane %v8930_v35, 2 }
 0x46e   :  { %10039 = vst [vmem:[#allocation58_spill] sm:$0xff] %v9024_v21  ;;  %v4540_v4 = vadd.f32 %v4539_v30, %v4538_v11  ;;  %v5077_v45 = vsel %vm4945_vm3, %v5076_v40, %v5075_v57  ;;  %v5086_v38 = vrot.slane %v8934_v9, 1  ;;  %v5088_v17 = vrot.slane %v8944_v44, 7 }
 0x46f   :  { %v5079_v34 = vsel %vm4948_vm4, %v5078_v52, %v5077_v45  ;;  %v5090_v1 = vrot.slane %v8946_v59, 6  ;;  %v5092_v49 = vrot.slane %v8950_v10, 5  ;;  %v5094_v43 = vrot.slane %v8958_v3, 4 }
 0x470   :  { %5826 = vrcp.f32 %v4540_v4  ;;  %v5081_v31 = vsel %vm4951_vm5, %v5080_v5, %v5079_v34  ;;  %v5089_v39 = vsel %vm4942_vm2, %v5088_v17, %v8942_v60  ;;  %v5096_v35 = vrot.slane %v8960_v20, 3 }
 0x471   :  { %v5083_v9 = vsel %vm4954_vm6, %v5082_v13, %v5081_v31  ;;  %v5091_v44 = vsel %vm4945_vm3, %v5090_v1, %v5089_v39  ;;  %v5102_v16 = vrot.slane %v8976_v58, 7  ;;  %v4549_v20 = vmul.f32 %v5813_v53, %v10040_v22 }
 0x472   :  { %v5085_v10 = vsel %vm4957_vm7, %v5084_v2, %v5083_v9  ;;  %v5093_v3 = vsel %vm4948_vm4, %v5092_v49, %v5091_v44  ;;  %v10047_v2 = vld [vmem:[#allocation102_spill] sm:$0xff]  ;;  %v10049_v9 = vld [vmem:[#allocation73_spill] sm:$0xff] }
 0x473   :  { %v5815_v60 = vpop.eup %5814  ;;  %v9051_v26 = vsel %vm4960_vm8, %v5086_v38, %v5085_v10  ;;  %v5095_v23 = vsel %vm4951_vm5, %v5094_v43, %v5093_v3  ;;  %v9061_v58 = vsel %vm4942_vm2, %v5102_v16, %v8974_v28  ;;  %v4557_v61 = vmul.f32 %v4549_v20, %v10044_v48 }
 0x474   :  { %10041 = vst [vmem:[#allocation59_spill] sm:$0xff] %v9051_v26  ;;  %v5817_v12 = vpop.eup %5816  ;;  %v4550_v46 = vmul.f32 %v5815_v60, %v10042_v0  ;;  %v9057_v41 = vsel %vm4954_vm6, %v5096_v35, %v5095_v23  ;;  %v9067_v11 = vmul.f32 %v4549_v20, %v10045_v56  ;;  %v9070_v25 = vmul.f32 %v4549_v20, %v10046_v8 }
 0x475   :  { %v5819_v63 = vpop.eup %5818  ;;  %v4551_v62 = vmul.f32 %v5817_v12, %v10043_v27  ;;  %v9112_v44 = vmul.f32 %v4549_v20, %v10049_v9 }
 0x476   :  { %v5821_v7 = vpop.eup %5820  ;;  %v4552_v42 = vmul.f32 %v5819_v63, %v10021_v50  ;;  %v4558_v40 = vmul.f32 %v4550_v46, %v10044_v48  ;;  %v9075_v28 = vmul.f32 %v4550_v46, %v10045_v56  ;;  %v9078_v30 = vmul.f32 %v4550_v46, %v10046_v8 }
 0x477   :  { %v5823_v37 = vpop.eup %5822  ;;  %v4553_v52 = vmul.f32 %v5821_v7, %v10022_v24  ;;  %v4559_v5 = vmul.f32 %v4551_v62, %v10044_v48  ;;  %v9083_v57 = vmul.f32 %v4551_v62, %v10045_v56  ;;  %v9086_v13 = vmul.f32 %v4551_v62, %v10046_v8  ;;  %v10048_v24 = vld [vmem:[#allocation103_spill] sm:$0xff] }
 0x478   :  { %v5825_v50 = vpop.eup %5824  ;;  %v4554_v4 = vmul.f32 %v5823_v37, %v10047_v2  ;;  %v4560_v45 = vmul.f32 %v4552_v42, %v10044_v48  ;;  %v9091_v38 = vmul.f32 %v4552_v42, %v10045_v56  ;;  %v9094_v17 = vmul.f32 %v4552_v42, %v10046_v8 }
 0x479   :  { %v4555_v34 = vmul.f32 %v5825_v50, %v10048_v24  ;;  %v4561_v1 = vmul.f32 %v4553_v52, %v10044_v48  ;;  %v9099_v49 = vmul.f32 %v4553_v52, %v10045_v56  ;;  %v9102_v43 = vmul.f32 %v4553_v52, %v10046_v8 }
 0x47a   :  { %v4562_v31 = vmul.f32 %v4554_v4, %v10044_v48  ;;  %v9106_v39 = vmul.f32 %v4554_v4, %v10045_v56  ;;  %v9109_v35 = vmul.f32 %v4554_v4, %v10046_v8  ;;  %v9122_v16 = vmul.f32 %v4550_v46, %v10049_v9 }
 0x47b   :  { %v4563_v53 = vmul.f32 %v4555_v34, %v10044_v48  ;;  %v9116_v10 = vmul.f32 %v4555_v34, %v10045_v56  ;;  %v9119_v3 = vmul.f32 %v4555_v34, %v10046_v8  ;;  %v9125_v60 = vmul.f32 %v4551_v62, %v10049_v9 }
 0x47c   :  { %v9128_v22 = vmul.f32 %v4552_v42, %v10049_v9  ;;  %v9131_v20 = vmul.f32 %v4553_v52, %v10049_v9  ;;  %v9134_v23 = vmul.f32 %v4554_v4, %v10049_v9  ;;  %v9137_v0 = vmul.f32 %v4555_v34, %v10049_v9 }
 0x47d   :  { %v5827_v12 = vpop.eup %5826  ;;  %v4589_v63 = vsel %vm1748_vm1, %v4557_v61, 0.0  ;;  %v4596_v46 = vsel %vm1748_vm1, %v4558_v40, 0.0  ;;  %v4603_v27 = vsel %vm1748_vm1, %v4559_v5, 0.0  ;;  %v4610_v52 = vsel %vm1748_vm1, %v4560_v45, 0.0 }
 0x47e   :  { %v4556_v62 = vmul.f32 %v5827_v12, %v8795_v33  ;;  %v4590_v7 = vrot.slane %v4589_v63, 4  ;;  %v4597_v42 = vrot.slane %v4596_v46, 4  ;;  %v4604_v37 = vrot.slane %v4603_v27, 4 }
 0x47f   :  { %v4617_v50 = vsel %vm1748_vm1, %v4561_v1, 0.0  ;;  %v4624_v2 = vsel %vm1748_vm1, %v4562_v31, 0.0  ;;  %v4631_v4 = vsel %vm1748_vm1, %v4563_v53, 0.0  ;;  %v4611_v12 = vrot.slane %v4610_v52, 4 }
 0x480   :  { %v4564_v24 = vmul.f32 %v4556_v62, %v10044_v48  ;;  %v9149_v61 = vmul.f32 %v4556_v62, %v10045_v56  ;;  %v9152_v40 = vmul.f32 %v4556_v62, %v10046_v8  ;;  %v9155_v33 = vmul.f32 %v4556_v62, %v10049_v9 }
 0x481   :  { %v4591_v5 = vadd.f32 %v4590_v7, %v4589_v63  ;;  %v4598_v34 = vadd.f32 %v4597_v42, %v4596_v46  ;;  %v4605_v45 = vadd.f32 %v4604_v37, %v4603_v27  ;;  %v4618_v1 = vrot.slane %v4617_v50, 4 }
 0x482   :  { %v4625_v54 = vrot.slane %v4624_v2, 4  ;;  %v4632_v31 = vrot.slane %v4631_v4, 4  ;;  %v4638_v53 = vsel %vm1748_vm1, %v4564_v24, 0.0  ;;  %v4612_v56 = vadd.f32 %v4611_v12, %v4610_v52 }
 0x483   :  { %v4592_v51 = vrot.slane %v4591_v5, 2  ;;  %v4599_v48 = vrot.slane %v4598_v34, 2  ;;  %v4606_v18 = vrot.slane %v4605_v45, 2  ;;  %v4619_v59 = vadd.f32 %v4618_v1, %v4617_v50 }
 0x484   :  { %v4626_v32 = vadd.f32 %v4625_v54, %v4624_v2  ;;  %v4633_v8 = vadd.f32 %v4632_v31, %v4631_v4  ;;  %v4639_v26 = vrot.slane %v4638_v53, 4  ;;  %v4613_v63 = vrot.slane %v4612_v56, 2 }
 0x485   :  { %v4593_v21 = vadd.f32 %v4592_v51, %v4591_v5  ;;  %v4600_v9 = vadd.f32 %v4599_v48, %v4598_v34  ;;  %v4607_v62 = vadd.f32 %v4606_v18, %v4605_v45  ;;  %v4620_v46 = vrot.slane %v4619_v59, 2 }
 0x486   :  { %v4627_v27 = vrot.slane %v4626_v32, 2  ;;  %v4634_v7 = vrot.slane %v4633_v8, 2  ;;  %v4640_v42 = vadd.f32 %v4639_v26, %v4638_v53  ;;  %v4614_v24 = vadd.f32 %v4613_v63, %v4612_v56 }
 0x487   :  { %v4594_v37 = vrot.slane %v4593_v21, 1  ;;  %v4601_v47 = vrot.slane %v4600_v9, 1  ;;  %v4608_v6 = vrot.slane %v4607_v62, 1  ;;  %v4621_v36 = vadd.f32 %v4620_v46, %v4619_v59 }
 0x488   :  { %v4628_v19 = vadd.f32 %v4627_v27, %v4626_v32  ;;  %v4635_v29 = vadd.f32 %v4634_v7, %v4633_v8  ;;  %v4641_v52 = vrot.slane %v4640_v42, 2  ;;  %v4615_v18 = vrot.slane %v4614_v24, 1 }
 0x489   :  { %v9158_v50 = vadd.f32 %v4594_v37, %v4593_v21  ;;  %v9160_v54 = vadd.f32 %v4601_v47, %v4600_v9  ;;  %v9162_v51 = vadd.f32 %v4608_v6, %v4607_v62  ;;  %v4622_v2 = vrot.slane %v4621_v36, 1 }
 0x48a   :  { %v4629_v4 = vrot.slane %v4628_v19, 1  ;;  %v4636_v5 = vrot.slane %v4635_v29, 1  ;;  %v4642_v34 = vadd.f32 %v4641_v52, %v4640_v42  ;;  %v9164_v26 = vadd.f32 %v4615_v18, %v4614_v24 }
 0x48b   :  { %v4645_v45 = vsel %vm1748_vm1, %v9067_v11, 0.0  ;;  %v4652_v32 = vsel %vm1748_vm1, %v9075_v28, 0.0  ;;  %v4659_v21 = vsel %vm1748_vm1, %v9083_v57, 0.0  ;;  %v9172_v47 = vadd.f32 %v4622_v2, %v4621_v36 }
 0x48c   :  { %v9174_v6 = vadd.f32 %v4629_v4, %v4628_v19  ;;  %v9176_v59 = vadd.f32 %v4636_v5, %v4635_v29  ;;  %v4643_v12 = vrot.slane %v4642_v34, 1  ;;  %v4646_v1 = vrot.slane %v4645_v45, 4 }
 0x48d   :  { %v4653_v31 = vrot.slane %v4652_v32, 4  ;;  %v4660_v53 = vrot.slane %v4659_v21, 4  ;;  %v4666_v48 = vsel %vm1748_vm1, %v9091_v38, 0.0  ;;  %v4673_v28 = vsel %vm1748_vm1, %v9099_v49, 0.0 }
 0x48e   :  { %v9180_v11 = vadd.f32 %v4643_v12, %v4642_v34  ;;  %v4667_v56 = vrot.slane %v4666_v48, 4  ;;  %v4680_v36 = vsel %vm1748_vm1, %v9106_v39, 0.0  ;;  %v4647_v19 = vadd.f32 %v4646_v1, %v4645_v45 }
 0x48f   :  { %v4654_v57 = vadd.f32 %v4653_v31, %v4652_v32  ;;  %v4661_v29 = vadd.f32 %v4660_v53, %v4659_v21  ;;  %v4674_v8 = vrot.slane %v4673_v28, 4  ;;  %v4681_v62 = vrot.slane %v4680_v36, 4 }
 0x490   :  { %v4668_v9 = vadd.f32 %v4667_v56, %v4666_v48  ;;  %v4687_v63 = vsel %vm1748_vm1, %v9116_v10, 0.0  ;;  %v4694_v38 = vsel %vm1748_vm1, %v9149_v61, 0.0  ;;  %v4648_v46 = vrot.slane %v4647_v19, 2 }
 0x491   :  { %v4655_v27 = vrot.slane %v4654_v57, 2  ;;  %v4662_v7 = vrot.slane %v4661_v29, 2  ;;  %v4675_v42 = vadd.f32 %v4674_v8, %v4673_v28  ;;  %v4682_v37 = vadd.f32 %v4681_v62, %v4680_v36 }
 0x492   :  { %v4669_v49 = vrot.slane %v4668_v9, 2  ;;  %v4688_v24 = vrot.slane %v4687_v63, 4  ;;  %v4695_v39 = vrot.slane %v4694_v38, 4  ;;  %v4649_v52 = vadd.f32 %v4648_v46, %v4647_v19 }
 0x493   :  { %v4656_v18 = vadd.f32 %v4655_v27, %v4654_v57  ;;  %v4663_v2 = vadd.f32 %v4662_v7, %v4661_v29  ;;  %v4676_v4 = vrot.slane %v4675_v42, 2  ;;  %v4683_v34 = vrot.slane %v4682_v37, 2 }
 0x494   :  { %v4670_v5 = vadd.f32 %v4669_v49, %v4668_v9  ;;  %v4689_v45 = vadd.f32 %v4688_v24, %v4687_v63  ;;  %v4696_v32 = vadd.f32 %v4695_v39, %v4694_v38  ;;  %v4650_v10 = vrot.slane %v4649_v52, 1 }
 0x495   :  { %v4657_v21 = vrot.slane %v4656_v18, 1  ;;  %v4664_v12 = vrot.slane %v4663_v2, 1  ;;  %v4677_v61 = vadd.f32 %v4676_v4, %v4675_v42  ;;  %v4684_v31 = vadd.f32 %v4683_v34, %v4682_v37 }
 0x496   :  { %v4671_v1 = vrot.slane %v4670_v5, 1  ;;  %v4690_v53 = vrot.slane %v4689_v45, 2  ;;  %v4697_v48 = vrot.slane %v4696_v32, 2  ;;  %v9190_v56 = vadd.f32 %v4650_v10, %v4649_v52 }
 0x497   :  { %v9192_v28 = vadd.f32 %v4657_v21, %v4656_v18  ;;  %v9194_v36 = vadd.f32 %v4664_v12, %v4663_v2  ;;  %v4678_v19 = vrot.slane %v4677_v61, 1  ;;  %v4685_v29 = vrot.slane %v4684_v31, 1 }
 0x498   :  { %v9196_v57 = vadd.f32 %v4671_v1, %v4670_v5  ;;  %v4691_v8 = vadd.f32 %v4690_v53, %v4689_v45  ;;  %v4698_v9 = vadd.f32 %v4697_v48, %v4696_v32  ;;  %v4701_v63 = vsel %vm1748_vm1, %v9070_v25, 0.0 }
 0x499   :  { %v9198_v62 = vadd.f32 %v4678_v19, %v4677_v61  ;;  %v4708_v38 = vsel %vm1748_vm1, %v9078_v30, 0.0  ;;  %v4715_v46 = vsel %vm1748_vm1, %v9086_v13, 0.0  ;;  %v9206_v27 = vadd.f32 %v4685_v29, %v4684_v31 }
 0x49a   :  { %v4692_v7 = vrot.slane %v4691_v8, 1  ;;  %v4699_v42 = vrot.slane %v4698_v9, 1  ;;  %v4702_v49 = vrot.slane %v4701_v63, 4  ;;  %v4709_v37 = vrot.slane %v4708_v38, 4 }
 0x49b   :  { %v4716_v24 = vrot.slane %v4715_v46, 4  ;;  %v4722_v39 = vsel %vm1748_vm1, %v9094_v17, 0.0  ;;  %v4729_v52 = vsel %vm1748_vm1, %v9102_v43, 0.0  ;;  %v4736_v34 = vsel %vm1748_vm1, %v9109_v35, 0.0 }
 0x49c   :  { %v9212_v25 = vadd.f32 %v4692_v7, %v4691_v8  ;;  %v9214_v18 = vadd.f32 %v4699_v42, %v4698_v9  ;;  %v4703_v30 = vadd.f32 %v4702_v49, %v4701_v63  ;;  %v4723_v2 = vrot.slane %v4722_v39, 4 }
 0x49d   :  { %v4710_v13 = vadd.f32 %v4709_v37, %v4708_v38  ;;  %v4717_v4 = vadd.f32 %v4716_v24, %v4715_v46  ;;  %v4730_v5 = vrot.slane %v4729_v52, 4  ;;  %v4737_v10 = vrot.slane %v4736_v34, 4 }
 0x49e   :  { %v4704_v45 = vrot.slane %v4703_v30, 2  ;;  %v4724_v32 = vadd.f32 %v4723_v2, %v4722_v39  ;;  %v4743_v17 = vsel %vm1748_vm1, %v9119_v3, 0.0  ;;  %v4750_v48 = vsel %vm1748_vm1, %v9152_v40, 0.0 }
 0x49f   :  { %v4711_v21 = vrot.slane %v4710_v13, 2  ;;  %v4718_v43 = vrot.slane %v4717_v4, 2  ;;  %v4731_v12 = vadd.f32 %v4730_v5, %v4729_v52  ;;  %v4744_v61 = vrot.slane %v4743_v17, 4 }
 0x4a0   :  { %v4705_v1 = vadd.f32 %v4704_v45, %v4703_v30  ;;  %v4725_v31 = vrot.slane %v4724_v32, 2  ;;  %v4738_v53 = vadd.f32 %v4737_v10, %v4736_v34  ;;  %v4751_v46 = vrot.slane %v4750_v48, 4 }
 0x4a1   :  { %v4712_v19 = vadd.f32 %v4711_v21, %v4710_v13  ;;  %v4719_v29 = vadd.f32 %v4718_v43, %v4717_v4  ;;  %v4732_v8 = vrot.slane %v4731_v12, 2  ;;  %v4745_v35 = vadd.f32 %v4744_v61, %v4743_v17 }
 0x4a2   :  { %v4706_v9 = vrot.slane %v4705_v1, 1  ;;  %v4726_v63 = vadd.f32 %v4725_v31, %v4724_v32  ;;  %v4739_v38 = vrot.slane %v4738_v53, 2  ;;  %v4752_v52 = vadd.f32 %v4751_v46, %v4750_v48 }
 0x4a3   :  { %v4713_v7 = vrot.slane %v4712_v19, 1  ;;  %v4720_v3 = vrot.slane %v4719_v29, 1  ;;  %v4733_v42 = vadd.f32 %v4732_v8, %v4731_v12  ;;  %v4746_v49 = vrot.slane %v4745_v35, 2 }
 0x4a4   :  { %v9222_v37 = vadd.f32 %v4706_v9, %v4705_v1  ;;  %v4727_v24 = vrot.slane %v4726_v63, 1  ;;  %v4740_v39 = vadd.f32 %v4739_v38, %v4738_v53  ;;  %v4753_v34 = vrot.slane %v4752_v52, 2 }
 0x4a5   :  { %v9224_v30 = vadd.f32 %v4713_v7, %v4712_v19  ;;  %v9226_v40 = vadd.f32 %v4720_v3, %v4719_v29  ;;  %v4734_v2 = vrot.slane %v4733_v42, 1  ;;  %v4747_v13 = vadd.f32 %v4746_v49, %v4745_v35 }
 0x4a6   :  { %v9228_v4 = vadd.f32 %v4727_v24, %v4726_v63  ;;  %v4741_v5 = vrot.slane %v4740_v39, 1  ;;  %v4757_v45 = vsel %vm1748_vm1, %v9112_v44, 0.0  ;;  %v4764_v21 = vsel %vm1748_vm1, %v9122_v16, 0.0 }
 0x4a7   :  { %v9232_v32 = vadd.f32 %v4734_v2, %v4733_v42  ;;  %v4748_v10 = vrot.slane %v4747_v13, 1  ;;  %v4758_v17 = vrot.slane %v4757_v45, 4  ;;  %v4754_v12 = vadd.f32 %v4753_v34, %v4752_v52 }
 0x4a8   :  { %v9236_v43 = vadd.f32 %v4741_v5, %v4740_v39  ;;  %v4765_v61 = vrot.slane %v4764_v21, 4  ;;  %v4771_v1 = vsel %vm1748_vm1, %v9125_v60, 0.0  ;;  %v4778_v44 = vsel %vm1748_vm1, %v9128_v22, 0.0 }
 0x4a9   :  { %v9240_v31 = vadd.f32 %v4748_v10, %v4747_v13  ;;  %v4759_v53 = vadd.f32 %v4758_v17, %v4757_v45  ;;  %v4772_v48 = vrot.slane %v4771_v1, 4  ;;  %v4755_v19 = vrot.slane %v4754_v12, 1 }
 0x4aa   :  { %v4766_v29 = vadd.f32 %v4765_v61, %v4764_v21  ;;  %v4779_v8 = vrot.slane %v4778_v44, 4  ;;  %v4785_v16 = vsel %vm1748_vm1, %v9131_v20, 0.0  ;;  %v4792_v38 = vsel %vm1748_vm1, %v9134_v23, 0.0 }
 0x4ab   :  { %v4760_v35 = vrot.slane %v4759_v53, 2  ;;  %v4773_v9 = vadd.f32 %v4772_v48, %v4771_v1  ;;  %v4786_v63 = vrot.slane %v4785_v16, 4  ;;  %v9248_v60 = vadd.f32 %v4755_v19, %v4754_v12 }
 0x4ac   :  { %v4767_v46 = vrot.slane %v4766_v29, 2  ;;  %v4780_v7 = vadd.f32 %v4779_v8, %v4778_v44  ;;  %v4793_v3 = vrot.slane %v4792_v38, 4  ;;  %v4799_v24 = vsel %vm1748_vm1, %v9137_v0, 0.0 }
 0x4ad   :  { %v4761_v42 = vadd.f32 %v4760_v35, %v4759_v53  ;;  %v4774_v49 = vrot.slane %v4773_v9, 2  ;;  %v4787_v22 = vadd.f32 %v4786_v63, %v4785_v16  ;;  %v4800_v2 = vrot.slane %v4799_v24, 4 }
 0x4ae   :  { %v4768_v39 = vadd.f32 %v4767_v46, %v4766_v29  ;;  %v4781_v52 = vrot.slane %v4780_v7, 2  ;;  %v4794_v20 = vadd.f32 %v4793_v3, %v4792_v38  ;;  %v4806_v23 = vsel %vm1748_vm1, %v9155_v33, 0.0 }
 0x4af   :  { %v4762_v13 = vrot.slane %v4761_v42, 1  ;;  %v4775_v5 = vadd.f32 %v4774_v49, %v4773_v9  ;;  %v4788_v34 = vrot.slane %v4787_v22, 2  ;;  %v4801_v21 = vadd.f32 %v4800_v2, %v4799_v24  ;;  %v10056_v2 = vld [vmem:[#allocation41_spill] sm:$0xff] }
 0x4b0   :  { %v4769_v45 = vrot.slane %v4768_v39, 1  ;;  %v4782_v10 = vadd.f32 %v4781_v52, %v4780_v7  ;;  %v4795_v17 = vrot.slane %v4794_v20, 2  ;;  %v4807_v53 = vrot.slane %v4806_v23, 4  ;;  %v10054_v52 = vld [vmem:[#allocation42_spill] sm:$0xff] }
 0x4b1   :  { %v9254_v12 = vadd.f32 %v4762_v13, %v4761_v42  ;;  %v4776_v61 = vrot.slane %v4775_v5, 1  ;;  %v4789_v1 = vadd.f32 %v4788_v34, %v4787_v22  ;;  %v4802_v19 = vrot.slane %v4801_v21, 2  ;;  %v10057_v34 = vld [vmem:[#allocation56_spill] sm:$0xff] }
 0x4b2   :  { %v9256_v0 = vadd.f32 %v4769_v45, %v4768_v39  ;;  %v4783_v48 = vrot.slane %v4782_v10, 1  ;;  %v4796_v44 = vadd.f32 %v4795_v17, %v4794_v20  ;;  %v4808_v16 = vadd.f32 %v4807_v53, %v4806_v23 }
 0x4b3   :  { %v9258_v29 = vadd.f32 %v4776_v61, %v4775_v5  ;;  %v4790_v8 = vrot.slane %v4789_v1, 1  ;;  %v10050_v33 = vrot.slane %v8962_v14, 2  ;;  %v4803_v38 = vadd.f32 %v4802_v19, %v4801_v21  ;;  %v10053_v14 = vld [vmem:[#allocation57_spill] sm:$0xff] }
 0x4b4   :  { %v9264_v9 = vadd.f32 %v4783_v48, %v4782_v10  ;;  %v4797_v63 = vrot.slane %v4796_v44, 1  ;;  %v10051_v46 = vrot.slane %v8966_v55, 1  ;;  %v4809_v42 = vrot.slane %v4808_v16, 2  ;;  %v10059_v10 = vld [vmem:[#allocation46_spill] sm:$0xff] }
 0x4b5   :  { %v5099_v35 = vsel %vm4957_vm7, %v10050_v33, %v9057_v41  ;;  %v9271_v3 = vadd.f32 %v4790_v8, %v4789_v1  ;;  %v10052_v49 = vrot.slane %v8978_v15, 6  ;;  %v5110_v24 = vrot.slane %v10053_v14, 3 }
 0x4b6   :  { %v9269_v7 = vsel %vm4960_vm8, %v10051_v46, %v5099_v35  ;;  %v9278_v41 = vadd.f32 %v4797_v63, %v4796_v44  ;;  %v4804_v39 = vrot.slane %v4803_v38, 1  ;;  %v10055_v20 = vrot.slane %v10054_v52, 5 }
 0x4b7   :  { %v5105_v22 = vsel %vm4945_vm3, %v10052_v49, %v9061_v58  ;;  %v5112_v13 = vrot.slane %v10056_v2, 2  ;;  %v4810_v5 = vadd.f32 %v4809_v42, %v4808_v16  ;;  %v10058_v23 = vrot.slane %v10057_v34, 4 }
 0x4b8   :  { %v5107_v55 = vsel %vm4948_vm4, %v10055_v20, %v5105_v22  ;;  %v5114_v15 = vrot.slane %v10059_v10, 1  ;;  %v5116_v58 = vrot.slane %v9160_v54, 7  ;;  %v9289_v17 = vadd.f32 %v4804_v39, %v4803_v38 }
 0x4b9   :  { %v5109_v45 = vsel %vm4951_vm5, %v10058_v23, %v5107_v55  ;;  %v5118_v61 = vrot.slane %v9162_v51, 6  ;;  %v5120_v1 = vrot.slane %v9164_v26, 5  ;;  %v4811_v53 = vrot.slane %v4810_v5, 1 }
 0x4ba   :  { %v5111_v21 = vsel %vm4954_vm6, %v5110_v24, %v5109_v45  ;;  %v5117_v44 = vsel %vm4942_vm2, %v5116_v58, %v9158_v50  ;;  %v5122_v19 = vrot.slane %v9172_v47, 4  ;;  %v5124_v16 = vrot.slane %v9174_v6, 3  ;;  %v10060_v45 = vld [vmem:[#allocation58_spill] sm:$0xff] }
 0x4bb   :  { %v5113_v48 = vsel %vm4957_vm7, %v5112_v13, %v5111_v21  ;;  %v5119_v54 = vsel %vm4945_vm3, %v5118_v61, %v5117_v44  ;;  %v5126_v33 = vrot.slane %v9176_v59, 2  ;;  %v4812_v51 = vadd.f32 %v4811_v53, %v4810_v5  ;;  %v10063_v21 = vld [vmem:[#allocation35_spill] sm:$0xff]  ;;  %v10064_v61 = vld [vmem:[#allocation6_spill] sm:$0xff]  ;;  %v10066_v44 = vld [vmem:[#allocation36_spill] sm:$0xff] }
 0x4bc   :  { %v9299_v8 = vsel %vm4960_vm8, %v5114_v15, %v5113_v48  ;;  %v5121_v26 = vsel %vm4948_vm4, %v5120_v1, %v5119_v54  ;;  %v5128_v35 = vrot.slane %v9180_v11, 1  ;;  %v5130_v63 = vrot.slane %v9192_v28, 7  ;;  %v10061_v15 = vld [vmem:[#allocation59_spill] sm:$0xff] }
 0x4bd   :  { %v5123_v50 = vsel %vm4951_vm5, %v5122_v19, %v5121_v26  ;;  %v5132_v47 = vrot.slane %v9194_v36, 6  ;;  %v5134_v38 = vrot.slane %v9196_v57, 5  ;;  %v5136_v46 = vrot.slane %v9198_v62, 4  ;;  %v10065_v48 = vld [vmem:[#allocation23_spill] sm:$0xff]  ;;  %v10068_v26 = vld [vmem:[#allocation34_spill] sm:$0xff] }
 0x4be   :  { %v5125_v42 = vsel %vm4954_vm6, %v5124_v16, %v5123_v50  ;;  %v5131_v6 = vsel %vm4942_vm2, %v5130_v63, %v9190_v56  ;;  %v5138_v59 = vrot.slane %v9206_v27, 3  ;;  %v5140_v49 = vrot.slane %v9212_v25, 2 }
 0x4bf   :  { %v5127_v11 = vsel %vm4957_vm7, %v5126_v33, %v5125_v42  ;;  %v5133_v28 = vsel %vm4945_vm3, %v5132_v47, %v5131_v6  ;;  %v5142_v22 = vrot.slane %v9214_v18, 1  ;;  %v5144_v36 = vrot.slane %v9224_v30, 7  ;;  %v10067_v33 = vld [vmem:[#allocation7_spill] sm:$0xff]  ;;  %v10071_v42 = vld [vmem:[#allocation22_spill] sm:$0xff] }
 0x4c0   :  { %v5129_v57 = vsel %vm4960_vm8, %v5128_v35, %v5127_v11  ;;  %v5135_v62 = vsel %vm4948_vm4, %v5134_v38, %v5133_v28  ;;  %v5146_v14 = vrot.slane %v9226_v40, 6  ;;  %v5148_v56 = vrot.slane %v9228_v4, 5  ;;  %v10069_v35 = vld [vmem:[#allocation19_spill] sm:$0xff] }
 0x4c1   :  { %v5137_v27 = vsel %vm4951_vm5, %v5136_v46, %v5135_v62  ;;  %v5145_v25 = vsel %vm4942_vm2, %v5144_v36, %v9222_v37  ;;  %v5150_v24 = vrot.slane %v9232_v32, 4  ;;  %v5152_v39 = vrot.slane %v9236_v43, 3  ;;  %v10070_v46 = vld [vmem:[#allocation21_spill] sm:$0xff] }
 0x4c2   :  { %v5139_v18 = vsel %vm4954_vm6, %v5138_v59, %v5137_v27  ;;  %v5147_v30 = vsel %vm4945_vm3, %v5146_v14, %v5145_v25  ;;  %v5154_v52 = vrot.slane %v9240_v31, 2  ;;  %v5156_v20 = vrot.slane %v9248_v60, 1 }
 0x4c3   :  { %v5141_v40 = vsel %vm4957_vm7, %v5140_v49, %v5139_v18  ;;  %v5149_v4 = vsel %vm4948_vm4, %v5148_v56, %v5147_v30  ;;  %v5158_v55 = vrot.slane %v9256_v0, 7  ;;  %v5160_v37 = vrot.slane %v9258_v29, 6 }
 0x4c4   :  { %v5143_v32 = vsel %vm4960_vm8, %v5142_v22, %v5141_v40  ;;  %v5151_v43 = vsel %vm4951_vm5, %v5150_v24, %v5149_v4  ;;  %v5162_v2 = vrot.slane %v9264_v9, 5  ;;  %v5164_v13 = vrot.slane %v9271_v3, 4 }
 0x4c5   :  { %v5153_v31 = vsel %vm4954_vm6, %v5152_v39, %v5151_v43  ;;  %v5159_v60 = vsel %vm4942_vm2, %v5158_v55, %v9254_v12  ;;  %v5166_v5 = vrot.slane %v9278_v41, 3  ;;  %v5168_v34 = vrot.slane %v9289_v17, 2  ;;  %v10062_v12 = vld [vmem:[#allocation20_spill] sm:$0xff] }
 0x4c6   :  { %v5155_v0 = vsel %vm4957_vm7, %v5154_v52, %v5153_v31  ;;  %v5161_v29 = vsel %vm4945_vm3, %v5160_v37, %v5159_v60  ;;  %v5170_v23 = vrot.slane %v4812_v51, 1  ;;  %v5324_v10 = vcombine.low %v10060_v45, %v9269_v7 }
 0x4c7   :  { %v5157_v9 = vsel %vm4960_vm8, %v5156_v20, %v5155_v0  ;;  %v5163_v3 = vsel %vm4948_vm4, %v5162_v2, %v5161_v29  ;;  %v5340_v58 = vcombine.low %v10061_v15, %v9299_v8  ;;  %v5252_v41 = vcombine.low %v10063_v21, %v10062_v12  ;;  %v10072_v12 = vld [vmem:[#allocation38_spill] sm:$0xff]  ;;  %v10073_v21 = vld [vmem:[#allocation40_spill] sm:$0xff] }
 0x4c8   :  { %v5165_v17 = vsel %vm4951_vm5, %v5164_v13, %v5163_v3  ;;  %v5332_v1 = vrot.slane %v5324_v10, %v10064_v61  ;;  %v5356_v53 = vcombine.low %v5129_v57, %v5157_v9  ;;  %v5284_v19 = vcombine.low %v10066_v44, %v10065_v48 }
 0x4c9   :  { %v5167_v54 = vsel %vm4954_vm6, %v5166_v5, %v5165_v17  ;;  %v5348_v16 = vrot.slane %v5340_v58, %v10064_v61  ;;  %v9363_v51 = vrot.slane %v5252_v41, %v10067_v33  ;;  %v5269_v63 = vcombine.high %v10069_v35, %v10068_v26  ;;  %v5487_v17 = vpop.permute.xlu0 %5486  ;;  %v10075_v26 = vld [vmem:[#allocation37_spill] sm:$0xff] }
 0x4ca   :  { %v5169_v50 = vsel %vm4957_vm7, %v5168_v34, %v5167_v54  ;;  %v5364_v47 = vrot.slane %v5356_v53, %v10064_v61  ;;  %v9370_v38 = vrot.slane %v5284_v19, %v10067_v33  ;;  %v5301_v6 = vcombine.high %v10071_v42, %v10070_v46 }
 0x4cb   :  { %v5171_v59 = vsel %vm4960_vm8, %v5170_v23, %v5169_v50  ;;  %v5388_v49 = vcombine.low %v5332_v1, %v5348_v16  ;;  %v5389_v11 = vcombine.high %v5332_v1, %v5348_v16  ;;  %v5283_v28 = vrot.slane %v5269_v63, %v10067_v33  ;;  %v5471_v1 = vpop.permute.xlu1 %5470 }
 0x4cc   :  { %v5372_v22 = vcombine.low %v5143_v32, %v5171_v59  ;;  %v5317_v36 = vcombine.high %v9363_v51, %v9370_v38  ;;  %v5315_v62 = vrot.slane %v5301_v6, %v10067_v33  ;;  %v5325_v14 = vcombine.high %v10060_v45, %v9269_v7 }
 0x4cd   :  { %v5341_v56 = vcombine.high %v10061_v15, %v9299_v8  ;;  %v5357_v27 = vcombine.high %v5129_v57, %v5157_v9  ;;  %v5373_v39 = vcombine.high %v5143_v32, %v5171_v59  ;;  %v5396_v18 = vrot.slane %v5388_v49, %v10067_v33 }
 0x4ce   :  { %v5380_v25 = vrot.slane %v5372_v22, %v10064_v61  ;;  %5462 = vrot.lane.b32.xlu0 %v5317_v36, %s5835_s10  ;;  %v5339_v24 = vrot.slane %v5325_v14, %v10064_v61  ;;  %v5403_v30 = vrot.slane %v5389_v11, %v10067_v33  ;;  %v5322_v4 = vcombine.low %v5283_v28, %v5315_v62 }
 0x4cf   :  { %v5355_v52 = vrot.slane %v5341_v56, %v10064_v61  ;;  %v5371_v20 = vrot.slane %v5357_v27, %v10064_v61  ;;  %v5387_v8 = vrot.slane %v5373_v39, %v10064_v61  ;;  %v5316_v37 = vcombine.low %v9363_v51, %v9370_v38  ;;  %v10074_v51 = vld [vmem:[#allocation45_spill] sm:$0xff]  ;;  %v5523_v27 = vld [vmem:[%s9451_s6 + $0x8] sm:$0xff] }
 0x4d0   :  { %v5420_v7 = vcombine.low %v5364_v47, %v5380_v25  ;;  %v5421_v40 = vcombine.high %v5364_v47, %v5380_v25  ;;  %v5323_v58 = vcombine.high %v5283_v28, %v5315_v62  ;;  %v5319_v41 = vcombine.high %v10073_v21, %v10072_v12  ;;  %v5522_v62 = vld [vmem:[%s9451_s6] sm:$0xff] }
 0x4d1   :  { %v5405_v57 = vcombine.high %v5339_v24, %v5355_v52  ;;  %v5404_v55 = vcombine.low %v5339_v24, %v5355_v52  ;;  %v5437_v2 = vcombine.high %v5371_v20, %v5387_v8  ;;  %v5436_v13 = vcombine.low %v5371_v20, %v5387_v8 }
 0x4d2   :  { %v5428_v32 = vrot.slane %v5420_v7, %v10067_v33  ;;  %v5435_v43 = vrot.slane %v5421_v40, %v10067_v33  ;;  %5494 = vrot.lane.b32.xlu0 %v5322_v4, %s5833_s5  ;;  %v5320_v35 = vcombine.low %v10075_v26, %v10074_v51  ;;  %v10076_v56 = vmov 0.0  }
 0x4d3   :  { %v5419_v31 = vrot.slane %v5405_v57, %v10067_v33  ;;  %v5412_v60 = vrot.slane %v5404_v55, %v10067_v33  ;;  %v5451_v0 = vrot.slane %v5437_v2, %v10067_v33  ;;  %v5444_v29 = vrot.slane %v5436_v13, %v10067_v33 }
 0x4d4   :  { %v5453_v5 = vcombine.high %v5396_v18, %v5428_v32  ;;  %v5454_v34 = vcombine.low %v5403_v30, %v5435_v43  ;;  %v5455_v23 = vcombine.high %v5403_v30, %v5435_v43  ;;  %v5452_v45 = vcombine.low %v5396_v18, %v5428_v32 }
 0x4d5   :  { %v5459_v10 = vcombine.high %v5419_v31, %v5451_v0  ;;  %v5457_v9 = vcombine.high %v5412_v60, %v5444_v29  ;;  %v5458_v3 = vcombine.low %v5419_v31, %v5451_v0  ;;  %v5456_v15 = vcombine.low %v5412_v60, %v5444_v29 }
 0x4d6   :  { %5464 = vrot.lane.b32.xlu1 %v5453_v5, %s5835_s10  ;;  %v5516_v47 = vsel %vm1748_vm1, %v5320_v35, %v5487_v17 }
 0x4d7   :  { %5488 = vrot.lane.b32.xlu0 %v5457_v9, %s5835_s10 }
 0x4da   :  { %5472 = vrot.lane.b32.xlu1 %v5454_v34, %s5833_s5 }
 0x4db   :  { %5496 = vrot.lane.b32.xlu0 %v5458_v3, %s5833_s5 }
 0x4de   :  { %5504 = vrot.lane.b32.xlu1 %v5459_v10, %s5834_s9 }
 0x4df   :  { %5502 = vrot.lane.b32.xlu0 %v5323_v58, %s5834_s9 }
 0x4e2   :  { %5480 = vrot.lane.b32.xlu1 %v5455_v23, %s5834_s9 }
 0x4e6   :  { %5478 = vrot.lane.b32.xlu1 %v5319_v41, %s5834_s9 }
 0x540   :  { %v5463_v61 = vpop.permute.xlu0 %5462 }
 0x541   :  { %v5508_v11 = vsel %vm1748_vm1, %v5316_v37, %v5463_v61 }
 0x542   :  { %v5511_v36 = vsel %vm5510_vm9, %v5508_v11, %v5471_v1 }
 0x544   :  { %v5495_v53 = vpop.permute.xlu0 %5494 }
 0x545   :  { %v5518_v42 = vsel %vm5510_vm9, %v5516_v47, %v5495_v53 }
 0x548   :  { %v5465_v48 = vpop.permute.xlu1 %5464 }
 0x549   :  { %v5489_v44 = vpop.permute.xlu0 %5488  ;;  %v5509_v46 = vsel %vm1748_vm1, %v5452_v45, %v5465_v48 }
 0x54a   :  { %v5517_v54 = vsel %vm1748_vm1, %v5456_v15, %v5489_v44 }
 0x54c   :  { %v5473_v19 = vpop.permute.xlu1 %5472 }
 0x54d   :  { %v5497_v16 = vpop.permute.xlu0 %5496  ;;  %v5512_v6 = vsel %vm5510_vm9, %v5509_v46, %v5473_v19 }
 0x54e   :  { %v5519_v33 = vsel %vm5510_vm9, %v5517_v54, %v5497_v16 }
 0x550   :  { %v5505_v63 = vpop.permute.xlu1 %5504 }
 0x551   :  { %v5521_v50 = vsel %vm5513_vm10, %v5519_v33, %v5505_v63  ;;  %v5503_v38 = vpop.permute.xlu0 %5502 }
 0x552   :  { %5558 = vmatprep.subr.mxu1 %v5521_v50  ;;  %v5520_v49 = vsel %vm5513_vm10, %v5518_v42, %v5503_v38 }
 0x554   :  { %v5481_v59 = vpop.permute.xlu1 %5480 }
 0x555   :  { %v5515_v28 = vsel %vm5513_vm10, %v5512_v6, %v5481_v59 }
 0x556   :  { %5559 = vmatpush1.msra.mxu1 %v5515_v28 }
 0x557   :  { %5560 = vmatprep.subr.mxu1 %v5520_v49 }
 0x558   :  { %v5479_v22 = vpop.permute.xlu1 %5478 }
 0x559   :  { %v5514_v14 = vsel %vm5513_vm10, %v5511_v36, %v5479_v22 }
 0x55a   :  { %5561 = vmatpush1.msra.mxu1 %v5514_v14 }
 0x55b   :  { %5679 = vmatmul.mubr.msk.f32.vlgmr.msra.gmra.mxu1 %vm32_vm0, %v5522_v62 }
 0x55c   :  { %5600 = vmatprep.mubr.f32.mxu1 %v10076_v56 }
 0x55f   :  { %5680 = vmatmul.mubr.msk.f32.gmra.mxu1 %vm32_vm0, %v5523_v27 }
 0x61b   :  { %v5596_v25 = vpop.f32.mrf.mxu1 }
 0x61c   :  { %v5615_v52 = vmul.f32 %v5596_v25, %v5596_v25 }
 0x61d   :  { %v5598_v24 = vpop.f32.mrf.mxu1 }
 0x61e   :  { %v5607_v39 = vadd.f32 %v5598_v24, %v5596_v25  ;;  %v5616_v18 = vmul.f32 %v5598_v24, %v5598_v24 }
 0x61f   :  { %v5602_v30 = vpop.f32.mrf.mxu1 }
 0x620   :  { %5608 = vadd.xlane.f32.xlu0 %v5607_v39  ;;  %v5619_v40 = vadd.f32 %v5616_v18, %v5615_v52  ;;  %v5617_v8 = vmul.f32 %v5602_v30, %v5602_v30 }
 0x621   :  { %v5604_v20 = vpop.f32.mrf.mxu1 }
 0x622   :  { %v5618_v7 = vmul.f32 %v5604_v20, %v5604_v20  ;;  %v5610_v4 = vadd.f32 %v5604_v20, %v5602_v30 }
 0x624   :  { %5620 = vadd.xlane.f32.xlu0 %v5619_v40  ;;  %5611 = vadd.xlane.f32.xlu1 %v5610_v4  ;;  %v5622_v57 = vadd.f32 %v5618_v7, %v5617_v8 }
 0x628   :  { %5623 = vadd.xlane.f32.xlu0 %v5622_v57 }
 0x6a9   :  { %v5609_v55 = vpop.xlane.xlu0 %5608 }
 0x6aa   :  { %v5613_v37 = vmul.f32 0.00390625, %v5609_v55 }
 0x6ac   :  { %v5627_v2 = vmul.f32 %v5613_v37, %v5613_v37  ;;  %v5633_v3 = vsub.f32 %v5596_v25, %v5613_v37  ;;  %v5634_v15 = vsub.f32 %v5598_v24, %v5613_v37 }
 0x6ad   :  { %v5621_v32 = vpop.xlane.xlu0 %5620  ;;  %v5612_v43 = vpop.xlane.xlu1 %5611 }
 0x6ae   :  { %v5625_v13 = vmul.f32 0.00390625, %v5621_v32  ;;  %v5614_v31 = vmul.f32 0.00390625, %v5612_v43 }
 0x6b0   :  { %v5629_v60 = vsub.f32 %v5625_v13, %v5627_v2  ;;  %v5628_v29 = vmul.f32 %v5614_v31, %v5614_v31  ;;  %v5635_v61 = vsub.f32 %v5602_v30, %v5614_v31  ;;  %v5636_v1 = vsub.f32 %v5604_v20, %v5614_v31 }
 0x6b1   :  { %v5624_v5 = vpop.xlane.xlu0 %5623 }
 0x6b2   :  { %v5631_v34 = vmax.f32 %v5629_v60, 0.0  ;;  %v5626_v0 = vmul.f32 0.00390625, %v5624_v5 }
 0x6b4   :  { %v5637_v23 = vadd.f32 1e-05, %v5631_v34  ;;  %v5630_v45 = vsub.f32 %v5626_v0, %v5628_v29 }
 0x6b6   :  { %5828 = vrsqrt.f32 %v5637_v23  ;;  %v5632_v10 = vmax.f32 %v5630_v45, 0.0 }
 0x6b8   :  { %v5638_v9 = vadd.f32 1e-05, %v5632_v10 }
 0x6ba   :  { %5830 = vrsqrt.f32 %v5638_v9 }
 0x6c3   :  { %v5829_v58 = vpop.eup %5828 }
 0x6c4   :  { %v5641_v12 = vmul.f32 %v5829_v58, %v5633_v3  ;;  %v5642_v21 = vmul.f32 %v5829_v58, %v5634_v15 }
 0x6c6   :  { %v5645_v41 = vmax.f32 %v5641_v12, 0.0  ;;  %v5646_v17 = vmax.f32 %v5642_v21, 0.0 }
 0x6c7   :  { %v5831_v53 = vpop.eup %5830 }
 0x6c8   :  { %5649 = vst [vmem:[%s9452_s7] sm:$0xff] %v5645_v41  ;;  %5650 = vst [vmem:[%s9452_s7 + $0x8] sm:$0xff] %v5646_v17  ;;  %v5643_v48 = vmul.f32 %v5831_v53, %v5635_v61  ;;  %v5644_v44 = vmul.f32 %v5831_v53, %v5636_v1 }
 0x6ca   :  { %v5647_v19 = vmax.f32 %v5643_v48, 0.0  ;;  %v5648_v54 = vmax.f32 %v5644_v44, 0.0 }
 0x6cc   :  { %5651 = vst [vmem:[%s9452_s7 + $0x10] sm:$0xff] %v5647_v19  ;;  %5652 = vst [vmem:[%s9452_s7 + $0x18] sm:$0xff] %v5648_v54 }

</bundles_post_ra>
